<compile_context>
chip_gen: v5e
topology: v5e:2x2
jax: 0.10.0
libtpu: 0.0.40
codegen_flags: <defaults>
</compile_context>

<pallas_src>
import math
import jax
import jax.numpy as jnp
from jax.experimental import pallas as pl
from jax.experimental.pallas import tpu as pltpu

# ---------------- small, module-consistent hyper-parameters ----------------
B = 2
K = 64                    # number of seed points
SEED_FEAT_DIM = 32        # module default is 256; kept small for the demo
NUM_PROPOSAL = 16
NSAMPLE = 8               # module uses 16; kept small for the demo
RADIUS = 0.3
NUM_CLASS = 4
NUM_HEADING_BIN = 4
NUM_SIZE_CLUSTER = 4
HIDDEN = 128              # PointnetSAModuleVotes mlp=[seed_feat_dim,128,128,128]
CIN = 3 + SEED_FEAT_DIM   # use_xyz=True prepends normalized xyz  (=35)
CIN_PAD = 128             # lane-aligned contraction dim for the first matmul (padded in-kernel)
OUT_DIM = 2 + 6 + 2 * NUM_HEADING_BIN + NUM_CLASS   # obj + rois + heading(scores+res) + sem_cls (=20)
OUT_PAD = 128             # lane-dense padded score / decode slabs
BP = B * NUM_PROPOSAL     # 32
BPS = B * NUM_PROPOSAL * NSAMPLE  # 256
DEC_FIELDS = 9            # heading(1) + center(3) + size(3) + bbox_mask(1) + bbox_sems(1)


def _elementwise_dtype():
    """bf16 activations only where the VPU has bf16 VALU (v6e/v7x); f32 elsewhere (v5e and older)."""
    try:
        kind = jax.devices()[0].device_kind.lower()
    except Exception:
        return jnp.float32
    if any(tag in kind for tag in ("v2", "v3", "v4", "v5")):
        return jnp.float32
    return jnp.bfloat16


ACT_DTYPE = _elementwise_dtype()


# =========================== fused Pallas kernel ===========================
def fused_proposal_kernel(x_ref, xyz_ref,
                          w1_ref, w2_ref, w3_ref, hw1_ref, hw2_ref, hw3_ref,
                          bias_ref,
                          feat_ref, scores_ref, dec_ref,
                          xpad_ref):
    """SA shared-MLP + max-pool + proposal head + decode_pred_box, all in VMEM."""

    def mm(a, w_ref):
        # weights are already bf16 in HBM/VMEM; activations are cast only if they are f32 (v5e path)
        return jnp.dot(a.astype(jnp.bfloat16), w_ref[...],
                       preferred_element_type=jnp.float32)

    bias = bias_ref[...]                                              # (8, 128) f32, one DMA
    b1, b2, b3 = bias[0:1, :], bias[1:2, :], bias[2:3, :]
    hb1, hb2, hb3 = bias[3:4, :], bias[4:5, :], bias[5:6, :]

    # ---- zero-pad the un-padded (BPS, CIN) bf16 input to the lane width inside VMEM ----
    xpad_ref[...] = jnp.zeros_like(xpad_ref)
    xpad_ref[:, 0:CIN] = x_ref[...]
    x = xpad_ref[...]                                                 # (BPS, CIN_PAD) bf16

    # ---- PointnetSAModuleVotes shared MLP (3x 1x1-conv + BN(eval, folded) + ReLU) ----
    h = jnp.maximum(mm(x, w1_ref) + b1, 0.0).astype(ACT_DTYPE)
    h = jnp.maximum(mm(h, w2_ref) + b2, 0.0).astype(ACT_DTYPE)
    h = jnp.maximum(mm(h, w3_ref) + b3, 0.0).astype(ACT_DTYPE)        # (BPS, HIDDEN)
    # PointNet++ max-pool over nsample (rows of each proposal are consecutive sublanes)
    f = jnp.max(h.reshape(BP, NSAMPLE, HIDDEN), axis=1)               # (BP, HIDDEN)
    feat_ref[...] = f.astype(jnp.float32)

    # ---- proposal head (StandardROIHeads approximation: 3x 1x1-conv) ----
    g = jnp.maximum(mm(f, hw1_ref) + hb1, 0.0).astype(ACT_DTYPE)
    g = jnp.maximum(mm(g, hw2_ref) + hb2, 0.0).astype(ACT_DTYPE)
    s = mm(g, hw3_ref) + hb3                                          # (BP, OUT_PAD) f32, lanes>=OUT_DIM are 0
    scores_ref[...] = s

    # ---- decode_pred_box / decode_scores ----
    nh = NUM_HEADING_BIN
    hscore = s[:, 8:8 + nh]
    hres_norm = s[:, 8 + nh:8 + 2 * nh]

    hcls = jnp.argmax(hscore, axis=-1, keepdims=True)                 # (BP, 1)
    lane_nh = jax.lax.broadcasted_iota(jnp.int32, hscore.shape, 1)
    sel_norm = jnp.sum(jnp.where(lane_nh == hcls, hres_norm, 0.0), axis=-1, keepdims=True)
    # single source of truth: only the *selected* residual is scaled here
    heading = hcls.astype(jnp.float32) * (2.0 * math.pi / nh) + sel_norm * (math.pi / nh)

    r = s[:, 2:8]                                                     # rois
    sx = r[:, 0:1] + r[:, 3:4]                                        # pred_box_size
    sy = r[:, 1:2] + r[:, 4:5]
    sz = r[:, 2:3] + r[:, 5:6]
    vx = (r[:, 0:1] - r[:, 3:4]) * 0.5                                # vote_xyz before rotation
    vy = (r[:, 1:2] - r[:, 4:5]) * 0.5
    vz = (r[:, 2:3] - r[:, 5:6]) * 0.5
    c = jnp.cos(heading)
    sn = jnp.sin(heading)
    # row-vector @ rotz(heading), rotz = [[c,-s,0],[s,c,0],[0,0,1]]; pred_center = new_xyz - vrot
    cx = xyz_ref[:, 0:1] - (vx * c + vy * sn)
    cy = xyz_ref[:, 1:2] - (-vx * sn + vy * c)
    cz = xyz_ref[:, 2:3] - vz

    mask = jnp.argmax(s[:, 0:2], axis=-1, keepdims=True).astype(jnp.float32)          # pred_bbox_mask
    sems = jnp.argmax(s[:, 8 + 2 * nh:8 + 2 * nh + NUM_CLASS],
                      axis=-1, keepdims=True).astype(jnp.float32)                     # pred_bbox_sems

    # lane-masked selects (VPU) over a zero slab instead of a lane-concatenate chain (XLU);
    # layout: [heading | center(3) | size(3) | mask | sems | zero pad], single lane-dense store
    lane = jax.lax.broadcasted_iota(jnp.int32, (BP, OUT_PAD), 1)
    dec = jnp.zeros((BP, OUT_PAD), jnp.float32)
    for i, col in enumerate((heading, cx, cy, cz, sx, sy, sz, mask, sems)):
        dec = jnp.where(lane == i, col, dec)
    dec_ref[...] = dec


def fused_proposal(grouped_bf16, new_xyz_flat, params):
    args = (grouped_bf16, new_xyz_flat) + tuple(params['weights']) + (params['biases'],)
    vmem = pl.BlockSpec(memory_space=pltpu.MemorySpace.VMEM)

    flops = 2 * (BPS * CIN_PAD * HIDDEN            # SA layer 1
                 + 2 * BPS * HIDDEN * HIDDEN       # SA layers 2-3
                 + 2 * BP * HIDDEN * HIDDEN        # head layers 1-2
                 + BP * HIDDEN * OUT_PAD)          # head layer 3
    bytes_in = (grouped_bf16.size * 2 + new_xyz_flat.size * 4
                + sum(int(w.size) * 2 for w in params['weights'])
                + int(params['biases'].size) * 4)
    bytes_out = (BP * HIDDEN + 2 * BP * OUT_PAD) * 4

    return pl.pallas_call(
        fused_proposal_kernel,
        out_shape=(
            jax.ShapeDtypeStruct((BP, HIDDEN), jnp.float32),    # aggregated features
            jax.ShapeDtypeStruct((BP, OUT_PAD), jnp.float32),   # padded head scores
            jax.ShapeDtypeStruct((BP, OUT_PAD), jnp.float32),   # packed decode slab
        ),
        in_specs=[vmem] * len(args),
        out_specs=(vmem, vmem, vmem),
        scratch_shapes=[pltpu.VMEM((BPS, CIN_PAD), jnp.bfloat16)],   # in-kernel lane padding
        cost_estimate=pl.CostEstimate(flops=flops, transcendentals=2 * BP,
                                      bytes_accessed=bytes_in + bytes_out),
    )(*args)


# =========================== glue (plain JAX) ===========================
def farthest_point_sample(xyz, npoint):
    """xyz: (B, K, 3) -> (B, npoint) int32; mirrors pointnet2 CUDA FPS (starts at index 0)."""
    def single(pts):
        k = pts.shape[0]
        def body(i, carry):
            dist, idxs, last = carry
            d = jnp.sum((pts - pts[last]) ** 2, axis=-1)
            dist = jnp.minimum(dist, d)
            nxt = jnp.argmax(dist).astype(jnp.int32)
            idxs = idxs.at[i].set(nxt)
            return dist, idxs, nxt
        dist0 = jnp.full((k,), 1e10, jnp.float32)
        idxs0 = jnp.zeros((npoint,), jnp.int32)
        _, idxs, _ = jax.lax.fori_loop(1, npoint, body, (dist0, idxs0, jnp.int32(0)))
        return idxs
    return jax.vmap(single)(xyz)


def ball_query(xyz, new_xyz, radius, nsample):
    """First `nsample` in-radius neighbors (original order), padded with the first hit.
    Falls back to index 0 if a proposal has zero in-radius neighbors."""
    k = xyz.shape[1]
    d2 = jnp.sum((new_xyz[:, :, None, :] - xyz[:, None, :, :]) ** 2, axis=-1)   # (B, P, K)
    in_r = d2 < radius ** 2
    order = jnp.where(in_r, jnp.arange(k, dtype=jnp.int32)[None, None, :], k)
    order = jnp.sort(order, axis=-1)[..., :nsample]
    first = order[..., 0:1]
    first = jnp.where(first < k, first, 0)
    return jnp.where(order < k, order, first).astype(jnp.int32)                 # (B, P, S)


def gather_points(x, idx):
    """x: (B, K, C), idx: (B, ...) -> (B, ..., C)."""
    return jax.vmap(lambda xb, ib: xb[ib])(x, idx)


def get_3d_box_batch_jax(box_size, heading, center):
    # TODO(synk): corner ordering / rotation axis follow the rotz convention used by
    # decode_pred_box; the repo's numpy get_3d_box_batch may use a different ordering.
    sx = jnp.array([1, 1, -1, -1, 1, 1, -1, -1], jnp.float32) * 0.5
    sy = jnp.array([1, -1, -1, 1, 1, -1, -1, 1], jnp.float32) * 0.5
    sz = jnp.array([1, 1, 1, 1, -1, -1, -1, -1], jnp.float32) * 0.5
    xc = box_size[..., 0:1] * sx
    yc = box_size[..., 1:2] * sy
    zc = box_size[..., 2:3] * sz
    c = jnp.cos(heading)[..., None]
    s = jnp.sin(heading)[..., None]
    xr = c * xc - s * yc
    yr = s * xc + c * yc
    return jnp.stack([xr, yr, zc], axis=-1) + center[..., None, :]              # (B, P, 8, 3)


def fold_bn(w, gamma, beta, mean, var, eps=1e-5):
    scale = gamma / jnp.sqrt(var + eps)
    return w * scale[None, :], (beta - mean * scale)[None, :]


def init_params(key):
    keys = iter(jax.random.split(key, 32))

    def bn_fold_layer(cin, cout):
        w = jax.random.normal(next(keys), (cin, cout), jnp.float32) / math.sqrt(cin)
        gamma = 1.0 + 0.1 * jax.random.normal(next(keys), (cout,), jnp.float32)
        beta = 0.1 * jax.random.normal(next(keys), (cout,), jnp.float32)
        mean = 0.1 * jax.random.normal(next(keys), (cout,), jnp.float32)
        var = jnp.abs(1.0 + 0.1 * jax.random.normal(next(keys), (cout,), jnp.float32))
        return fold_bn(w, gamma, beta, mean, var)

    (w1, b1), (w2, b2), (w3, b3) = [bn_fold_layer(cin, cout) for cin, cout in
                                    [(CIN, HIDDEN), (HIDDEN, HIDDEN), (HIDDEN, HIDDEN)]]
    # zero-pad the contraction dim of the first matmul to the lane width (35 -> 128)
    w1 = jnp.pad(w1, ((0, CIN_PAD - CIN), (0, 0)))

    (hw1, hb1), (hw2, hb2) = [bn_fold_layer(HIDDEN, HIDDEN) for _ in range(2)]
    hw3 = jax.random.normal(next(keys), (HIDDEN, OUT_DIM), jnp.float32) / math.sqrt(HIDDEN)
    hb3 = (0.1 * jax.random.normal(next(keys), (OUT_DIM,), jnp.float32))[None, :]
    # zero-pad the head output to 128 lanes so the kernel's score store is unmasked / lane-dense
    hw3 = jnp.pad(hw3, ((0, 0), (0, OUT_PAD - OUT_DIM)))
    hb3 = jnp.pad(hb3, ((0, 0), (0, OUT_PAD - OUT_DIM)))

    # bf16 weights in HBM (halves weight DMA; matmul operands are bf16 anyway)
    weights = tuple(w.astype(jnp.bfloat16) for w in (w1, w2, w3, hw1, hw2, hw3))
    # pack all biases into one (8, 128) f32 array: one input, one DMA
    biases = jnp.zeros((8, HIDDEN), jnp.float32)
    for i, b in enumerate((b1, b2, b3, hb1, hb2, hb3)):
        biases = biases.at[i].set(b[0])

    return {
        'weights': weights,
        'biases': biases,
        # mean_size_arr kept for interface parity (unused in forward for this FCOS variant)
        'mean_size_arr': jnp.ones((NUM_SIZE_CLUSTER, 3), jnp.float32),
    }


def forward(xyz, features_ncw, params):
    """xyz: (B, K, 3), features_ncw: (B, C, K) (PyTorch layout). Returns data_dict."""
    data_dict = {}
    feats = jnp.transpose(features_ncw, (0, 2, 1))                    # (B, K, C) channels-last
    pts = jnp.concatenate([xyz, feats], axis=-1)                      # (B, K, 3+C) -> single gather

    # ---- vote_aggregation grouping: FPS + ball-query + grouping (plain-JAX glue) ----
    fps_inds = farthest_point_sample(xyz, NUM_PROPOSAL)               # (B, P)
    new_xyz = gather_points(xyz, fps_inds)                            # (B, P, 3)
    nbr_idx = ball_query(xyz, new_xyz, RADIUS, NSAMPLE)               # (B, P, S)
    g = gather_points(pts, nbr_idx)                                   # (B, P, S, 3+C)
    g_xyz = (g[..., :3] - new_xyz[:, :, None, :]) / RADIUS            # normalize_xyz=True
    grouped = jnp.concatenate([g_xyz, g[..., 3:]], axis=-1)           # use_xyz=True, (B,P,S,CIN)
    # un-padded, bf16: the 93 zero lanes are created inside the kernel, not shipped through HBM
    grouped = grouped.reshape(BPS, CIN).astype(jnp.bfloat16)

    # ---- single fused Pallas call: SA-MLP + max-pool + head + decode ----
    feat, scores_pad, dec = fused_proposal(grouped, new_xyz.reshape(BP, 3), params)

    agg_feat = feat.reshape(B, NUM_PROPOSAL, HIDDEN)
    scores = scores_pad[:, :OUT_DIM].reshape(B, NUM_PROPOSAL, OUT_DIM)
    dec = dec.reshape(B, NUM_PROPOSAL, OUT_PAD)

    data_dict['aggregated_vote_xyz'] = new_xyz
    data_dict['aggregated_vote_features'] = agg_feat                  # == features.permute(0,2,1)
    data_dict['aggregated_vote_inds'] = fps_inds

    nh = NUM_HEADING_BIN
    data_dict['objectness_scores'] = scores[..., 0:2]
    data_dict['rois'] = scores[..., 2:8]
    data_dict['heading_scores'] = scores[..., 8:8 + nh]
    data_dict['heading_residuals_normalized'] = scores[..., 8 + nh:8 + 2 * nh]
    data_dict['heading_residuals'] = data_dict['heading_residuals_normalized'] * (math.pi / nh)
    data_dict['sem_cls_scores'] = scores[..., 8 + 2 * nh:]

    heading = dec[..., 0]
    center = dec[..., 1:4]
    size = dec[..., 4:7]
    data_dict['pred_heading'] = heading
    data_dict['pred_center'] = center
    data_dict['pred_size'] = size
    data_dict['pred_bbox_corner'] = get_3d_box_batch_jax(size, heading, center)
    data_dict['pred_bbox_feature'] = agg_feat
    data_dict['pred_bbox_mask'] = dec[..., 7].astype(jnp.int32)
    data_dict['pred_bbox_sems'] = dec[..., 8].astype(jnp.int32)
    # TODO(synk): mask_box / use_vote_weight / use_kl_loss training-time branches not implemented
    # (inference path only). bf16 MXU operands imply ~3-significant-digit agreement with f32 PyTorch.
    return data_dict


if __name__ == "__main__":
    key = jax.random.PRNGKey(0)
    kx, kf, kp = jax.random.split(key, 3)
    xyz = jax.random.normal(kx, (B, K, 3), jnp.float32) * 0.15            # (B, K, 3)
    features = jax.random.normal(kf, (B, SEED_FEAT_DIM, K), jnp.float32)  # PyTorch (B, C, K)
    params = init_params(kp)

    fwd = jax.jit(lambda x, f: forward(x, f, params))
    out = fwd(xyz, features)
    jax.block_until_ready(out)

    assert out['aggregated_vote_features'].shape == (B, NUM_PROPOSAL, HIDDEN)
    assert out['objectness_scores'].shape == (B, NUM_PROPOSAL, 2)
    assert out['heading_scores'].shape == (B, NUM_PROPOSAL, NUM_HEADING_BIN)
    assert out['sem_cls_scores'].shape == (B, NUM_PROPOSAL, NUM_CLASS)
    assert out['pred_center'].shape == (B, NUM_PROPOSAL, 3)
    assert out['pred_size'].shape == (B, NUM_PROPOSAL, 3)
    assert out['pred_heading'].shape == (B, NUM_PROPOSAL)
    assert out['pred_bbox_corner'].shape == (B, NUM_PROPOSAL, 8, 3)
    assert out['pred_bbox_mask'].dtype == jnp.int32
    assert out['pred_bbox_sems'].dtype == jnp.int32
    print("KERNEL_OK")
</pallas_src>

<mosaic_0001>
module attributes {stable_mosaic.version = 11 : i64} {
  func.func @fused_proposal_kernel(%arg0: memref<256x35xbf16, #tpu.memory_space<vmem>>, %arg1: memref<32x3xf32, #tpu.memory_space<vmem>>, %arg2: memref<128x128xbf16, #tpu.memory_space<vmem>>, %arg3: memref<128x128xbf16, #tpu.memory_space<vmem>>, %arg4: memref<128x128xbf16, #tpu.memory_space<vmem>>, %arg5: memref<128x128xbf16, #tpu.memory_space<vmem>>, %arg6: memref<128x128xbf16, #tpu.memory_space<vmem>>, %arg7: memref<128x128xbf16, #tpu.memory_space<vmem>>, %arg8: memref<8x128xf32, #tpu.memory_space<vmem>>, %arg9: memref<32x128xf32, #tpu.memory_space<vmem>>, %arg10: memref<32x128xf32, #tpu.memory_space<vmem>>, %arg11: memref<32x128xf32, #tpu.memory_space<vmem>>, %arg12: memref<256x128xbf16, #tpu.memory_space<vmem>>) attributes {dimension_semantics = [], scalar_prefetch = 0 : i64, scratch_operands = 1 : i64, tpu.core_type = #tpu.core_type<tc>} {
    %c0 = arith.constant 0 : index
    %c0_0 = arith.constant 0 : index
    %0 = vector.load %arg8[%c0, %c0_0] : memref<8x128xf32, #tpu.memory_space<vmem>>, vector<8x128xf32>
    %1 = vector.extract_strided_slice %0 {offsets = [0, 0], sizes = [1, 128], strides = [1, 1]} : vector<8x128xf32> to vector<1x128xf32>
    %2 = vector.extract_strided_slice %0 {offsets = [1, 0], sizes = [1, 128], strides = [1, 1]} : vector<8x128xf32> to vector<1x128xf32>
    %3 = vector.extract_strided_slice %0 {offsets = [2, 0], sizes = [1, 128], strides = [1, 1]} : vector<8x128xf32> to vector<1x128xf32>
    %4 = vector.extract_strided_slice %0 {offsets = [3, 0], sizes = [1, 128], strides = [1, 1]} : vector<8x128xf32> to vector<1x128xf32>
    %5 = vector.extract_strided_slice %0 {offsets = [4, 0], sizes = [1, 128], strides = [1, 1]} : vector<8x128xf32> to vector<1x128xf32>
    %6 = vector.extract_strided_slice %0 {offsets = [5, 0], sizes = [1, 128], strides = [1, 1]} : vector<8x128xf32> to vector<1x128xf32>
    %cst = arith.constant 0.000000e+00 : bf16
    %7 = vector.broadcast %cst : bf16 to vector<256x128xbf16>
    %c0_1 = arith.constant 0 : index
    %c0_2 = arith.constant 0 : index
    %8 = vector.load %arg12[%c0_1, %c0_2] : memref<256x128xbf16, #tpu.memory_space<vmem>>, vector<256x128xbf16>
    tpu.vector_store %arg12[%c0_1, %c0_2], %7 {strides = array<i32>} : memref<256x128xbf16, #tpu.memory_space<vmem>>, vector<256x128xbf16>,
    %c0_3 = arith.constant 0 : index
    %c0_4 = arith.constant 0 : index
    %9 = vector.load %arg0[%c0_3, %c0_4] : memref<256x35xbf16, #tpu.memory_space<vmem>>, vector<256x35xbf16>
    %c0_5 = arith.constant 0 : index
    %c0_6 = arith.constant 0 : index
    %10 = vector.load %arg12[%c0_5, %c0_6] : memref<256x128xbf16, #tpu.memory_space<vmem>>, vector<256x35xbf16>
    tpu.vector_store %arg12[%c0_5, %c0_6], %9 {strides = array<i32>} : memref<256x128xbf16, #tpu.memory_space<vmem>>, vector<256x35xbf16>,
    %c0_7 = arith.constant 0 : index
    %c0_8 = arith.constant 0 : index
    %11 = vector.load %arg12[%c0_7, %c0_8] : memref<256x128xbf16, #tpu.memory_space<vmem>>, vector<256x128xbf16>
    %c0_9 = arith.constant 0 : index
    %c0_10 = arith.constant 0 : index
    %12 = vector.load %arg2[%c0_9, %c0_10] : memref<128x128xbf16, #tpu.memory_space<vmem>>, vector<128x128xbf16>
    %cst_11 = arith.constant dense<0.000000e+00> : vector<256x128xf32>
    %13 = tpu.matmul %11, %12, %cst_11 {dimension_numbers = #tpu.dot_dimension_numbers<[1], [0], [0], [1], [0, 0, 1, 1], [], []>} : vector<256x128xbf16>, vector<128x128xbf16>, vector<256x128xf32> -> vector<256x128xf32>
    %14 = vector.broadcast %1 : vector<1x128xf32> to vector<256x128xf32>
    %15 = arith.addf %13, %14 : vector<256x128xf32>
    %cst_12 = arith.constant 0.000000e+00 : f32
    %16 = vector.broadcast %cst_12 : f32 to vector<256x128xf32>
    %17 = arith.maximumf %15, %16 : vector<256x128xf32>
    %18 = arith.truncf %17 : vector<256x128xf32> to vector<256x128xbf16>
    %c0_13 = arith.constant 0 : index
    %c0_14 = arith.constant 0 : index
    %19 = vector.load %arg3[%c0_13, %c0_14] : memref<128x128xbf16, #tpu.memory_space<vmem>>, vector<128x128xbf16>
    %cst_15 = arith.constant dense<0.000000e+00> : vector<256x128xf32>
    %20 = tpu.matmul %18, %19, %cst_15 {dimension_numbers = #tpu.dot_dimension_numbers<[1], [0], [0], [1], [0, 0, 1, 1], [], []>} : vector<256x128xbf16>, vector<128x128xbf16>, vector<256x128xf32> -> vector<256x128xf32>
    %21 = vector.broadcast %2 : vector<1x128xf32> to vector<256x128xf32>
    %22 = arith.addf %20, %21 : vector<256x128xf32>
    %cst_16 = arith.constant 0.000000e+00 : f32
    %23 = vector.broadcast %cst_16 : f32 to vector<256x128xf32>
    %24 = arith.maximumf %22, %23 : vector<256x128xf32>
    %25 = arith.truncf %24 : vector<256x128xf32> to vector<256x128xbf16>
    %c0_17 = arith.constant 0 : index
    %c0_18 = arith.constant 0 : index
    %26 = vector.load %arg4[%c0_17, %c0_18] : memref<128x128xbf16, #tpu.memory_space<vmem>>, vector<128x128xbf16>
    %cst_19 = arith.constant dense<0.000000e+00> : vector<256x128xf32>
    %27 = tpu.matmul %25, %26, %cst_19 {dimension_numbers = #tpu.dot_dimension_numbers<[1], [0], [0], [1], [0, 0, 1, 1], [], []>} : vector<256x128xbf16>, vector<128x128xbf16>, vector<256x128xf32> -> vector<256x128xf32>
    %28 = vector.broadcast %3 : vector<1x128xf32> to vector<256x128xf32>
    %29 = arith.addf %27, %28 : vector<256x128xf32>
    %cst_20 = arith.constant 0.000000e+00 : f32
    %30 = vector.broadcast %cst_20 : f32 to vector<256x128xf32>
    %31 = arith.maximumf %29, %30 : vector<256x128xf32>
    %32 = arith.truncf %31 : vector<256x128xf32> to vector<256x128xbf16>
    %33 = vector.shape_cast %32 : vector<256x128xbf16> to vector<32x8x128xbf16>
    %cst_21 = arith.constant dense<0xFF80> : vector<32x128xbf16>
    %34 = vector.multi_reduction <maximumf>, %33, %cst_21 [1] : vector<32x8x128xbf16> to vector<32x128xbf16>
    %35 = arith.extf %34 : vector<32x128xbf16> to vector<32x128xf32>
    %c0_22 = arith.constant 0 : index
    %c0_23 = arith.constant 0 : index
    %36 = vector.load %arg9[%c0_22, %c0_23] : memref<32x128xf32, #tpu.memory_space<vmem>>, vector<32x128xf32>
    tpu.vector_store %arg9[%c0_22, %c0_23], %35 {strides = array<i32>} : memref<32x128xf32, #tpu.memory_space<vmem>>, vector<32x128xf32>,
    %c0_24 = arith.constant 0 : index
    %c0_25 = arith.constant 0 : index
    %37 = vector.load %arg5[%c0_24, %c0_25] : memref<128x128xbf16, #tpu.memory_space<vmem>>, vector<128x128xbf16>
    %cst_26 = arith.constant dense<0.000000e+00> : vector<32x128xf32>
    %38 = tpu.matmul %34, %37, %cst_26 {dimension_numbers = #tpu.dot_dimension_numbers<[1], [0], [0], [1], [0, 0, 1, 1], [], []>} : vector<32x128xbf16>, vector<128x128xbf16>, vector<32x128xf32> -> vector<32x128xf32>
    %39 = vector.broadcast %4 : vector<1x128xf32> to vector<32x128xf32>
    %40 = arith.addf %38, %39 : vector<32x128xf32>
    %cst_27 = arith.constant 0.000000e+00 : f32
    %41 = vector.broadcast %cst_27 : f32 to vector<32x128xf32>
    %42 = arith.maximumf %40, %41 : vector<32x128xf32>
    %43 = arith.truncf %42 : vector<32x128xf32> to vector<32x128xbf16>
    %c0_28 = arith.constant 0 : index
    %c0_29 = arith.constant 0 : index
    %44 = vector.load %arg6[%c0_28, %c0_29] : memref<128x128xbf16, #tpu.memory_space<vmem>>, vector<128x128xbf16>
    %cst_30 = arith.constant dense<0.000000e+00> : vector<32x128xf32>
    %45 = tpu.matmul %43, %44, %cst_30 {dimension_numbers = #tpu.dot_dimension_numbers<[1], [0], [0], [1], [0, 0, 1, 1], [], []>} : vector<32x128xbf16>, vector<128x128xbf16>, vector<32x128xf32> -> vector<32x128xf32>
    %46 = vector.broadcast %5 : vector<1x128xf32> to vector<32x128xf32>
    %47 = arith.addf %45, %46 : vector<32x128xf32>
    %cst_31 = arith.constant 0.000000e+00 : f32
    %48 = vector.broadcast %cst_31 : f32 to vector<32x128xf32>
    %49 = arith.maximumf %47, %48 : vector<32x128xf32>
    %50 = arith.truncf %49 : vector<32x128xf32> to vector<32x128xbf16>
    %c0_32 = arith.constant 0 : index
    %c0_33 = arith.constant 0 : index
    %51 = vector.load %arg7[%c0_32, %c0_33] : memref<128x128xbf16, #tpu.memory_space<vmem>>, vector<128x128xbf16>
    %cst_34 = arith.constant dense<0.000000e+00> : vector<32x128xf32>
    %52 = tpu.matmul %50, %51, %cst_34 {dimension_numbers = #tpu.dot_dimension_numbers<[1], [0], [0], [1], [0, 0, 1, 1], [], []>} : vector<32x128xbf16>, vector<128x128xbf16>, vector<32x128xf32> -> vector<32x128xf32>
    %53 = vector.broadcast %6 : vector<1x128xf32> to vector<32x128xf32>
    %54 = arith.addf %52, %53 : vector<32x128xf32>
    %c0_35 = arith.constant 0 : index
    %c0_36 = arith.constant 0 : index
    %55 = vector.load %arg10[%c0_35, %c0_36] : memref<32x128xf32, #tpu.memory_space<vmem>>, vector<32x128xf32>
    tpu.vector_store %arg10[%c0_35, %c0_36], %54 {strides = array<i32>} : memref<32x128xf32, #tpu.memory_space<vmem>>, vector<32x128xf32>,
    %56 = vector.extract_strided_slice %54 {offsets = [0, 8], sizes = [32, 4], strides = [1, 1]} : vector<32x128xf32> to vector<32x4xf32>
    %57 = vector.extract_strided_slice %54 {offsets = [0, 12], sizes = [32, 4], strides = [1, 1]} : vector<32x128xf32> to vector<32x4xf32>
    %58 = tpu.reduce_index %56 {axis = 1 : i32, kind = #tpu.reduction_kind<arg_max>} : vector<32x4xf32> -> vector<32xi32>
    %59 = vector.shape_cast %58 : vector<32xi32> to vector<32x1xi32>
    %60 = tpu.iota {dimensions = array<i32: 1>} : vector<32x4xi32>
    %61 = vector.broadcast %59 : vector<32x1xi32> to vector<32x4xi32>
    %62 = arith.cmpi eq, %60, %61 : vector<32x4xi32>
    %cst_37 = arith.constant 0.000000e+00 : f32
    %63 = vector.broadcast %cst_37 : f32 to vector<32x4xf32>
    %64 = arith.select %62, %57, %63 : vector<32x4xi1>, vector<32x4xf32>
    %cst_38 = arith.constant dense<0.000000e+00> : vector<32xf32>
    %65 = vector.multi_reduction <add>, %64, %cst_38 [1] : vector<32x4xf32> to vector<32xf32>
    %66 = vector.shape_cast %65 : vector<32xf32> to vector<32x1xf32>
    %67 = arith.sitofp %59 : vector<32x1xi32> to vector<32x1xf32>
    %cst_39 = arith.constant 1.57079637 : f32
    %68 = vector.broadcast %cst_39 : f32 to vector<32x1xf32>
    %69 = arith.mulf %67, %68 : vector<32x1xf32>
    %cst_40 = arith.constant 0.785398185 : f32
    %70 = vector.broadcast %cst_40 : f32 to vector<32x1xf32>
    %71 = arith.mulf %66, %70 : vector<32x1xf32>
    %72 = arith.addf %69, %71 : vector<32x1xf32>
    %73 = vector.extract_strided_slice %54 {offsets = [0, 2], sizes = [32, 6], strides = [1, 1]} : vector<32x128xf32> to vector<32x6xf32>
    %74 = vector.extract_strided_slice %73 {offsets = [0, 0], sizes = [32, 1], strides = [1, 1]} : vector<32x6xf32> to vector<32x1xf32>
    %75 = vector.extract_strided_slice %73 {offsets = [0, 3], sizes = [32, 1], strides = [1, 1]} : vector<32x6xf32> to vector<32x1xf32>
    %76 = arith.addf %74, %75 : vector<32x1xf32>
    %77 = vector.extract_strided_slice %73 {offsets = [0, 1], sizes = [32, 1], strides = [1, 1]} : vector<32x6xf32> to vector<32x1xf32>
    %78 = vector.extract_strided_slice %73 {offsets = [0, 4], sizes = [32, 1], strides = [1, 1]} : vector<32x6xf32> to vector<32x1xf32>
    %79 = arith.addf %77, %78 : vector<32x1xf32>
    %80 = vector.extract_strided_slice %73 {offsets = [0, 2], sizes = [32, 1], strides = [1, 1]} : vector<32x6xf32> to vector<32x1xf32>
    %81 = vector.extract_strided_slice %73 {offsets = [0, 5], sizes = [32, 1], strides = [1, 1]} : vector<32x6xf32> to vector<32x1xf32>
    %82 = arith.addf %80, %81 : vector<32x1xf32>
    %83 = vector.extract_strided_slice %73 {offsets = [0, 0], sizes = [32, 1], strides = [1, 1]} : vector<32x6xf32> to vector<32x1xf32>
    %84 = vector.extract_strided_slice %73 {offsets = [0, 3], sizes = [32, 1], strides = [1, 1]} : vector<32x6xf32> to vector<32x1xf32>
    %85 = arith.subf %83, %84 : vector<32x1xf32>
    %cst_41 = arith.constant 5.000000e-01 : f32
    %86 = vector.broadcast %cst_41 : f32 to vector<32x1xf32>
    %87 = arith.mulf %85, %86 : vector<32x1xf32>
    %88 = vector.extract_strided_slice %73 {offsets = [0, 1], sizes = [32, 1], strides = [1, 1]} : vector<32x6xf32> to vector<32x1xf32>
    %89 = vector.extract_strided_slice %73 {offsets = [0, 4], sizes = [32, 1], strides = [1, 1]} : vector<32x6xf32> to vector<32x1xf32>
    %90 = arith.subf %88, %89 : vector<32x1xf32>
    %cst_42 = arith.constant 5.000000e-01 : f32
    %91 = vector.broadcast %cst_42 : f32 to vector<32x1xf32>
    %92 = arith.mulf %90, %91 : vector<32x1xf32>
    %93 = vector.extract_strided_slice %73 {offsets = [0, 2], sizes = [32, 1], strides = [1, 1]} : vector<32x6xf32> to vector<32x1xf32>
    %94 = vector.extract_strided_slice %73 {offsets = [0, 5], sizes = [32, 1], strides = [1, 1]} : vector<32x6xf32> to vector<32x1xf32>
    %95 = arith.subf %93, %94 : vector<32x1xf32>
    %cst_43 = arith.constant 5.000000e-01 : f32
    %96 = vector.broadcast %cst_43 : f32 to vector<32x1xf32>
    %97 = arith.mulf %95, %96 : vector<32x1xf32>
    %98 = math.cos %72 : vector<32x1xf32>
    %99 = math.sin %72 : vector<32x1xf32>
    %c0_44 = arith.constant 0 : index
    %c0_45 = arith.constant 0 : index
    %100 = vector.load %arg1[%c0_44, %c0_45] : memref<32x3xf32, #tpu.memory_space<vmem>>, vector<32x1xf32>
    %101 = arith.mulf %87, %98 : vector<32x1xf32>
    %102 = arith.mulf %92, %99 : vector<32x1xf32>
    %103 = arith.addf %101, %102 : vector<32x1xf32>
    %104 = arith.subf %100, %103 : vector<32x1xf32>
    %c0_46 = arith.constant 0 : index
    %c1 = arith.constant 1 : index
    %105 = vector.load %arg1[%c0_46, %c1] : memref<32x3xf32, #tpu.memory_space<vmem>>, vector<32x1xf32>
    %cst_47 = arith.constant 0.000000e+00 : f32
    %106 = vector.broadcast %cst_47 : f32 to vector<32x1xf32>
    %107 = arith.subf %106, %87 : vector<32x1xf32>
    %108 = arith.mulf %107, %99 : vector<32x1xf32>
    %109 = arith.mulf %92, %98 : vector<32x1xf32>
    %110 = arith.addf %108, %109 : vector<32x1xf32>
    %111 = arith.subf %105, %110 : vector<32x1xf32>
    %c0_48 = arith.constant 0 : index
    %c2 = arith.constant 2 : index
    %112 = vector.load %arg1[%c0_48, %c2] : memref<32x3xf32, #tpu.memory_space<vmem>>, vector<32x1xf32>
    %113 = arith.subf %112, %97 : vector<32x1xf32>
    %114 = vector.extract_strided_slice %54 {offsets = [0, 0], sizes = [32, 2], strides = [1, 1]} : vector<32x128xf32> to vector<32x2xf32>
    %115 = tpu.reduce_index %114 {axis = 1 : i32, kind = #tpu.reduction_kind<arg_max>} : vector<32x2xf32> -> vector<32xi32>
    %116 = vector.shape_cast %115 : vector<32xi32> to vector<32x1xi32>
    %117 = arith.sitofp %116 : vector<32x1xi32> to vector<32x1xf32>
    %118 = vector.extract_strided_slice %54 {offsets = [0, 16], sizes = [32, 4], strides = [1, 1]} : vector<32x128xf32> to vector<32x4xf32>
    %119 = tpu.reduce_index %118 {axis = 1 : i32, kind = #tpu.reduction_kind<arg_max>} : vector<32x4xf32> -> vector<32xi32>
    %120 = vector.shape_cast %119 : vector<32xi32> to vector<32x1xi32>
    %121 = arith.sitofp %120 : vector<32x1xi32> to vector<32x1xf32>
    %122 = tpu.iota {dimensions = array<i32: 1>} : vector<32x128xi32>
    %cst_49 = arith.constant 0.000000e+00 : f32
    %123 = vector.broadcast %cst_49 : f32 to vector<32x128xf32>
    %c0_i32 = arith.constant 0 : i32
    %124 = vector.broadcast %c0_i32 : i32 to vector<32x128xi32>
    %125 = arith.cmpi eq, %122, %124 : vector<32x128xi32>
    %126 = vector.shape_cast %72 : vector<32x1xf32> to vector<32x1xf32>
    %127 = vector.broadcast %126 : vector<32x1xf32> to vector<32x128xf32>
    %128 = arith.select %125, %127, %123 : vector<32x128xi1>, vector<32x128xf32>
    %c1_i32 = arith.constant 1 : i32
    %129 = vector.broadcast %c1_i32 : i32 to vector<32x128xi32>
    %130 = arith.cmpi eq, %122, %129 : vector<32x128xi32>
    %131 = vector.shape_cast %104 : vector<32x1xf32> to vector<32x1xf32>
    %132 = vector.broadcast %131 : vector<32x1xf32> to vector<32x128xf32>
    %133 = arith.select %130, %132, %128 : vector<32x128xi1>, vector<32x128xf32>
    %c2_i32 = arith.constant 2 : i32
    %134 = vector.broadcast %c2_i32 : i32 to vector<32x128xi32>
    %135 = arith.cmpi eq, %122, %134 : vector<32x128xi32>
    %136 = vector.shape_cast %111 : vector<32x1xf32> to vector<32x1xf32>
    %137 = vector.broadcast %136 : vector<32x1xf32> to vector<32x128xf32>
    %138 = arith.select %135, %137, %133 : vector<32x128xi1>, vector<32x128xf32>
    %c3_i32 = arith.constant 3 : i32
    %139 = vector.broadcast %c3_i32 : i32 to vector<32x128xi32>
    %140 = arith.cmpi eq, %122, %139 : vector<32x128xi32>
    %141 = vector.shape_cast %113 : vector<32x1xf32> to vector<32x1xf32>
    %142 = vector.broadcast %141 : vector<32x1xf32> to vector<32x128xf32>
    %143 = arith.select %140, %142, %138 : vector<32x128xi1>, vector<32x128xf32>
    %c4_i32 = arith.constant 4 : i32
    %144 = vector.broadcast %c4_i32 : i32 to vector<32x128xi32>
    %145 = arith.cmpi eq, %122, %144 : vector<32x128xi32>
    %146 = vector.shape_cast %76 : vector<32x1xf32> to vector<32x1xf32>
    %147 = vector.broadcast %146 : vector<32x1xf32> to vector<32x128xf32>
    %148 = arith.select %145, %147, %143 : vector<32x128xi1>, vector<32x128xf32>
    %c5_i32 = arith.constant 5 : i32
    %149 = vector.broadcast %c5_i32 : i32 to vector<32x128xi32>
    %150 = arith.cmpi eq, %122, %149 : vector<32x128xi32>
    %151 = vector.shape_cast %79 : vector<32x1xf32> to vector<32x1xf32>
    %152 = vector.broadcast %151 : vector<32x1xf32> to vector<32x128xf32>
    %153 = arith.select %150, %152, %148 : vector<32x128xi1>, vector<32x128xf32>
    %c6_i32 = arith.constant 6 : i32
    %154 = vector.broadcast %c6_i32 : i32 to vector<32x128xi32>
    %155 = arith.cmpi eq, %122, %154 : vector<32x128xi32>
    %156 = vector.shape_cast %82 : vector<32x1xf32> to vector<32x1xf32>
    %157 = vector.broadcast %156 : vector<32x1xf32> to vector<32x128xf32>
    %158 = arith.select %155, %157, %153 : vector<32x128xi1>, vector<32x128xf32>
    %c7_i32 = arith.constant 7 : i32
    %159 = vector.broadcast %c7_i32 : i32 to vector<32x128xi32>
    %160 = arith.cmpi eq, %122, %159 : vector<32x128xi32>
    %161 = vector.shape_cast %117 : vector<32x1xf32> to vector<32x1xf32>
    %162 = vector.broadcast %161 : vector<32x1xf32> to vector<32x128xf32>
    %163 = arith.select %160, %162, %158 : vector<32x128xi1>, vector<32x128xf32>
    %c8_i32 = arith.constant 8 : i32
    %164 = vector.broadcast %c8_i32 : i32 to vector<32x128xi32>
    %165 = arith.cmpi eq, %122, %164 : vector<32x128xi32>
    %166 = vector.shape_cast %121 : vector<32x1xf32> to vector<32x1xf32>
    %167 = vector.broadcast %166 : vector<32x1xf32> to vector<32x128xf32>
    %168 = arith.select %165, %167, %163 : vector<32x128xi1>, vector<32x128xf32>
    %c0_50 = arith.constant 0 : index
    %c0_51 = arith.constant 0 : index
    %169 = vector.load %arg11[%c0_50, %c0_51] : memref<32x128xf32, #tpu.memory_space<vmem>>, vector<32x128xf32>
    tpu.vector_store %arg11[%c0_50, %c0_51], %168 {strides = array<i32>} : memref<32x128xf32, #tpu.memory_space<vmem>>, vector<32x128xf32>,
    return
  }
}

</mosaic_0001>

<bundles_post_ra>
// kernel: custom-call.6
= control target key start
LH: loop header
LB: loop body
LE: loop exit
PB: predicated region body
PF: predicated region fallthrough
CT: control target
= control target key end

     0   :  { %s6_s0 = inlined_call_operand.vmem [shape: f32[2,64], index: 0, kind: output, shape index: {}]  }

// kernel: _lambda_.1
= control target key start
LH: loop header
LB: loop body
LE: loop exit
PB: predicated region body
PF: predicated region fallthrough
CT: control target
= control target key end

     0   :  { %v5232_v1 = vmov 0   ;;  %vm101_vm0 = vcmask 281600   ;;  %vm1204_vm1 = vcmask 1041409   ;;  %vm1206_vm2 = vcmask 1042434   ;;  %s3729_s14 = smov 125   ;;  %s3730_s15 = smov 116   ;;  %s5207_s2 = inlined_call_operand.vmem [shape: bf16[128,128], index: 2, kind: input, shape index: {}]   ;;  %s5208_s0 = inlined_call_operand.vmem [shape: bf16[256,35], index: 0, kind: input, shape index: {}]   ;;  %s5209_s3 = inlined_call_operand.vmem [shape: bf16[128,128], index: 3, kind: input, shape index: {}]   ;;  %s5210_s8 = inlined_call_operand.vmem [shape: f32[8,128], index: 8, kind: input, shape index: {}]   ;;  %s5211_s4 = inlined_call_operand.vmem [shape: bf16[128,128], index: 4, kind: input, shape index: {}]   ;;  %s5212_s9 = inlined_call_operand.vmem [shape: f32[32,128], index: 9, kind: output, shape index: {0}]   ;;  %s5213_s5 = inlined_call_operand.vmem [shape: bf16[128,128], index: 5, kind: input, shape index: {}]   ;;  %s5214_s6 = inlined_call_operand.vmem [shape: bf16[128,128], index: 6, kind: input, shape index: {}]   ;;  %s5215_s7 = inlined_call_operand.vmem [shape: bf16[128,128], index: 7, kind: input, shape index: {}]   ;;  %s5216_s10 = inlined_call_operand.vmem [shape: f32[32,128], index: 10, kind: output, shape index: {1}]   ;;  %s5217_s1 = inlined_call_operand.vmem [shape: f32[32,3], index: 1, kind: input, shape index: {}]   ;;  %s5218_s11 = inlined_call_operand.vmem [shape: f32[32,128], index: 11, kind: output, shape index: {2}]  }
   0x1   :  { %v3623_v0 = vld [vmem:[%s5207_s2 + $0x38] sm:$0xff]  ;;  %37 = vst [vmem:[#allocation2] sm:$0xf] %v5232_v1  ;;  %v3622_v2 = vld [vmem:[%s5207_s2 + $0x30] sm:$0xff]  ;;  %v69_v3 = vld [vmem:[%s5208_s0] sm:$0xf] }
   0x2   :  { %38 = vst [vmem:[#allocation2 + $0x4] sm:$0xf] %v5232_v1  ;;  %327 = vmatpush.bf16.msra.mxu0 %v3623_v0  ;;  %3664 = vmatpush.bf16.msra.mxu3 %v3623_v0  ;;  %v70_v4 = vld [vmem:[%s5208_s0 + $0x4] sm:$0xf]  ;;  %v3621_v5 = vld [vmem:[%s5207_s2 + $0x28] sm:$0xff]  ;;  %v3619_v7 = vld [vmem:[%s5207_s2 + $0x18] sm:$0xff] }
   0x3   :  { %39 = vst [vmem:[#allocation2 + $0x8] sm:$0xf] %v5232_v1  ;;  %v3620_v6 = vld [vmem:[%s5207_s2 + $0x20] sm:$0xff]  ;;  %v3618_v8 = vld [vmem:[%s5207_s2 + $0x10] sm:$0xff]  ;;  %v3617_v9 = vld [vmem:[%s5207_s2 + $0x8] sm:$0xff]  ;;  %vm1208_vm3 = vcmask 1043459  }
   0x4   :  { %102 = vst.msk [vmem:[#allocation2] sm:$0xf] %vm101_vm0, %v69_v3  ;;  %v3616_v10 = vld [vmem:[%s5207_s2] sm:$0xff]  ;;  %v71_v12 = vld [vmem:[%s5208_s0 + $0x8] sm:$0xf]  ;;  %v3631_v28 = vld [vmem:[%s5209_s3 + $0x38] sm:$0xff] }
   0x5   :  { %103 = vst.msk [vmem:[#allocation2 + $0x4] sm:$0xf] %vm101_vm0, %v70_v4  ;;  %v72_v13 = vld [vmem:[%s5208_s0 + $0xc] sm:$0xf]  ;;  %v73_v14 = vld [vmem:[%s5208_s0 + $0x10] sm:$0xf]  ;;  %529 = vmatpush.bf16.msra.mxu1 %v3631_v28 }
   0x6   :  { %40 = vst [vmem:[#allocation2 + $0xc] sm:$0xf] %v5232_v1  ;;  %328 = vmatpush.bf16.msra.mxu0 %v3622_v2  ;;  %3665 = vmatpush.bf16.msra.mxu3 %v3622_v2  ;;  %v74_v15 = vld [vmem:[%s5208_s0 + $0x14] sm:$0xf]  ;;  %v75_v16 = vld [vmem:[%s5208_s0 + $0x18] sm:$0xf] }
   0x7   :  { %41 = vst [vmem:[#allocation2 + $0x10] sm:$0xf] %v5232_v1  ;;  %v76_v17 = vld [vmem:[%s5208_s0 + $0x1c] sm:$0xf]  ;;  %v77_v19 = vld [vmem:[%s5208_s0 + $0x20] sm:$0xf] }
   0x8   :  { %42 = vst [vmem:[#allocation2 + $0x14] sm:$0xf] %v5232_v1  ;;  %v78_v20 = vld [vmem:[%s5208_s0 + $0x24] sm:$0xf]  ;;  %v79_v22 = vld [vmem:[%s5208_s0 + $0x28] sm:$0xf] }
   0x9   :  { %43 = vst [vmem:[#allocation2 + $0x18] sm:$0xf] %v5232_v1  ;;  %v80_v23 = vld [vmem:[%s5208_s0 + $0x2c] sm:$0xf]  ;;  %v81_v25 = vld [vmem:[%s5208_s0 + $0x30] sm:$0xf] }
   0xa   :  { %44 = vst [vmem:[#allocation2 + $0x1c] sm:$0xf] %v5232_v1  ;;  %329 = vmatpush.bf16.msra.mxu0 %v3621_v5  ;;  %3666 = vmatpush.bf16.msra.mxu3 %v3621_v5  ;;  %v82_v26 = vld [vmem:[%s5208_s0 + $0x34] sm:$0xf]  ;;  %v83_v29 = vld [vmem:[%s5208_s0 + $0x38] sm:$0xf] }
   0xb   :  { %45 = vst [vmem:[#allocation2 + $0x20] sm:$0xf] %v5232_v1  ;;  %v84_v30 = vld [vmem:[%s5208_s0 + $0x3c] sm:$0xf]  ;;  %v3630_v32 = vld [vmem:[%s5209_s3 + $0x30] sm:$0xff]  ;;  %v3629_v33 = vld [vmem:[%s5209_s3 + $0x28] sm:$0xff] }
   0xc   :  { %46 = vst [vmem:[#allocation2 + $0x24] sm:$0xf] %v5232_v1  ;;  %v3600_v11 = vld [vmem:[#allocation2] sm:$0xff]  ;;  %530 = vmatpush.bf16.msra.mxu1 %v3630_v32  ;;  %v3627_v37 = vld [vmem:[%s5209_s3 + $0x18] sm:$0xff]  ;;  %v3626_v39 = vld [vmem:[%s5209_s3 + $0x10] sm:$0xff]  ;;  %vm1210_vm4 = vcmask 1044484  }
   0xd   :  { %47 = vst [vmem:[#allocation2 + $0x28] sm:$0xf] %v5232_v1  ;;  %v3628_v34 = vld [vmem:[%s5209_s3 + $0x20] sm:$0xff]  ;;  %v3625_v40 = vld [vmem:[%s5209_s3 + $0x8] sm:$0xff]  ;;  %v97_v45 = vld [vmem:[%s5208_s0 + $0x70] sm:$0xf] }
   0xe   :  { %48 = vst [vmem:[#allocation2 + $0x2c] sm:$0xf] %v5232_v1  ;;  %330 = vmatpush.bf16.msra.mxu0 %v3620_v6  ;;  %3667 = vmatpush.bf16.msra.mxu3 %v3620_v6  ;;  %v85_v35 = vld [vmem:[%s5208_s0 + $0x40] sm:$0xf]  ;;  %v86_v36 = vld [vmem:[%s5208_s0 + $0x44] sm:$0xf] }
   0xf   :  { %49 = vst [vmem:[#allocation2 + $0x30] sm:$0xf] %v5232_v1  ;;  %v87_v41 = vld [vmem:[%s5208_s0 + $0x48] sm:$0xf]  ;;  %v88_v42 = vld [vmem:[%s5208_s0 + $0x4c] sm:$0xf] }
  0x10   :  { %50 = vst [vmem:[#allocation2 + $0x34] sm:$0xf] %v5232_v1  ;;  %531 = vmatpush.bf16.msra.mxu1 %v3629_v33  ;;  %v3624_v43 = vld [vmem:[%s5209_s3] sm:$0xff]  ;;  %v98_v46 = vld [vmem:[%s5208_s0 + $0x74] sm:$0xf]  ;;  %vm1212_vm5 = vcmask 1045509  }
  0x11   :  { %51 = vst [vmem:[#allocation2 + $0x38] sm:$0xf] %v5232_v1  ;;  %v89_v47 = vld [vmem:[%s5208_s0 + $0x50] sm:$0xf]  ;;  %v90_v48 = vld [vmem:[%s5208_s0 + $0x54] sm:$0xf] }
  0x12   :  { %52 = vst [vmem:[#allocation2 + $0x3c] sm:$0xf] %v5232_v1  ;;  %331 = vmatpush.bf16.msra.mxu0 %v3619_v7  ;;  %3668 = vmatpush.bf16.msra.mxu3 %v3619_v7  ;;  %v3984_v51 = vld [vmem:[%s5210_s8] sm:$0xff]  ;;  %v99_v54 = vld [vmem:[%s5208_s0 + $0x78] sm:$0xf]  ;;  %vm1214_vm6 = vcmask 1046534  }
  0x13   :  { %53 = vst [vmem:[#allocation2 + $0x40] sm:$0xf] %v5232_v1  ;;  %v3987_v53 = vperm.slane %v3984_v51, 0  ;;  %v100_v55 = vld [vmem:[%s5208_s0 + $0x7c] sm:$0xf]  ;;  %vm1216_vm7 = vcmask 1047559  }
  0x14   :  { %54 = vst [vmem:[#allocation2 + $0x44] sm:$0xf] %v5232_v1  ;;  %532 = vmatpush.bf16.msra.mxu1 %v3628_v34  ;;  %v91_v59 = vld [vmem:[%s5208_s0 + $0x58] sm:$0xf]  ;;  %v92_v60 = vld [vmem:[%s5208_s0 + $0x5c] sm:$0xf] }
  0x15   :  { %55 = vst [vmem:[#allocation2 + $0x48] sm:$0xf] %v5232_v1  ;;  %v93_v7 = vld [vmem:[%s5208_s0 + $0x60] sm:$0xf]  ;;  %s3731_s16 = smov 120   ;;  %s3732_s21 = smov 126  }
  0x16   :  { %56 = vst [vmem:[#allocation2 + $0x4c] sm:$0xf] %v5232_v1  ;;  %332 = vmatpush.bf16.msra.mxu0 %v3618_v8  ;;  %3669 = vmatpush.bf16.msra.mxu3 %v3618_v8  ;;  %v94_v8 = vld [vmem:[%s5208_s0 + $0x64] sm:$0xf]  ;;  %vm1659_vm8 = vcmask 31744   ;;  %vm3102_vm12 = vcmask 15360  }
  0x17   :  { %57 = vst [vmem:[#allocation2 + $0x50] sm:$0xf] %v5232_v1  ;;  %s3733_s22 = smov 112  }
  0x18   :  { %58 = vst [vmem:[#allocation2 + $0x54] sm:$0xf] %v5232_v1  ;;  %533 = vmatpush.bf16.msra.mxu1 %v3627_v37 }
  0x19   :  { %59 = vst [vmem:[#allocation2 + $0x58] sm:$0xf] %v5232_v1 }
  0x1a   :  { %60 = vst [vmem:[#allocation2 + $0x5c] sm:$0xf] %v5232_v1  ;;  %333 = vmatpush.bf16.msra.mxu0 %v3617_v9  ;;  %3670 = vmatpush.bf16.msra.mxu3 %v3617_v9 }
  0x1b   :  { %61 = vst [vmem:[#allocation2 + $0x60] sm:$0xf] %v5232_v1 }
  0x1c   :  { %62 = vst [vmem:[#allocation2 + $0x64] sm:$0xf] %v5232_v1  ;;  %534 = vmatpush.bf16.msra.mxu1 %v3626_v39 }
  0x1d   :  { %63 = vst [vmem:[#allocation2 + $0x68] sm:$0xf] %v5232_v1 }
  0x1e   :  { %64 = vst [vmem:[#allocation2 + $0x6c] sm:$0xf] %v5232_v1  ;;  %334 = vmatpush.bf16.msra.mxu0 %v3616_v10  ;;  %3671 = vmatpush.bf16.msra.mxu3 %v3616_v10 }
  0x1f   :  { %65 = vst [vmem:[#allocation2 + $0x70] sm:$0xf] %v5232_v1 }
  0x20   :  { %66 = vst [vmem:[#allocation2 + $0x74] sm:$0xf] %v5232_v1  ;;  %535 = vmatpush.bf16.msra.mxu1 %v3625_v40 }
  0x21   :  { %67 = vst [vmem:[#allocation2 + $0x78] sm:$0xf] %v5232_v1  ;;  %335 = vmatmul.bf16.vlgmr.msra.gmra.mxu0 %v3600_v11 }
  0x22   :  { %68 = vst [vmem:[#allocation2 + $0x7c] sm:$0xf] %v5232_v1  ;;  %3672 = vmatpush.bf16.msrb.mxu3 %v3631_v28 }
  0x23   :  { %104 = vst.msk [vmem:[#allocation2 + $0x8] sm:$0xf] %vm101_vm0, %v71_v12 }
  0x24   :  { %105 = vst.msk [vmem:[#allocation2 + $0xc] sm:$0xf] %vm101_vm0, %v72_v13  ;;  %536 = vmatpush.bf16.msra.mxu1 %v3624_v43 }
  0x25   :  { %106 = vst.msk [vmem:[#allocation2 + $0x10] sm:$0xf] %vm101_vm0, %v73_v14 }
  0x26   :  { %107 = vst.msk [vmem:[#allocation2 + $0x14] sm:$0xf] %vm101_vm0, %v74_v15  ;;  %3673 = vmatpush.bf16.msrb.mxu3 %v3630_v32 }
  0x27   :  { %108 = vst.msk [vmem:[#allocation2 + $0x18] sm:$0xf] %vm101_vm0, %v75_v16 }
  0x28   :  { %109 = vst.msk [vmem:[#allocation2 + $0x1c] sm:$0xf] %vm101_vm0, %v76_v17  ;;  %v95_v17 = vld [vmem:[%s5208_s0 + $0x68] sm:$0xf] }
  0x29   :  { %110 = vst.msk [vmem:[#allocation2 + $0x20] sm:$0xf] %vm101_vm0, %v77_v19 }
  0x2a   :  { %111 = vst.msk [vmem:[#allocation2 + $0x24] sm:$0xf] %vm101_vm0, %v78_v20  ;;  %3674 = vmatpush.bf16.msrb.mxu3 %v3629_v33 }
  0x2b   :  { %v3601_v18 = vld [vmem:[#allocation2 + $0x8] sm:$0xff]  ;;  %112 = vst.msk [vmem:[#allocation2 + $0x28] sm:$0xf] %vm101_vm0, %v79_v22 }
  0x2c   :  { %113 = vst.msk [vmem:[#allocation2 + $0x2c] sm:$0xf] %vm101_vm0, %v80_v23 }
  0x2d   :  { %v3602_v21 = vld [vmem:[#allocation2 + $0x10] sm:$0xff]  ;;  %114 = vst.msk [vmem:[#allocation2 + $0x30] sm:$0xf] %vm101_vm0, %v81_v25 }
  0x2e   :  { %115 = vst.msk [vmem:[#allocation2 + $0x34] sm:$0xf] %vm101_vm0, %v82_v26  ;;  %3675 = vmatpush.bf16.msrb.mxu3 %v3628_v34 }
  0x2f   :  { %v3603_v24 = vld [vmem:[#allocation2 + $0x18] sm:$0xff]  ;;  %116 = vst.msk [vmem:[#allocation2 + $0x38] sm:$0xf] %vm101_vm0, %v83_v29 }
  0x30   :  { %117 = vst.msk [vmem:[#allocation2 + $0x3c] sm:$0xf] %vm101_vm0, %v84_v30 }
  0x31   :  { %340 = vmatmul.bf16.gmra.mxu0 %v3601_v18  ;;  %v3604_v27 = vld [vmem:[#allocation2 + $0x20] sm:$0xff]  ;;  %118 = vst.msk [vmem:[#allocation2 + $0x40] sm:$0xf] %vm101_vm0, %v85_v35  ;;  %v96_v18 = vld [vmem:[%s5208_s0 + $0x6c] sm:$0xf] }
  0x32   :  { %119 = vst.msk [vmem:[#allocation2 + $0x44] sm:$0xf] %vm101_vm0, %v86_v36  ;;  %3676 = vmatpush.bf16.msrb.mxu3 %v3627_v37 }
  0x33   :  { %v3605_v31 = vld [vmem:[#allocation2 + $0x28] sm:$0xff]  ;;  %120 = vst.msk [vmem:[#allocation2 + $0x48] sm:$0xf] %vm101_vm0, %v87_v41 }
  0x34   :  { %121 = vst.msk [vmem:[#allocation2 + $0x4c] sm:$0xf] %vm101_vm0, %v88_v42 }
  0x35   :  { %v3606_v38 = vld [vmem:[#allocation2 + $0x30] sm:$0xff]  ;;  %130 = vst.msk [vmem:[#allocation2 + $0x70] sm:$0xf] %vm101_vm0, %v97_v45 }
  0x36   :  { %3677 = vmatpush.bf16.msrb.mxu3 %v3626_v39  ;;  %131 = vst.msk [vmem:[#allocation2 + $0x74] sm:$0xf] %vm101_vm0, %v98_v46 }
  0x37   :  { %v3607_v44 = vld [vmem:[#allocation2 + $0x38] sm:$0xff]  ;;  %122 = vst.msk [vmem:[#allocation2 + $0x50] sm:$0xf] %vm101_vm0, %v89_v47  ;;  %v3638_v47 = vld [vmem:[%s5211_s4 + $0x30] sm:$0xff] }
  0x38   :  { %123 = vst.msk [vmem:[#allocation2 + $0x54] sm:$0xf] %vm101_vm0, %v90_v48 }
  0x39   :  { %v3608_v50 = vld [vmem:[#allocation2 + $0x40] sm:$0xff]  ;;  %132 = vst.msk [vmem:[#allocation2 + $0x78] sm:$0xf] %vm101_vm0, %v99_v54 }
  0x3a   :  { %3678 = vmatpush.bf16.msrb.mxu3 %v3625_v40  ;;  %133 = vst.msk [vmem:[#allocation2 + $0x7c] sm:$0xf] %vm101_vm0, %v100_v55 }
  0x3b   :  { %124 = vst.msk [vmem:[#allocation2 + $0x58] sm:$0xf] %vm101_vm0, %v91_v59  ;;  %v3609_v2 = vld [vmem:[#allocation2 + $0x48] sm:$0xff] }
  0x3c   :  { %125 = vst.msk [vmem:[#allocation2 + $0x5c] sm:$0xf] %vm101_vm0, %v92_v60  ;;  %v3634_v60 = vld [vmem:[%s5211_s4 + $0x10] sm:$0xff] }
  0x3d   :  { %v3614_v49 = vld [vmem:[#allocation2 + $0x70] sm:$0xff]  ;;  %126 = vst.msk [vmem:[#allocation2 + $0x60] sm:$0xf] %vm101_vm0, %v93_v7 }
  0x3e   :  { %3679 = vmatpush.bf16.msrb.mxu3 %v3624_v43  ;;  %127 = vst.msk [vmem:[#allocation2 + $0x64] sm:$0xf] %vm101_vm0, %v94_v8  ;;  %v3639_v43 = vld [vmem:[%s5211_s4 + $0x38] sm:$0xff] }
  0x3f   :  { %405 = vmatmul.bf16.vlgmr.msra.gmra.mxu3 %v3614_v49  ;;  %v3610_v12 = vld [vmem:[#allocation2 + $0x50] sm:$0xff]  ;;  %128 = vst.msk [vmem:[#allocation2 + $0x68] sm:$0xf] %vm101_vm0, %v95_v17  ;;  %731 = vmatpush.bf16.msra.mxu2 %v3639_v43  ;;  %v3637_v49 = vld [vmem:[%s5211_s4 + $0x28] sm:$0xff] }
  0x40   :  { %129 = vst.msk [vmem:[#allocation2 + $0x6c] sm:$0xf] %vm101_vm0, %v96_v18 }
  0x41   :  { %345 = vmatmul.bf16.gmra.mxu0 %v3602_v21  ;;  %v3615_v63 = vld [vmem:[#allocation2 + $0x78] sm:$0xff] }
  0x42   :  { %3680 = vmatpush.bf16.msra.mxu3 %v3639_v43 }
  0x43   :  { %v3611_v22 = vld [vmem:[#allocation2 + $0x58] sm:$0xff]  ;;  %732 = vmatpush.bf16.msra.mxu2 %v3638_v47 }
  0x45   :  { %v3612_v30 = vld [vmem:[#allocation2 + $0x60] sm:$0xff] }
  0x46   :  { %3681 = vmatpush.bf16.msra.mxu3 %v3638_v47 }
  0x47   :  { %733 = vmatpush.bf16.msra.mxu2 %v3637_v49 }
  0x4a   :  { %3682 = vmatpush.bf16.msra.mxu3 %v3637_v49 }
  0x4f   :  { %410 = vmatmul.bf16.gmra.mxu3 %v3615_v63  ;;  %v3632_v63 = vld [vmem:[%s5211_s4] sm:$0xff] }
  0x51   :  { %350 = vmatmul.bf16.gmra.mxu0 %v3603_v24 }
  0x61   :  { %355 = vmatmul.bf16.gmra.mxu0 %v3604_v27 }
  0x71   :  { %360 = vmatmul.bf16.gmra.mxu0 %v3605_v31 }
  0x81   :  { %365 = vmatmul.bf16.gmra.mxu0 %v3606_v38  ;;  %v3613_v38 = vld [vmem:[#allocation2 + $0x68] sm:$0xff] }
  0x91   :  { %370 = vmatmul.bf16.gmra.mxu0 %v3607_v44 }
  0x9e   :  { %v336_v52 = vpop.f32.mrf.mxu0 }
  0x9f   :  { %v337_v56 = vadd.f32 %v336_v52, %v3987_v53 }
  0xa1   :  { %375 = vmatmul.bf16.gmra.mxu0 %v3608_v50  ;;  %v416_v61 = vmax.f32 %v337_v56, 0.0  ;;  %v3636_v50 = vld [vmem:[%s5211_s4 + $0x20] sm:$0xff]  ;;  %v3635_v56 = vld [vmem:[%s5211_s4 + $0x18] sm:$0xff] }
  0xa2   :  { %734 = vmatpush.bf16.msra.mxu2 %v3636_v50  ;;  %3683 = vmatpush.bf16.msra.mxu3 %v3636_v50 }
  0xa6   :  { %v338_v57 = vpop.f32.mrf.mxu0  ;;  %735 = vmatpush.bf16.msra.mxu2 %v3635_v56  ;;  %3684 = vmatpush.bf16.msra.mxu3 %v3635_v56 }
  0xa7   :  { %v339_v58 = vadd.f32 %v338_v57, %v3987_v53 }
  0xa9   :  { %v417_v62 = vmax.f32 %v339_v58, 0.0 }
  0xaa   :  { %736 = vmatpush.bf16.msra.mxu2 %v3634_v60  ;;  %3685 = vmatpush.bf16.msra.mxu3 %v3634_v60 }
  0xab   :  { %v448_v0 = vpack.c.bf16 %v417_v62, %v416_v61  ;;  %v3633_v62 = vld [vmem:[%s5211_s4 + $0x8] sm:$0xff] }
  0xad   :  { %537 = vmatmul.bf16.vlgmr.msra.gmra.mxu1 %v448_v0 }
  0xae   :  { %v341_v3 = vpop.f32.mrf.mxu0  ;;  %737 = vmatpush.bf16.msra.mxu2 %v3633_v62  ;;  %3686 = vmatpush.bf16.msra.mxu3 %v3633_v62 }
  0xaf   :  { %v342_v4 = vadd.f32 %v341_v3, %v3987_v53 }
  0xb1   :  { %380 = vmatmul.bf16.gmra.mxu0 %v3609_v2  ;;  %v418_v9 = vmax.f32 %v342_v4, 0.0 }
  0xb2   :  { %738 = vmatpush.bf16.msra.mxu2 %v3632_v63  ;;  %3687 = vmatpush.bf16.msra.mxu3 %v3632_v63 }
  0xb6   :  { %v343_v5 = vpop.f32.mrf.mxu0 }
  0xb7   :  { %v344_v6 = vadd.f32 %v343_v5, %v3987_v53 }
  0xb9   :  { %v419_v10 = vmax.f32 %v344_v6, 0.0 }
  0xbb   :  { %v449_v11 = vpack.c.bf16 %v419_v10, %v418_v9 }
  0xbd   :  { %542 = vmatmul.bf16.gmra.mxu1 %v449_v11 }
  0xbe   :  { %v346_v13 = vpop.f32.mrf.mxu0 }
  0xbf   :  { %v347_v14 = vadd.f32 %v346_v13, %v3987_v53 }
  0xc1   :  { %385 = vmatmul.bf16.gmra.mxu0 %v3610_v12  ;;  %v420_v19 = vmax.f32 %v347_v14, 0.0 }
  0xc2   :  { %v406_v8 = vpop.f32.mrf.mxu3 }
  0xc3   :  { %v407_v9 = vadd.f32 %v406_v8, %v3987_v53 }
  0xc5   :  { %v444_v14 = vmax.f32 %v407_v9, 0.0 }
  0xc6   :  { %v348_v15 = vpop.f32.mrf.mxu0 }
  0xc7   :  { %v349_v16 = vadd.f32 %v348_v15, %v3987_v53 }
  0xc9   :  { %v421_v20 = vmax.f32 %v349_v16, 0.0 }
  0xca   :  { %v408_v13 = vpop.f32.mrf.mxu3 }
  0xcb   :  { %v450_v21 = vpack.c.bf16 %v421_v20, %v420_v19  ;;  %v409_v15 = vadd.f32 %v408_v13, %v3987_v53 }
  0xcd   :  { %547 = vmatmul.bf16.gmra.mxu1 %v450_v21  ;;  %v445_v19 = vmax.f32 %v409_v15, 0.0 }
  0xce   :  { %v351_v23 = vpop.f32.mrf.mxu0 }
  0xcf   :  { %v352_v24 = vadd.f32 %v351_v23, %v3987_v53  ;;  %v462_v21 = vpack.c.bf16 %v445_v19, %v444_v14 }
  0xd1   :  { %390 = vmatmul.bf16.gmra.mxu0 %v3611_v22  ;;  %v422_v27 = vmax.f32 %v352_v24, 0.0  ;;  %v4066_v22 = vperm.slane %v3984_v51, 1  ;;  %607 = vmatmul.bf16.vlgmr.msrb.gmra.mxu3 %v462_v21 }
  0xd2   :  { %v411_v24 = vpop.f32.mrf.mxu3 }
  0xd6   :  { %v353_v25 = vpop.f32.mrf.mxu0 }
  0xd7   :  { %v354_v26 = vadd.f32 %v353_v25, %v3987_v53 }
  0xd9   :  { %v423_v28 = vmax.f32 %v354_v26, 0.0 }
  0xdb   :  { %v451_v29 = vpack.c.bf16 %v423_v28, %v422_v27  ;;  %v412_v28 = vadd.f32 %v411_v24, %v3987_v53 }
  0xdd   :  { %552 = vmatmul.bf16.gmra.mxu1 %v451_v29 }
  0xde   :  { %v356_v31 = vpop.f32.mrf.mxu0 }
  0xdf   :  { %v357_v32 = vadd.f32 %v356_v31, %v3987_v53 }
  0xe1   :  { %395 = vmatmul.bf16.gmra.mxu0 %v3612_v30  ;;  %v424_v35 = vmax.f32 %v357_v32, 0.0 }
  0xe6   :  { %v358_v33 = vpop.f32.mrf.mxu0 }
  0xe7   :  { %v359_v34 = vadd.f32 %v358_v33, %v3987_v53 }
  0xe9   :  { %v425_v36 = vmax.f32 %v359_v34, 0.0 }
  0xeb   :  { %v452_v37 = vpack.c.bf16 %v425_v36, %v424_v35  ;;  %v413_v35 = vpop.f32.mrf.mxu3  ;;  %v446_v36 = vmax.f32 %v412_v28, 0.0 }
  0xed   :  { %557 = vmatmul.bf16.gmra.mxu1 %v452_v37  ;;  %v414_v37 = vadd.f32 %v413_v35, %v3987_v53 }
  0xee   :  { %v361_v39 = vpop.f32.mrf.mxu0 }
  0xef   :  { %v362_v40 = vadd.f32 %v361_v39, %v3987_v53 }
  0xf1   :  { %400 = vmatmul.bf16.gmra.mxu0 %v3613_v38  ;;  %v426_v44 = vmax.f32 %v362_v40, 0.0 }
  0xf6   :  { %v363_v41 = vpop.f32.mrf.mxu0 }
  0xf7   :  { %v364_v42 = vadd.f32 %v363_v41, %v3987_v53  ;;  %v447_v41 = vmax.f32 %v414_v37, 0.0 }
  0xf9   :  { %v427_v45 = vmax.f32 %v364_v42, 0.0  ;;  %v463_v43 = vpack.c.bf16 %v447_v41, %v446_v36 }
  0xfb   :  { %v453_v46 = vpack.c.bf16 %v427_v45, %v426_v44  ;;  %612 = vmatmul.bf16.gmra.mxu3 %v463_v43 }
  0xfd   :  { %562 = vmatmul.bf16.gmra.mxu1 %v453_v46 }
  0xfe   :  { %v366_v48 = vpop.f32.mrf.mxu0 }
  0xff   :  { %v367_v52 = vadd.f32 %v366_v48, %v3987_v53 }
 0x101   :  { %v428_v57 = vmax.f32 %v367_v52, 0.0 }
 0x106   :  { %v368_v54 = vpop.f32.mrf.mxu0 }
 0x107   :  { %v369_v55 = vadd.f32 %v368_v54, %v3987_v53 }
 0x109   :  { %v429_v58 = vmax.f32 %v369_v55, 0.0 }
 0x10b   :  { %v454_v59 = vpack.c.bf16 %v429_v58, %v428_v57 }
 0x10d   :  { %567 = vmatmul.bf16.gmra.mxu1 %v454_v59 }
 0x10e   :  { %v371_v61 = vpop.f32.mrf.mxu0 }
 0x10f   :  { %v372_v0 = vadd.f32 %v371_v61, %v3987_v53 }
 0x111   :  { %v430_v4 = vmax.f32 %v372_v0, 0.0 }
 0x116   :  { %v373_v2 = vpop.f32.mrf.mxu0 }
 0x117   :  { %v374_v3 = vadd.f32 %v373_v2, %v3987_v53 }
 0x119   :  { %v431_v5 = vmax.f32 %v374_v3, 0.0 }
 0x11b   :  { %v455_v6 = vpack.c.bf16 %v431_v5, %v430_v4 }
 0x11d   :  { %572 = vmatmul.bf16.gmra.mxu1 %v455_v6 }
 0x11e   :  { %v376_v7 = vpop.f32.mrf.mxu0 }
 0x11f   :  { %v377_v10 = vadd.f32 %v376_v7, %v3987_v53 }
 0x121   :  { %v432_v16 = vmax.f32 %v377_v10, 0.0 }
 0x126   :  { %v378_v11 = vpop.f32.mrf.mxu0 }
 0x127   :  { %v379_v12 = vadd.f32 %v378_v11, %v3987_v53 }
 0x129   :  { %v433_v17 = vmax.f32 %v379_v12, 0.0 }
 0x12a   :  { %v538_v18 = vpop.f32.mrf.mxu1 }
 0x12b   :  { %v456_v20 = vpack.c.bf16 %v433_v17, %v432_v16  ;;  %v539_v25 = vadd.f32 %v538_v18, %v4066_v22 }
 0x12d   :  { %577 = vmatmul.bf16.gmra.mxu1 %v456_v20  ;;  %v618_v29 = vmax.f32 %v539_v25, 0.0 }
 0x12e   :  { %v381_v23 = vpop.f32.mrf.mxu0 }
 0x12f   :  { %v382_v30 = vadd.f32 %v381_v23, %v3987_v53 }
 0x131   :  { %v434_v38 = vmax.f32 %v382_v30, 0.0 }
 0x132   :  { %v540_v26 = vpop.f32.mrf.mxu1 }
 0x133   :  { %v541_v27 = vadd.f32 %v540_v26, %v4066_v22 }
 0x135   :  { %v619_v31 = vmax.f32 %v541_v27, 0.0 }
 0x136   :  { %v383_v32 = vpop.f32.mrf.mxu0 }
 0x137   :  { %v384_v33 = vadd.f32 %v383_v32, %v3987_v53  ;;  %v650_v34 = vpack.c.bf16 %v619_v31, %v618_v29 }
 0x139   :  { %v435_v39 = vmax.f32 %v384_v33, 0.0  ;;  %739 = vmatmul.bf16.vlgmr.msra.gmra.mxu2 %v650_v34 }
 0x13a   :  { %v543_v40 = vpop.f32.mrf.mxu1 }
 0x13b   :  { %v457_v42 = vpack.c.bf16 %v435_v39, %v434_v38  ;;  %v544_v45 = vadd.f32 %v543_v40, %v4066_v22 }
 0x13d   :  { %582 = vmatmul.bf16.gmra.mxu1 %v457_v42  ;;  %v620_v48 = vmax.f32 %v544_v45, 0.0 }
 0x13e   :  { %v386_v44 = vpop.f32.mrf.mxu0 }
 0x13f   :  { %v387_v49 = vadd.f32 %v386_v44, %v3987_v53 }
 0x141   :  { %v436_v56 = vmax.f32 %v387_v49, 0.0 }
 0x142   :  { %v545_v46 = vpop.f32.mrf.mxu1 }
 0x143   :  { %v546_v47 = vadd.f32 %v545_v46, %v4066_v22 }
 0x145   :  { %v621_v50 = vmax.f32 %v546_v47, 0.0 }
 0x146   :  { %v388_v52 = vpop.f32.mrf.mxu0 }
 0x147   :  { %v389_v54 = vadd.f32 %v388_v52, %v3987_v53  ;;  %v651_v55 = vpack.c.bf16 %v621_v50, %v620_v48 }
 0x149   :  { %v437_v57 = vmax.f32 %v389_v54, 0.0  ;;  %744 = vmatmul.bf16.gmra.mxu2 %v651_v55 }
 0x14a   :  { %v548_v58 = vpop.f32.mrf.mxu1 }
 0x14b   :  { %v458_v59 = vpack.c.bf16 %v437_v57, %v436_v56  ;;  %v549_v61 = vadd.f32 %v548_v58, %v4066_v22 }
 0x14d   :  { %587 = vmatmul.bf16.gmra.mxu1 %v458_v59  ;;  %v622_v0 = vmax.f32 %v549_v61, 0.0 }
 0x14e   :  { %v391_v60 = vpop.f32.mrf.mxu0 }
 0x14f   :  { %v392_v2 = vadd.f32 %v391_v60, %v3987_v53 }
 0x151   :  { %v438_v7 = vmax.f32 %v392_v2, 0.0 }
 0x152   :  { %v550_v62 = vpop.f32.mrf.mxu1 }
 0x153   :  { %v551_v63 = vadd.f32 %v550_v62, %v4066_v22 }
 0x155   :  { %v623_v3 = vmax.f32 %v551_v63, 0.0  ;;  %v608_v63 = vpop.f32.mrf.mxu3 }
 0x156   :  { %v393_v4 = vpop.f32.mrf.mxu0 }
 0x157   :  { %v394_v5 = vadd.f32 %v393_v4, %v3987_v53  ;;  %v652_v6 = vpack.c.bf16 %v623_v3, %v622_v0 }
 0x159   :  { %v439_v8 = vmax.f32 %v394_v5, 0.0  ;;  %749 = vmatmul.bf16.gmra.mxu2 %v652_v6  ;;  %v4099_v6 = vperm.slane %v3984_v51, 2 }
 0x15a   :  { %v553_v9 = vpop.f32.mrf.mxu1 }
 0x15b   :  { %v459_v10 = vpack.c.bf16 %v439_v8, %v438_v7  ;;  %v554_v12 = vadd.f32 %v553_v9, %v4066_v22  ;;  %v609_v7 = vadd.f32 %v608_v63, %v4066_v22 }
 0x15d   :  { %592 = vmatmul.bf16.gmra.mxu1 %v459_v10  ;;  %v624_v15 = vmax.f32 %v554_v12, 0.0  ;;  %v610_v8 = vpop.f32.mrf.mxu3 }
 0x15e   :  { %v396_v11 = vpop.f32.mrf.mxu0  ;;  %v611_v10 = vadd.f32 %v610_v8, %v4066_v22 }
 0x15f   :  { %v397_v16 = vadd.f32 %v396_v11, %v3987_v53  ;;  %v646_v11 = vmax.f32 %v609_v7, 0.0 }
 0x161   :  { %v440_v21 = vmax.f32 %v397_v16, 0.0 }
 0x162   :  { %v555_v13 = vpop.f32.mrf.mxu1 }
 0x163   :  { %v556_v14 = vadd.f32 %v555_v13, %v4066_v22  ;;  %v647_v13 = vmax.f32 %v611_v10, 0.0 }
 0x165   :  { %v625_v17 = vmax.f32 %v556_v14, 0.0 }
 0x166   :  { %v398_v18 = vpop.f32.mrf.mxu0 }
 0x167   :  { %v399_v19 = vadd.f32 %v398_v18, %v3987_v53  ;;  %v653_v20 = vpack.c.bf16 %v625_v17, %v624_v15  ;;  %v664_v15 = vpack.c.bf16 %v647_v13, %v646_v11 }
 0x169   :  { %v441_v23 = vmax.f32 %v399_v19, 0.0  ;;  %754 = vmatmul.bf16.gmra.mxu2 %v653_v20  ;;  %809 = vmatmul.bf16.vlgmr.msra.gmra.mxu3 %v664_v15 }
 0x16a   :  { %v558_v24 = vpop.f32.mrf.mxu1 }
 0x16b   :  { %v460_v25 = vpack.c.bf16 %v441_v23, %v440_v21  ;;  %v559_v27 = vadd.f32 %v558_v24, %v4066_v22 }
 0x16d   :  { %597 = vmatmul.bf16.gmra.mxu1 %v460_v25  ;;  %v626_v30 = vmax.f32 %v559_v27, 0.0 }
 0x16e   :  { %v401_v26 = vpop.f32.mrf.mxu0 }
 0x16f   :  { %v402_v31 = vadd.f32 %v401_v26, %v3987_v53 }
 0x171   :  { %v442_v36 = vmax.f32 %v402_v31, 0.0 }
 0x172   :  { %v560_v28 = vpop.f32.mrf.mxu1 }
 0x173   :  { %v561_v29 = vadd.f32 %v560_v28, %v4066_v22 }
 0x175   :  { %v627_v32 = vmax.f32 %v561_v29, 0.0 }
 0x176   :  { %v403_v33 = vpop.f32.mrf.mxu0 }
 0x177   :  { %v404_v34 = vadd.f32 %v403_v33, %v3987_v53  ;;  %v654_v35 = vpack.c.bf16 %v627_v32, %v626_v30 }
 0x179   :  { %v443_v37 = vmax.f32 %v404_v34, 0.0  ;;  %759 = vmatmul.bf16.gmra.mxu2 %v654_v35 }
 0x17a   :  { %v563_v38 = vpop.f32.mrf.mxu1 }
 0x17b   :  { %v461_v39 = vpack.c.bf16 %v443_v37, %v442_v36  ;;  %v564_v40 = vadd.f32 %v563_v38, %v4066_v22 }
 0x17d   :  { %602 = vmatmul.bf16.gmra.mxu1 %v461_v39  ;;  %v628_v43 = vmax.f32 %v564_v40, 0.0 }
 0x17e   :  { %v613_v19 = vpop.f32.mrf.mxu3 }
 0x17f   :  { %v614_v35 = vadd.f32 %v613_v19, %v4066_v22 }
 0x181   :  { %v648_v40 = vmax.f32 %v614_v35, 0.0 }
 0x182   :  { %v565_v41 = vpop.f32.mrf.mxu1 }
 0x183   :  { %v566_v42 = vadd.f32 %v565_v41, %v4066_v22 }
 0x185   :  { %v629_v44 = vmax.f32 %v566_v42, 0.0 }
 0x186   :  { %v615_v33 = vpop.f32.mrf.mxu3 }
 0x187   :  { %v655_v45 = vpack.c.bf16 %v629_v44, %v628_v43  ;;  %v616_v36 = vadd.f32 %v615_v33, %v4066_v22 }
 0x189   :  { %764 = vmatmul.bf16.gmra.mxu2 %v655_v45  ;;  %v649_v41 = vmax.f32 %v616_v36, 0.0 }
 0x18a   :  { %v568_v46 = vpop.f32.mrf.mxu1 }
 0x18b   :  { %v569_v47 = vadd.f32 %v568_v46, %v4066_v22  ;;  %v665_v45 = vpack.c.bf16 %v649_v41, %v648_v40 }
 0x18d   :  { %v630_v49 = vmax.f32 %v569_v47, 0.0  ;;  %814 = vmatmul.bf16.gmra.mxu3 %v665_v45 }
 0x192   :  { %v570_v53 = vpop.f32.mrf.mxu1 }
 0x193   :  { %v571_v48 = vadd.f32 %v570_v53, %v4066_v22 }
 0x195   :  { %v631_v50 = vmax.f32 %v571_v48, 0.0 }
 0x197   :  { %v656_v52 = vpack.c.bf16 %v631_v50, %v630_v49 }
 0x199   :  { %769 = vmatmul.bf16.gmra.mxu2 %v656_v52 }
 0x19a   :  { %v573_v54 = vpop.f32.mrf.mxu1 }
 0x19b   :  { %v574_v55 = vadd.f32 %v573_v54, %v4066_v22 }
 0x19d   :  { %v632_v58 = vmax.f32 %v574_v55, 0.0 }
 0x1a2   :  { %v575_v56 = vpop.f32.mrf.mxu1 }
 0x1a3   :  { %v576_v57 = vadd.f32 %v575_v56, %v4066_v22 }
 0x1a5   :  { %v633_v59 = vmax.f32 %v576_v57, 0.0 }
 0x1a7   :  { %v657_v60 = vpack.c.bf16 %v633_v59, %v632_v58 }
 0x1a9   :  { %774 = vmatmul.bf16.gmra.mxu2 %v657_v60 }
 0x1aa   :  { %v578_v61 = vpop.f32.mrf.mxu1 }
 0x1ab   :  { %v579_v62 = vadd.f32 %v578_v61, %v4066_v22 }
 0x1ad   :  { %v634_v3 = vmax.f32 %v579_v62, 0.0 }
 0x1b2   :  { %v580_v0 = vpop.f32.mrf.mxu1 }
 0x1b3   :  { %v581_v2 = vadd.f32 %v580_v0, %v4066_v22 }
 0x1b5   :  { %v635_v4 = vmax.f32 %v581_v2, 0.0 }
 0x1b7   :  { %v658_v5 = vpack.c.bf16 %v635_v4, %v634_v3 }
 0x1b9   :  { %779 = vmatmul.bf16.gmra.mxu2 %v658_v5 }
 0x1ba   :  { %v583_v9 = vpop.f32.mrf.mxu1 }
 0x1bb   :  { %v584_v17 = vadd.f32 %v583_v9, %v4066_v22 }
 0x1bc   :  { %v740_v12 = vpop.f32.mrf.mxu2 }
 0x1bd   :  { %v741_v14 = vadd.f32 %v740_v12, %v4099_v6  ;;  %v636_v24 = vmax.f32 %v584_v17, 0.0 }
 0x1bf   :  { %v820_v16 = vmax.f32 %v741_v14, 0.0 }
 0x1c1   :  { %v852_v18 = vpack.c.bf16 %v820_v16, %v820_v16 }
 0x1c2   :  { %v585_v51 = vpop.f32.mrf.mxu1 }
 0x1c3   :  { %v884_v20 = vunpack.c.l.bf16 %v852_v18  ;;  %v586_v21 = vadd.f32 %v585_v51, %v4066_v22 }
 0x1c4   :  { %v742_v23 = vpop.f32.mrf.mxu2 }
 0x1c5   :  { %v916_v25 = vrot.slane %v884_v20, 4  ;;  %v637_v26 = vmax.f32 %v586_v21, 0.0  ;;  %v743_v27 = vadd.f32 %v742_v23, %v4099_v6 }
 0x1c7   :  { %v917_v28 = vmax.f32 %v884_v20, %v916_v25  ;;  %v821_v29 = vmax.f32 %v743_v27, 0.0  ;;  %v659_v30 = vpack.c.bf16 %v637_v26, %v636_v24 }
 0x1c9   :  { %v918_v31 = vrot.slane %v917_v28, 2  ;;  %v853_v32 = vpack.c.bf16 %v821_v29, %v821_v29  ;;  %784 = vmatmul.bf16.gmra.mxu2 %v659_v30 }
 0x1ca   :  { %v588_v34 = vpop.f32.mrf.mxu1 }
 0x1cb   :  { %v919_v37 = vmax.f32 %v917_v28, %v918_v31  ;;  %v885_v38 = vunpack.c.l.bf16 %v853_v32  ;;  %v589_v50 = vadd.f32 %v588_v34, %v4066_v22 }
 0x1cc   :  { %v745_v39 = vpop.f32.mrf.mxu2 }
 0x1cd   :  { %v920_v42 = vrot.slane %v919_v37, 1  ;;  %v922_v43 = vrot.slane %v885_v38, 4  ;;  %v746_v44 = vadd.f32 %v745_v39, %v4099_v6  ;;  %v638_v62 = vmax.f32 %v589_v50, 0.0 }
 0x1cf   :  { %v923_v46 = vmax.f32 %v885_v38, %v922_v43  ;;  %v822_v47 = vmax.f32 %v746_v44, 0.0  ;;  %v921_v53 = vmax.f32 %v919_v37, %v920_v42 }
 0x1d1   :  { %v924_v48 = vrot.slane %v923_v46, 2  ;;  %v854_v49 = vpack.c.bf16 %v822_v47, %v822_v47  ;;  %v4112_v58 = vpack.c.bf16 %v921_v53, %v921_v53 }
 0x1d2   :  { %v590_v52 = vpop.f32.mrf.mxu1 }
 0x1d3   :  { %v925_v54 = vmax.f32 %v923_v46, %v924_v48  ;;  %v886_v55 = vunpack.c.l.bf16 %v854_v49  ;;  %v591_v56 = vadd.f32 %v590_v52, %v4066_v22  ;;  %v1296_v5 = vperm.slane %v4112_v58, 0 }
 0x1d4   :  { %v747_v57 = vpop.f32.mrf.mxu2 }
 0x1d5   :  { %v926_v59 = vrot.slane %v925_v54, 1  ;;  %v928_v60 = vrot.slane %v886_v55, 4  ;;  %v748_v61 = vadd.f32 %v747_v57, %v4099_v6  ;;  %v639_v63 = vmax.f32 %v591_v56, 0.0 }
 0x1d6   :  { %v1328_v15 = vunpack.c.l.b16 %v1296_v5 }
 0x1d7   :  { %v927_v0 = vmax.f32 %v925_v54, %v926_v59  ;;  %v929_v2 = vmax.f32 %v886_v55, %v928_v60  ;;  %v823_v3 = vmax.f32 %v748_v61, 0.0  ;;  %v660_v4 = vpack.c.bf16 %v639_v63, %v638_v62 }
 0x1d9   :  { %v4116_v7 = vpack.c.bf16 %v927_v0, %v927_v0  ;;  %v930_v8 = vrot.slane %v929_v2, 2  ;;  %v855_v9 = vpack.c.bf16 %v823_v3, %v823_v3  ;;  %789 = vmatmul.bf16.gmra.mxu2 %v660_v4 }
 0x1da   :  { %v593_v10 = vpop.f32.mrf.mxu1 }
 0x1db   :  { %v1297_v11 = vperm.slane %v4116_v7, 0  ;;  %v931_v12 = vmax.f32 %v929_v2, %v930_v8  ;;  %v887_v13 = vunpack.c.l.bf16 %v855_v9  ;;  %v594_v26 = vadd.f32 %v593_v10, %v4066_v22 }
 0x1dc   :  { %v750_v14 = vpop.f32.mrf.mxu2 }
 0x1dd   :  { %v1329_v16 = vunpack.c.l.b16 %v1297_v11  ;;  %v932_v17 = vrot.slane %v931_v12, 1  ;;  %v934_v18 = vrot.slane %v887_v13, 4  ;;  %v751_v19 = vadd.f32 %v750_v14, %v4099_v6 }
 0x1de   :  { %v640_v36 = vmax.f32 %v594_v26, 0.0 }
 0x1df   :  { %v1360_v51 = vsel %vm1204_vm1, %v1329_v16, %v1328_v15  ;;  %v933_v20 = vmax.f32 %v931_v12, %v932_v17  ;;  %v935_v21 = vmax.f32 %v887_v13, %v934_v18  ;;  %v824_v23 = vmax.f32 %v751_v19, 0.0 }
 0x1e1   :  { %v4121_v24 = vpack.c.bf16 %v933_v20, %v933_v20  ;;  %v936_v25 = vrot.slane %v935_v21, 2  ;;  %v856_v27 = vpack.c.bf16 %v824_v23, %v824_v23 }
 0x1e2   :  { %v595_v28 = vpop.f32.mrf.mxu1 }
 0x1e3   :  { %v1298_v29 = vperm.slane %v4121_v24, 0  ;;  %v937_v30 = vmax.f32 %v935_v21, %v936_v25  ;;  %v596_v31 = vadd.f32 %v595_v28, %v4066_v22  ;;  %v888_v32 = vunpack.c.l.bf16 %v856_v27 }
 0x1e4   :  { %v752_v33 = vpop.f32.mrf.mxu2 }
 0x1e5   :  { %v1330_v34 = vunpack.c.l.b16 %v1298_v29  ;;  %v938_v35 = vrot.slane %v937_v30, 1  ;;  %v641_v37 = vmax.f32 %v596_v31, 0.0  ;;  %v940_v38 = vrot.slane %v888_v32, 4 }
 0x1e6   :  { %v753_v39 = vadd.f32 %v752_v33, %v4099_v6 }
 0x1e7   :  { %v1361_v40 = vsel %vm1206_vm2, %v1330_v34, %v1360_v51  ;;  %v939_v41 = vmax.f32 %v937_v30, %v938_v35  ;;  %v661_v42 = vpack.c.bf16 %v641_v37, %v640_v36  ;;  %v941_v43 = vmax.f32 %v888_v32, %v940_v38 }
 0x1e8   :  { %v825_v44 = vmax.f32 %v753_v39, 0.0 }
 0x1e9   :  { %v4128_v45 = vpack.c.bf16 %v939_v41, %v939_v41  ;;  %v942_v46 = vrot.slane %v941_v43, 2  ;;  %794 = vmatmul.bf16.gmra.mxu2 %v661_v42  ;;  %v1141_v42 = vunpack.c.l.bf16 %v4116_v7 }
 0x1ea   :  { %v857_v47 = vpack.c.bf16 %v825_v44, %v825_v44  ;;  %v598_v53 = vpop.f32.mrf.mxu1 }
 0x1eb   :  { %v1299_v48 = vperm.slane %v4128_v45, 0  ;;  %v943_v49 = vmax.f32 %v941_v43, %v942_v46  ;;  %v599_v63 = vadd.f32 %v598_v53, %v4066_v22  ;;  %v1142_v46 = vunpack.c.l.bf16 %v4121_v24 }
 0x1ec   :  { %v889_v50 = vunpack.c.l.bf16 %v857_v47  ;;  %v755_v52 = vpop.f32.mrf.mxu2 }
 0x1ed   :  { %v1331_v54 = vunpack.c.l.b16 %v1299_v48  ;;  %v756_v55 = vadd.f32 %v755_v52, %v4099_v6  ;;  %v944_v56 = vrot.slane %v943_v49, 1  ;;  %v642_v12 = vmax.f32 %v599_v63, 0.0 }
 0x1ee   :  { %v946_v57 = vrot.slane %v889_v50, 4  ;;  %v1140_v48 = vunpack.c.l.bf16 %v4112_v58 }
 0x1ef   :  { %v1362_v59 = vsel %vm1208_vm3, %v1331_v54, %v1361_v40  ;;  %v826_v60 = vmax.f32 %v756_v55, 0.0  ;;  %v945_v61 = vmax.f32 %v943_v49, %v944_v56  ;;  %v1143_v49 = vunpack.c.l.bf16 %v4128_v45 }
 0x1f0   :  { %v947_v62 = vmax.f32 %v889_v50, %v946_v57  ;;  %v1205_v7 = vsel %vm1204_vm1, %v1141_v42, %v1140_v48 }
 0x1f1   :  { %v858_v0 = vpack.c.bf16 %v826_v60, %v826_v60  ;;  %v4134_v2 = vpack.c.bf16 %v945_v61, %v945_v61 }
 0x1f2   :  { %v948_v3 = vrot.slane %v947_v62, 2  ;;  %v600_v4 = vpop.f32.mrf.mxu1 }
 0x1f3   :  { %v890_v5 = vunpack.c.l.bf16 %v858_v0  ;;  %v601_v8 = vadd.f32 %v600_v4, %v4066_v22  ;;  %v1300_v9 = vperm.slane %v4134_v2, 0  ;;  %v1144_v54 = vunpack.c.l.bf16 %v4134_v2 }
 0x1f4   :  { %v949_v10 = vmax.f32 %v947_v62, %v948_v3  ;;  %v757_v11 = vpop.f32.mrf.mxu2 }
 0x1f5   :  { %v952_v13 = vrot.slane %v890_v5, 4  ;;  %v643_v14 = vmax.f32 %v601_v8, 0.0  ;;  %v758_v15 = vadd.f32 %v757_v11, %v4099_v6  ;;  %v1332_v16 = vunpack.c.l.b16 %v1300_v9 }
 0x1f6   :  { %v950_v17 = vrot.slane %v949_v10, 1 }
 0x1f7   :  { %v953_v18 = vmax.f32 %v890_v5, %v952_v13  ;;  %v662_v19 = vpack.c.bf16 %v643_v14, %v642_v12  ;;  %v827_v51 = vmax.f32 %v758_v15, 0.0  ;;  %v1363_v21 = vsel %vm1210_vm4, %v1332_v16, %v1362_v59  ;;  %v3646_v15 = vld [vmem:[%s5213_s5 + $0x30] sm:$0xff] }
 0x1f8   :  { %v951_v20 = vmax.f32 %v949_v10, %v950_v17  ;;  %v3647_v10 = vld [vmem:[%s5213_s5 + $0x38] sm:$0xff] }
 0x1f9   :  { %v954_v23 = vrot.slane %v953_v18, 2  ;;  %v859_v25 = vpack.c.bf16 %v827_v51, %v827_v51  ;;  %799 = vmatmul.bf16.gmra.mxu2 %v662_v19  ;;  %1440 = vmatpush.bf16.msrb.mxu3 %v3647_v10  ;;  %v3645_v51 = vld [vmem:[%s5213_s5 + $0x28] sm:$0xff] }
 0x1fa   :  { %v1113_v26 = vpack.c.bf16 %v951_v20, %v951_v20  ;;  %v603_v27 = vpop.f32.mrf.mxu1 }
 0x1fb   :  { %v955_v28 = vmax.f32 %v953_v18, %v954_v23  ;;  %v891_v29 = vunpack.c.l.bf16 %v859_v25  ;;  %v604_v40 = vadd.f32 %v603_v27, %v4066_v22 }
 0x1fc   :  { %v1301_v30 = vperm.slane %v1113_v26, 0  ;;  %v760_v31 = vpop.f32.mrf.mxu2  ;;  %v1145_v57 = vunpack.c.l.bf16 %v1113_v26 }
 0x1fd   :  { %v956_v32 = vrot.slane %v955_v28, 1  ;;  %v958_v33 = vrot.slane %v891_v29, 4  ;;  %v644_v55 = vmax.f32 %v604_v40, 0.0  ;;  %v761_v13 = vadd.f32 %v760_v31, %v4099_v6  ;;  %1441 = vmatpush.bf16.msrb.mxu3 %v3646_v15 }
 0x1fe   :  { %v1333_v34 = vunpack.c.l.b16 %v1301_v30 }
 0x1ff   :  { %v957_v35 = vmax.f32 %v955_v28, %v956_v32  ;;  %v959_v36 = vmax.f32 %v891_v29, %v958_v33  ;;  %v828_v18 = vmax.f32 %v761_v13, 0.0  ;;  %v3644_v28 = vld [vmem:[%s5213_s5 + $0x20] sm:$0xff] }
 0x200   :  { %v1364_v37 = vsel %vm1212_vm5, %v1333_v34, %v1363_v21 }
 0x201   :  { %v1114_v38 = vpack.c.bf16 %v957_v35, %v957_v35  ;;  %v960_v39 = vrot.slane %v959_v36, 2  ;;  %1442 = vmatpush.bf16.msrb.mxu3 %v3645_v51  ;;  %v860_v26 = vpack.c.bf16 %v828_v18, %v828_v18  ;;  %v3643_v35 = vld [vmem:[%s5213_s5 + $0x18] sm:$0xff] }
 0x202   :  { %v605_v41 = vpop.f32.mrf.mxu1 }
 0x203   :  { %v1302_v43 = vperm.slane %v1114_v38, 0  ;;  %v961_v44 = vmax.f32 %v959_v36, %v960_v39  ;;  %v606_v47 = vadd.f32 %v605_v41, %v4066_v22  ;;  %v1207_v22 = vsel %vm1206_vm2, %v1142_v46, %v1205_v7 }
 0x204   :  { %v762_v53 = vpop.f32.mrf.mxu2  ;;  %v1146_v60 = vunpack.c.l.bf16 %v1114_v38  ;;  %v1209_v58 = vsel %vm1208_vm3, %v1143_v49, %v1207_v22  ;;  %v892_v33 = vunpack.c.l.bf16 %v860_v26 }
 0x205   :  { %v1334_v50 = vunpack.c.l.b16 %v1302_v43  ;;  %v962_v52 = vrot.slane %v961_v44, 1  ;;  %v645_v56 = vmax.f32 %v606_v47, 0.0  ;;  %v1211_v62 = vsel %vm1210_vm4, %v1144_v54, %v1209_v58  ;;  %1443 = vmatpush.bf16.msrb.mxu3 %v3644_v28  ;;  %v3642_v43 = vld [vmem:[%s5213_s5 + $0x10] sm:$0xff] }
 0x206   :  { %v1213_v63 = vsel %vm1212_vm5, %v1145_v57, %v1211_v62  ;;  %v763_v12 = vadd.f32 %v762_v53, %v4099_v6  ;;  %v964_v40 = vrot.slane %v892_v33, 4 }
 0x207   :  { %v963_v59 = vmax.f32 %v961_v44, %v962_v52  ;;  %v1365_v24 = vsel %vm1214_vm6, %v1334_v50, %v1364_v37  ;;  %v663_v61 = vpack.c.bf16 %v645_v56, %v644_v55  ;;  %v1215_v3 = vsel %vm1214_vm6, %v1146_v60, %v1213_v63  ;;  %v3641_v52 = vld [vmem:[%s5213_s5 + $0x8] sm:$0xff] }
 0x208   :  { %v829_v17 = vmax.f32 %v763_v12, 0.0  ;;  %v965_v48 = vmax.f32 %v892_v33, %v964_v40 }
 0x209   :  { %v1115_v45 = vpack.c.bf16 %v963_v59, %v963_v59  ;;  %804 = vmatmul.bf16.gmra.mxu2 %v663_v61  ;;  %1444 = vmatpush.bf16.msrb.mxu3 %v3643_v35  ;;  %v3640_v61 = vld [vmem:[%s5213_s5] sm:$0xff]  ;;  %s3740_s5 = smov 127  }
 0x20a   :  { %v861_v23 = vpack.c.bf16 %v829_v17, %v829_v17 }
 0x20b   :  { %v1147_v0 = vunpack.c.l.bf16 %v1115_v45  ;;  %v1303_v2 = vperm.slane %v1115_v45, 0 }
 0x20c   :  { %v765_v4 = vpop.f32.mrf.mxu2  ;;  %v893_v31 = vunpack.c.l.bf16 %v861_v23 }
 0x20d   :  { %v1217_v5 = vsel %vm1216_vm7, %v1147_v0, %v1215_v3  ;;  %v1335_v8 = vunpack.c.l.b16 %v1303_v2  ;;  %v766_v14 = vadd.f32 %v765_v4, %v4099_v6  ;;  %1445 = vmatpush.bf16.msrb.mxu3 %v3642_v43 }
 0x20e   :  { %1243 = vst [vmem:[%s5212_s9] sm:$0xff] %v1217_v5  ;;  %v970_v39 = vrot.slane %v893_v31, 4 }
 0x20f   :  { %v4160_v9 = vsel %vm1216_vm7, %v1335_v8, %v1365_v24  ;;  %v830_v19 = vmax.f32 %v766_v14, 0.0  ;;  %v966_v24 = vrot.slane %v965_v48, 2 }
 0x210   :  { %v971_v53 = vmax.f32 %v893_v31, %v970_v39 }
 0x211   :  { %v862_v27 = vpack.c.bf16 %v830_v19, %v830_v19  ;;  %1446 = vmatpush.bf16.msrb.mxu3 %v3641_v52  ;;  %v967_v3 = vmax.f32 %v965_v48, %v966_v24 }
 0x212   :  { %v972_v57 = vrot.slane %v971_v53, 2 }
 0x213   :  { %v894_v34 = vunpack.c.l.bf16 %v862_v27  ;;  %v968_v17 = vrot.slane %v967_v3, 1 }
 0x214   :  { %v767_v11 = vpop.f32.mrf.mxu2  ;;  %v973_v0 = vmax.f32 %v971_v53, %v972_v57 }
 0x215   :  { %v768_v16 = vadd.f32 %v767_v11, %v4099_v6  ;;  %v976_v41 = vrot.slane %v894_v34, 4  ;;  %1447 = vmatpush.bf16.msrb.mxu3 %v3640_v61  ;;  %v969_v28 = vmax.f32 %v967_v3, %v968_v17 }
 0x216   :  { %v974_v13 = vrot.slane %v973_v0, 1 }
 0x217   :  { %v831_v20 = vmax.f32 %v768_v16, 0.0  ;;  %v977_v49 = vmax.f32 %v894_v34, %v976_v41  ;;  %v1116_v39 = vpack.c.bf16 %v969_v28, %v969_v28 }
 0x218   :  { %v975_v23 = vmax.f32 %v973_v0, %v974_v13 }
 0x219   :  { %v863_v29 = vpack.c.bf16 %v831_v20, %v831_v20  ;;  %v978_v22 = vrot.slane %v977_v49, 2  ;;  %v1304_v48 = vperm.slane %v1116_v39, 0 }
 0x21a   :  { %v1117_v35 = vpack.c.bf16 %v975_v23, %v975_v23 }
 0x21b   :  { %v895_v36 = vunpack.c.l.bf16 %v863_v29  ;;  %v979_v4 = vmax.f32 %v977_v49, %v978_v22 }
 0x21c   :  { %v770_v21 = vpop.f32.mrf.mxu2  ;;  %v1149_v52 = vunpack.c.l.bf16 %v1117_v35 }
 0x21d   :  { %v771_v25 = vadd.f32 %v770_v21, %v4099_v6  ;;  %v982_v44 = vrot.slane %v895_v36, 4  ;;  %v980_v18 = vrot.slane %v979_v4, 1 }
 0x21f   :  { %v832_v30 = vmax.f32 %v771_v25, 0.0  ;;  %v983_v54 = vmax.f32 %v895_v36, %v982_v44  ;;  %v981_v29 = vmax.f32 %v979_v4, %v980_v18 }
 0x221   :  { %v864_v32 = vpack.c.bf16 %v832_v30, %v832_v30  ;;  %v984_v58 = vrot.slane %v983_v54, 2  ;;  %v1118_v40 = vpack.c.bf16 %v981_v29, %v981_v29 }
 0x223   :  { %v896_v37 = vunpack.c.l.bf16 %v864_v32  ;;  %v985_v8 = vmax.f32 %v983_v54, %v984_v58  ;;  %v1306_v49 = vperm.slane %v1118_v40, 0  ;;  %v1336_v58 = vunpack.c.l.b16 %v1304_v48 }
 0x224   :  { %v772_v38 = vpop.f32.mrf.mxu2 }
 0x225   :  { %v773_v42 = vadd.f32 %v772_v38, %v4099_v6  ;;  %v988_v46 = vrot.slane %v896_v37, 4  ;;  %v986_v19 = vrot.slane %v985_v8, 1 }
 0x227   :  { %v833_v47 = vmax.f32 %v773_v42, 0.0  ;;  %v989_v55 = vmax.f32 %v896_v37, %v988_v46  ;;  %v987_v30 = vmax.f32 %v985_v8, %v986_v19  ;;  %v1305_v46 = vperm.slane %v1117_v35, 0 }
 0x229   :  { %v865_v50 = vpack.c.bf16 %v833_v47, %v833_v47  ;;  %v990_v62 = vrot.slane %v989_v55, 2  ;;  %v1119_v41 = vpack.c.bf16 %v987_v30, %v987_v30  ;;  %v1337_v24 = vunpack.c.l.b16 %v1305_v46  ;;  %v810_v46 = vpop.f32.mrf.mxu3 }
 0x22b   :  { %v897_v56 = vunpack.c.l.bf16 %v865_v50  ;;  %v991_v11 = vmax.f32 %v989_v55, %v990_v62  ;;  %v1307_v54 = vperm.slane %v1119_v41, 0  ;;  %v1151_v22 = vunpack.c.l.bf16 %v1119_v41 }
 0x22c   :  { %v775_v7 = vpop.f32.mrf.mxu2 }
 0x22d   :  { %v776_v59 = vadd.f32 %v775_v7, %v4099_v6  ;;  %v994_v60 = vrot.slane %v897_v56, 4  ;;  %v992_v21 = vrot.slane %v991_v11, 1  ;;  %v1150_v7 = vunpack.c.l.bf16 %v1118_v40 }
 0x22f   :  { %v834_v45 = vmax.f32 %v776_v59, 0.0  ;;  %v995_v63 = vmax.f32 %v897_v56, %v994_v60  ;;  %v993_v33 = vmax.f32 %v991_v11, %v992_v21  ;;  %v1148_v56 = vunpack.c.l.bf16 %v1116_v39 }
 0x230   :  { %v1367_v11 = vsel %vm1204_vm1, %v1337_v24, %v1336_v58 }
 0x231   :  { %v866_v2 = vpack.c.bf16 %v834_v45, %v834_v45  ;;  %v996_v5 = vrot.slane %v995_v63, 2  ;;  %v1120_v44 = vpack.c.bf16 %v993_v33, %v993_v33  ;;  %v1338_v45 = vunpack.c.l.b16 %v1306_v49 }
 0x232   :  { %v1218_v0 = vsel %vm1204_vm1, %v1149_v52, %v1148_v56 }
 0x233   :  { %v898_v10 = vunpack.c.l.bf16 %v866_v2  ;;  %v997_v14 = vmax.f32 %v995_v63, %v996_v5  ;;  %v1308_v57 = vperm.slane %v1120_v44, 0  ;;  %v1152_v62 = vunpack.c.l.bf16 %v1120_v44 }
 0x234   :  { %v777_v12 = vpop.f32.mrf.mxu2  ;;  %v1339_v2 = vunpack.c.l.b16 %v1307_v54  ;;  %v1219_v5 = vsel %vm1206_vm2, %v1150_v7, %v1218_v0 }
 0x235   :  { %v1000_v15 = vrot.slane %v898_v10, 4  ;;  %v778_v16 = vadd.f32 %v777_v12, %v4099_v6  ;;  %v998_v25 = vrot.slane %v997_v14, 1  ;;  %v1340_v8 = vunpack.c.l.b16 %v1308_v57 }
 0x236   :  { %v1220_v12 = vsel %vm1208_vm3, %v1151_v22, %v1219_v5 }
 0x237   :  { %v1001_v51 = vmax.f32 %v898_v10, %v1000_v15  ;;  %v835_v20 = vmax.f32 %v778_v16, 0.0  ;;  %v999_v36 = vmax.f32 %v997_v14, %v998_v25  ;;  %v1368_v15 = vsel %vm1206_vm2, %v1338_v45, %v1367_v11 }
 0x238   :  { %v1221_v16 = vsel %vm1210_vm4, %v1152_v62, %v1220_v12  ;;  %v1369_v18 = vsel %vm1208_vm3, %v1339_v2, %v1368_v15 }
 0x239   :  { %v1002_v26 = vrot.slane %v1001_v51, 2  ;;  %v867_v27 = vpack.c.bf16 %v835_v20, %v835_v20  ;;  %v1121_v47 = vpack.c.bf16 %v999_v36, %v999_v36  ;;  %v1370_v25 = vsel %vm1210_vm4, %v1340_v8, %v1369_v18 }
 0x23b   :  { %v1003_v31 = vmax.f32 %v1001_v51, %v1002_v26  ;;  %v899_v32 = vunpack.c.l.bf16 %v867_v27  ;;  %v1309_v60 = vperm.slane %v1121_v47, 0  ;;  %v1153_v3 = vunpack.c.l.bf16 %v1121_v47 }
 0x23c   :  { %v4194_v34 = vpop.f32.mrf.mxu2 }
 0x23d   :  { %v1004_v37 = vrot.slane %v1003_v31, 1  ;;  %v1006_v38 = vrot.slane %v899_v32, 4  ;;  %v1341_v13 = vunpack.c.l.b16 %v1309_v60  ;;  %v1222_v19 = vsel %vm1212_vm5, %v1153_v3, %v1221_v16 }
 0x23e   :  { %v781_v35 = vadd.f32 %v4194_v34, %v4099_v6 }
 0x23f   :  { %v1005_v42 = vmax.f32 %v1003_v31, %v1004_v37  ;;  %v1007_v43 = vmax.f32 %v899_v32, %v1006_v38  ;;  %v1371_v28 = vsel %vm1212_vm5, %v1341_v13, %v1370_v25 }
 0x240   :  { %v836_v40 = vmax.f32 %v781_v35, 0.0 }
 0x241   :  { %v1008_v53 = vrot.slane %v1007_v43, 2  ;;  %v1122_v50 = vpack.c.bf16 %v1005_v42, %v1005_v42 }
 0x242   :  { %v868_v47 = vpack.c.bf16 %v836_v40, %v836_v40 }
 0x243   :  { %v1009_v55 = vmax.f32 %v1007_v43, %v1008_v53  ;;  %v1310_v63 = vperm.slane %v1122_v50, 0  ;;  %v1154_v10 = vunpack.c.l.bf16 %v1122_v50 }
 0x244   :  { %v782_v59 = vpop.f32.mrf.mxu2  ;;  %v900_v52 = vunpack.c.l.bf16 %v868_v47 }
 0x245   :  { %v1010_v61 = vrot.slane %v1009_v55, 1  ;;  %v1342_v17 = vunpack.c.l.b16 %v1310_v63  ;;  %v1223_v21 = vsel %vm1214_vm6, %v1154_v10, %v1222_v19  ;;  %v783_v33 = vadd.f32 %v782_v59, %v4099_v6 }
 0x246   :  { %v1012_v24 = vrot.slane %v900_v52, 4 }
 0x247   :  { %v1011_v4 = vmax.f32 %v1009_v55, %v1010_v61  ;;  %v1372_v29 = vsel %vm1214_vm6, %v1342_v17, %v1371_v28  ;;  %v837_v38 = vmax.f32 %v783_v33, 0.0  ;;  %v812_v61 = vpop.f32.mrf.mxu3 }
 0x248   :  { %v1013_v2 = vmax.f32 %v900_v52, %v1012_v24 }
 0x249   :  { %v1123_v14 = vpack.c.bf16 %v1011_v4, %v1011_v4  ;;  %v869_v44 = vpack.c.bf16 %v837_v38, %v837_v38 }
 0x24b   :  { %v1155_v51 = vunpack.c.l.bf16 %v1123_v14  ;;  %v1311_v20 = vperm.slane %v1123_v14, 0  ;;  %v901_v49 = vunpack.c.l.bf16 %v869_v44  ;;  %v1014_v14 = vrot.slane %v1013_v2, 2 }
 0x24c   :  { %v785_v23 = vpop.f32.mrf.mxu2 }
 0x24d   :  { %v1224_v26 = vsel %vm1216_vm7, %v1155_v51, %v1223_v21  ;;  %v1343_v27 = vunpack.c.l.b16 %v1311_v20  ;;  %v786_v36 = vadd.f32 %v785_v23, %v4099_v6  ;;  %v1018_v7 = vrot.slane %v901_v49, 4 }
 0x24e   :  { %1244 = vst [vmem:[%s5212_s9 + $0x8] sm:$0xff] %v1224_v26  ;;  %v1015_v25 = vmax.f32 %v1013_v2, %v1014_v14 }
 0x24f   :  { %v1373_v30 = vsel %vm1216_vm7, %v1343_v27, %v1372_v29  ;;  %v838_v41 = vmax.f32 %v786_v36, 0.0  ;;  %v1019_v45 = vmax.f32 %v901_v49, %v1018_v7  ;;  %v815_v20 = vpop.f32.mrf.mxu3  ;;  %v811_v29 = vadd.f32 %v810_v46, %v4099_v6 }
 0x250   :  { %v1388_v31 = vpack.c.b16 %v1373_v30, %v4160_v9  ;;  %v813_v30 = vadd.f32 %v812_v61, %v4099_v6  ;;  %v1016_v38 = vrot.slane %v1015_v25, 1 }
 0x251   :  { %v870_v53 = vpack.c.bf16 %v838_v41, %v838_v41  ;;  %v1020_v10 = vrot.slane %v1019_v45, 2 }
 0x252   :  { %1448 = vmatmul.bf16.vlgmr.msrb.gmra.mxu3 %v1388_v31 }
 0x253   :  { %v902_v54 = vunpack.c.l.bf16 %v870_v53  ;;  %v1021_v18 = vmax.f32 %v1019_v45, %v1020_v10 }
 0x254   :  { %v787_v32 = vpop.f32.mrf.mxu2 }
 0x255   :  { %v788_v37 = vadd.f32 %v787_v32, %v4099_v6  ;;  %v1024_v22 = vrot.slane %v902_v54, 4  ;;  %v1022_v32 = vrot.slane %v1021_v18, 1 }
 0x257   :  { %v839_v43 = vmax.f32 %v788_v37, 0.0  ;;  %v1025_v3 = vmax.f32 %v902_v54, %v1024_v22  ;;  %v817_v54 = vpop.f32.mrf.mxu3 }
 0x259   :  { %v871_v48 = vpack.c.bf16 %v839_v43, %v839_v43  ;;  %v1026_v15 = vrot.slane %v1025_v3, 2  ;;  %v849_v43 = vmax.f32 %v813_v30, 0.0 }
 0x25b   :  { %v903_v56 = vunpack.c.l.bf16 %v871_v48  ;;  %v1027_v26 = vmax.f32 %v1025_v3, %v1026_v15 }
 0x25c   :  { %v790_v39 = vpop.f32.mrf.mxu2 }
 0x25d   :  { %v791_v42 = vadd.f32 %v790_v39, %v4099_v6  ;;  %v1030_v58 = vrot.slane %v903_v56, 4  ;;  %v1028_v39 = vrot.slane %v1027_v26, 1 }
 0x25f   :  { %v840_v9 = vmax.f32 %v791_v42, 0.0  ;;  %v1031_v8 = vmax.f32 %v903_v56, %v1030_v58  ;;  %v848_v42 = vmax.f32 %v811_v29, 0.0  ;;  %v816_v58 = vadd.f32 %v815_v20, %v4099_v6 }
 0x261   :  { %v872_v50 = vpack.c.bf16 %v840_v9, %v840_v9  ;;  %v1032_v17 = vrot.slane %v1031_v8, 2  ;;  %v1023_v9 = vmax.f32 %v1021_v18, %v1022_v32  ;;  %v880_v7 = vpack.c.bf16 %v848_v42, %v848_v42 }
 0x262   :  { %v850_v14 = vmax.f32 %v816_v58, 0.0 }
 0x263   :  { %v904_v57 = vunpack.c.l.bf16 %v872_v50  ;;  %v1033_v28 = vmax.f32 %v1031_v8, %v1032_v17  ;;  %v1017_v50 = vmax.f32 %v1015_v25, %v1016_v38  ;;  %v4226_v24 = vpack.c.bf16 %v1023_v9, %v1023_v9 }
 0x264   :  { %v792_v34 = vpop.f32.mrf.mxu2  ;;  %v882_v32 = vpack.c.bf16 %v850_v14, %v850_v14 }
 0x265   :  { %v793_v55 = vadd.f32 %v792_v34, %v4099_v6  ;;  %v1036_v62 = vrot.slane %v904_v57, 4  ;;  %v1034_v41 = vrot.slane %v1033_v28, 1  ;;  %v1029_v34 = vmax.f32 %v1027_v26, %v1028_v39 }
 0x266   :  { %v1157_v10 = vunpack.c.l.bf16 %v4226_v24 }
 0x267   :  { %v841_v59 = vmax.f32 %v793_v55, 0.0  ;;  %v1037_v11 = vmax.f32 %v904_v57, %v1036_v62  ;;  %v1035_v56 = vmax.f32 %v1033_v28, %v1034_v41  ;;  %v881_v57 = vpack.c.bf16 %v849_v43, %v849_v43 }
 0x268   :  { %v818_v62 = vadd.f32 %v817_v54, %v4099_v6 }
 0x269   :  { %v873_v60 = vpack.c.bf16 %v841_v59, %v841_v59  ;;  %v1038_v19 = vrot.slane %v1037_v11, 2  ;;  %v4234_v3 = vpack.c.bf16 %v1035_v56, %v1035_v56 }
 0x26b   :  { %v905_v63 = vunpack.c.l.bf16 %v873_v60  ;;  %v1039_v33 = vmax.f32 %v1037_v11, %v1038_v19 }
 0x26c   :  { %v795_v0 = vpop.f32.mrf.mxu2 }
 0x26d   :  { %v1042_v4 = vrot.slane %v905_v63, 4  ;;  %v796_v5 = vadd.f32 %v795_v0, %v4099_v6  ;;  %v1040_v47 = vrot.slane %v1039_v33, 1  ;;  %v4232_v0 = vpack.c.bf16 %v1029_v34, %v1029_v34 }
 0x26f   :  { %v842_v12 = vmax.f32 %v796_v5, 0.0  ;;  %v1043_v13 = vmax.f32 %v905_v63, %v1042_v4  ;;  %v1041_v22 = vmax.f32 %v1039_v33, %v1040_v47  ;;  %v4230_v63 = vpack.c.bf16 %v1017_v50, %v1017_v50 }
 0x270   :  { %v912_v4 = vunpack.c.l.bf16 %v880_v7  ;;  %v913_v5 = vunpack.c.l.bf16 %v881_v57  ;;  %v1158_v19 = vunpack.c.l.bf16 %v4232_v0 }
 0x271   :  { %v874_v16 = vpack.c.bf16 %v842_v12, %v842_v12  ;;  %v1044_v21 = vrot.slane %v1043_v13, 2  ;;  %v4237_v11 = vpack.c.bf16 %v1041_v22, %v1041_v22  ;;  %v1156_v18 = vunpack.c.l.bf16 %v4230_v63 }
 0x272   :  { %v1090_v25 = vrot.slane %v913_v5, 4 }
 0x273   :  { %v906_v51 = vunpack.c.l.bf16 %v874_v16  ;;  %v1045_v36 = vmax.f32 %v1043_v13, %v1044_v21  ;;  %v851_v16 = vmax.f32 %v818_v62, 0.0  ;;  %v1159_v21 = vunpack.c.l.bf16 %v4234_v3 }
 0x274   :  { %v797_v23 = vpop.f32.mrf.mxu2  ;;  %v1160_v28 = vunpack.c.l.bf16 %v4237_v11  ;;  %v1091_v41 = vmax.f32 %v913_v5, %v1090_v25 }
 0x275   :  { %v1048_v27 = vrot.slane %v906_v51, 4  ;;  %v798_v31 = vadd.f32 %v797_v23, %v4099_v6  ;;  %v1046_v46 = vrot.slane %v1045_v36, 1  ;;  %v1084_v23 = vrot.slane %v912_v4, 4 }
 0x277   :  { %v1049_v35 = vmax.f32 %v906_v51, %v1048_v27  ;;  %v843_v37 = vmax.f32 %v798_v31, 0.0  ;;  %v1047_v61 = vmax.f32 %v1045_v36, %v1046_v46  ;;  %v1225_v27 = vsel %vm1204_vm1, %v1157_v10, %v1156_v18  ;;  %v3655_v18 = vld [vmem:[%s5214_s6 + $0x38] sm:$0xff] }
 0x278   :  { %v1226_v36 = vsel %vm1206_vm2, %v1158_v19, %v1225_v27  ;;  %1530 = vmatpush.bf16.msra.mxu3 %v3655_v18 }
 0x279   :  { %v1050_v40 = vrot.slane %v1049_v35, 2  ;;  %v875_v44 = vpack.c.bf16 %v843_v37, %v843_v37  ;;  %v4239_v13 = vpack.c.bf16 %v1047_v61, %v1047_v61  ;;  %v1227_v39 = vsel %vm1208_vm3, %v1159_v21, %v1226_v36 }
 0x27a   :  { %v1228_v43 = vsel %vm1210_vm4, %v1160_v28, %v1227_v39  ;;  %v1312_v39 = vperm.slane %v4230_v63, 0  ;;  %v3652_v63 = vld [vmem:[%s5214_s6 + $0x20] sm:$0xff] }
 0x27b   :  { %v1051_v53 = vmax.f32 %v1049_v35, %v1050_v40  ;;  %v907_v48 = vunpack.c.l.bf16 %v875_v44  ;;  %v1161_v31 = vunpack.c.l.bf16 %v4239_v13  ;;  %v883_v35 = vpack.c.bf16 %v851_v16, %v851_v16 }
 0x27c   :  { %v800_v49 = vpop.f32.mrf.mxu2  ;;  %v1085_v40 = vmax.f32 %v912_v4, %v1084_v23 }
 0x27d   :  { %v1052_v52 = vrot.slane %v1051_v53, 1  ;;  %v801_v55 = vadd.f32 %v800_v49, %v4099_v6  ;;  %v1054_v59 = vrot.slane %v907_v48, 4  ;;  %v1229_v47 = vsel %vm1212_vm5, %v1161_v31, %v1228_v43 }
 0x27e   :  { %v1086_v54 = vrot.slane %v1085_v40, 2 }
 0x27f   :  { %v844_v60 = vmax.f32 %v801_v55, 0.0  ;;  %v1055_v45 = vmax.f32 %v907_v48, %v1054_v59  ;;  %v1053_v2 = vmax.f32 %v1051_v53, %v1052_v52  ;;  %v914_v53 = vunpack.c.l.bf16 %v882_v32 }
 0x280   :  { %v915_v48 = vunpack.c.l.bf16 %v883_v35  ;;  %v1092_v55 = vrot.slane %v1091_v41, 2  ;;  %v1313_v35 = vperm.slane %v4226_v24, 0 }
 0x281   :  { %v1056_v8 = vrot.slane %v1055_v45, 2  ;;  %v876_v12 = vpack.c.bf16 %v844_v60, %v844_v60  ;;  %v4243_v51 = vpack.c.bf16 %v1053_v2, %v1053_v2  ;;  %v1096_v22 = vrot.slane %v914_v53, 4 }
 0x282   :  { %v1102_v60 = vrot.slane %v915_v48, 4  ;;  %v1093_v62 = vmax.f32 %v1091_v41, %v1092_v55  ;;  %v1315_v55 = vperm.slane %v4234_v3, 0 }
 0x283   :  { %v1057_v15 = vmax.f32 %v1055_v45, %v1056_v8  ;;  %v908_v29 = vunpack.c.l.bf16 %v876_v12  ;;  %v1162_v37 = vunpack.c.l.bf16 %v4243_v51  ;;  %v1087_v45 = vmax.f32 %v1085_v40, %v1086_v54 }
 0x284   :  { %v802_v17 = vpop.f32.mrf.mxu2  ;;  %v1097_v5 = vmax.f32 %v914_v53, %v1096_v22  ;;  %v1103_v8 = vmax.f32 %v915_v48, %v1102_v60  ;;  %v1345_v48 = vunpack.c.l.b16 %v1313_v35  ;;  %v1347_v3 = vunpack.c.l.b16 %v1315_v55 }
 0x285   :  { %v803_v20 = vadd.f32 %v802_v17, %v4099_v6  ;;  %v1058_v26 = vrot.slane %v1057_v15, 1  ;;  %v1060_v44 = vrot.slane %v908_v29, 4  ;;  %v1230_v50 = vsel %vm1214_vm6, %v1162_v37, %v1229_v47 }
 0x286   :  { %v1088_v16 = vrot.slane %v1087_v45, 1  ;;  %v1094_v17 = vrot.slane %v1093_v62, 1  ;;  %v1098_v23 = vrot.slane %v1097_v5, 2  ;;  %v1104_v25 = vrot.slane %v1103_v8, 2 }
 0x287   :  { %v845_v30 = vmax.f32 %v803_v20, 0.0  ;;  %v1059_v33 = vmax.f32 %v1057_v15, %v1058_v26  ;;  %v1061_v7 = vmax.f32 %v908_v29, %v1060_v44  ;;  %v3654_v26 = vld [vmem:[%s5214_s6 + $0x30] sm:$0xff]  ;;  %v1314_v47 = vperm.slane %v4232_v0, 0 }
 0x288   :  { %v1099_v36 = vmax.f32 %v1097_v5, %v1098_v23  ;;  %v1105_v37 = vmax.f32 %v1103_v8, %v1104_v25  ;;  %1531 = vmatpush.bf16.msra.mxu3 %v3654_v26 }
 0x289   :  { %v877_v38 = vpack.c.bf16 %v845_v30, %v845_v30  ;;  %v4253_v42 = vpack.c.bf16 %v1059_v33, %v1059_v33  ;;  %v1062_v2 = vrot.slane %v1061_v7, 2  ;;  %v1095_v30 = vmax.f32 %v1093_v62, %v1094_v17 }
 0x28a   :  { %v1316_v17 = vperm.slane %v4237_v11, 0 }
 0x28b   :  { %v909_v9 = vunpack.c.l.bf16 %v877_v38  ;;  %v1163_v46 = vunpack.c.l.bf16 %v4253_v42  ;;  %v1063_v19 = vmax.f32 %v1061_v7, %v1062_v2  ;;  %v3653_v38 = vld [vmem:[%s5214_s6 + $0x28] sm:$0xff] }
 0x28c   :  { %v805_v49 = vpop.f32.mrf.mxu2  ;;  %1532 = vmatpush.bf16.msra.mxu3 %v3653_v38 }
 0x28d   :  { %v1066_v34 = vrot.slane %v909_v9, 4  ;;  %v806_v52 = vadd.f32 %v805_v49, %v4099_v6  ;;  %v1231_v56 = vsel %vm1216_vm7, %v1163_v46, %v1230_v50  ;;  %v1064_v31 = vrot.slane %v1063_v19, 1 }
 0x28e   :  { %1245 = vst [vmem:[%s5212_s9 + $0x10] sm:$0xff] %v1231_v56  ;;  %v1100_v49 = vrot.slane %v1099_v36, 1  ;;  %v1106_v50 = vrot.slane %v1105_v37, 1 }
 0x28f   :  { %v1067_v57 = vmax.f32 %v909_v9, %v1066_v34  ;;  %v846_v59 = vmax.f32 %v806_v52, 0.0  ;;  %v4278_v9 = vpack.c.bf16 %v1095_v30, %v1095_v30  ;;  %v1065_v53 = vmax.f32 %v1063_v19, %v1064_v31 }
 0x290   :  { %v1344_v34 = vunpack.c.l.b16 %v1312_v39  ;;  %1533 = vmatpush.bf16.msra.mxu3 %v3652_v63 }
 0x291   :  { %v1068_v61 = vrot.slane %v1067_v57, 2  ;;  %v878_v58 = vpack.c.bf16 %v846_v59, %v846_v59  ;;  %v1325_v0 = vperm.slane %v4278_v9, 0  ;;  %v1132_v59 = vpack.c.bf16 %v1065_v53, %v1065_v53 }
 0x292   :  { %v1374_v60 = vsel %vm1204_vm1, %v1345_v48, %v1344_v34  ;;  %v1169_v62 = vunpack.c.l.bf16 %v4278_v9 }
 0x293   :  { %v910_v4 = vunpack.c.l.bf16 %v878_v58  ;;  %v1069_v12 = vmax.f32 %v1067_v57, %v1068_v61  ;;  %v1346_v57 = vunpack.c.l.b16 %v1314_v47  ;;  %v1101_v61 = vmax.f32 %v1099_v36, %v1100_v49 }
 0x294   :  { %v807_v10 = vpop.f32.mrf.mxu2  ;;  %v1107_v58 = vmax.f32 %v1105_v37, %v1106_v50  ;;  %v1357_v8 = vunpack.c.l.b16 %v1325_v0  ;;  %v1164_v23 = vunpack.c.l.bf16 %v1132_v59 }
 0x295   :  { %v1072_v14 = vrot.slane %v910_v4, 4  ;;  %v808_v15 = vadd.f32 %v807_v10, %v4099_v6  ;;  %v1070_v27 = vrot.slane %v1069_v12, 1  ;;  %v1089_v6 = vmax.f32 %v1087_v45, %v1088_v16 }
 0x296   :  { %v1375_v16 = vsel %vm1206_vm2, %v1346_v57, %v1374_v60  ;;  %v1138_v18 = vpack.c.bf16 %v1101_v61, %v1101_v61  ;;  %v1139_v19 = vpack.c.bf16 %v1107_v58, %v1107_v58  ;;  %v3651_v57 = vld [vmem:[%s5214_s6 + $0x18] sm:$0xff]  ;;  %v3648_v60 = vld [vmem:[%s5214_s6] sm:$0xff] }
 0x297   :  { %v1073_v20 = vmax.f32 %v910_v4, %v1072_v14  ;;  %v847_v21 = vmax.f32 %v808_v15, 0.0  ;;  %v1071_v40 = vmax.f32 %v1069_v12, %v1070_v27  ;;  %v4276_v44 = vpack.c.bf16 %v1089_v6, %v1089_v6  ;;  %1534 = vmatpush.bf16.msra.mxu3 %v3651_v57  ;;  %v3723_v58 = vld [vmem:[%s5210_s8] sm:$0xff] }
 0x298   :  { %v1320_v12 = vperm.slane %v1132_v59, 0  ;;  %v1376_v6 = vsel %vm1208_vm3, %v1347_v3, %v1375_v16  ;;  %v1326_v36 = vperm.slane %v1138_v18, 0  ;;  %v3650_v59 = vld [vmem:[%s5214_s6 + $0x10] sm:$0xff] }
 0x299   :  { %v1074_v28 = vrot.slane %v1073_v20, 2  ;;  %v879_v29 = vpack.c.bf16 %v847_v21, %v847_v21  ;;  %v1133_v52 = vpack.c.bf16 %v1071_v40, %v1071_v40  ;;  %v1324_v56 = vperm.slane %v4276_v44, 0 }
 0x29a   :  { %v1168_v45 = vunpack.c.l.bf16 %v4276_v44  ;;  %v1317_v21 = vperm.slane %v4239_v13, 0  ;;  %v1352_v30 = vunpack.c.l.b16 %v1320_v12  ;;  %v1327_v13 = vperm.slane %v1139_v19, 0  ;;  %v3662_v12 = vld [vmem:[%s5215_s7 + $0x30] sm:$0xff] }
 0x29b   :  { %v1075_v32 = vmax.f32 %v1073_v20, %v1074_v28  ;;  %v911_v33 = vunpack.c.l.bf16 %v879_v29  ;;  %v1321_v2 = vperm.slane %v1133_v52, 0  ;;  %v1356_v5 = vunpack.c.l.b16 %v1324_v56  ;;  %1535 = vmatpush.bf16.msra.mxu3 %v3650_v59 }
 0x29c   :  { %v1165_v14 = vunpack.c.l.bf16 %v1133_v52  ;;  %v1318_v28 = vperm.slane %v4243_v51, 0  ;;  %v1319_v29 = vperm.slane %v4253_v42, 0  ;;  %v1349_v37 = vunpack.c.l.b16 %v1317_v21 }
 0x29d   :  { %v1076_v41 = vrot.slane %v1075_v32, 1  ;;  %v1078_v43 = vrot.slane %v911_v33, 4  ;;  %v1353_v25 = vunpack.c.l.b16 %v1321_v2  ;;  %v1170_v40 = vunpack.c.l.bf16 %v1138_v18 }
 0x29e   :  { %v1232_v31 = vsel %vm1204_vm1, %v1165_v14, %v1164_v23  ;;  %v1171_v44 = vunpack.c.l.bf16 %v1139_v19  ;;  %v1351_v47 = vunpack.c.l.b16 %v1319_v29  ;;  %v1359_v63 = vunpack.c.l.b16 %v1327_v13  ;;  %v3661_v14 = vld [vmem:[%s5215_s7 + $0x28] sm:$0xff] }
 0x29f   :  { %v1077_v24 = vmax.f32 %v1075_v32, %v1076_v41  ;;  %v1079_v46 = vmax.f32 %v911_v33, %v1078_v43  ;;  %v1348_v33 = vunpack.c.l.b16 %v1316_v17  ;;  %v1381_v38 = vsel %vm1204_vm1, %v1353_v25, %v1352_v30  ;;  %v3659_v25 = vld [vmem:[%s5215_s7 + $0x18] sm:$0xff] }
 0x2a0   :  { %v1350_v41 = vunpack.c.l.b16 %v1318_v28  ;;  %v3656_v28 = vld [vmem:[%s5215_s7] sm:$0xff] }
 0x2a1   :  { %v1080_v54 = vrot.slane %v1079_v46, 2  ;;  %v1134_v7 = vpack.c.bf16 %v1077_v24, %v1077_v24  ;;  %v1377_v48 = vsel %vm1210_vm4, %v1348_v33, %v1376_v6  ;;  %v1481_v6 = vperm.slane %v3723_v58, 4 }
 0x2a2   :  { %v1378_v34 = vsel %vm1212_vm5, %v1349_v37, %v1377_v48 }
 0x2a3   :  { %v1081_v22 = vmax.f32 %v1079_v46, %v1080_v54  ;;  %v1322_v10 = vperm.slane %v1134_v7, 0  ;;  %v1166_v20 = vunpack.c.l.bf16 %v1134_v7  ;;  %v1358_v46 = vunpack.c.l.b16 %v1326_v36 }
 0x2a4   :  { %v1379_v54 = vsel %vm1214_vm6, %v1350_v41, %v1378_v34 }
 0x2a5   :  { %v1082_v4 = vrot.slane %v1081_v22, 1  ;;  %v1354_v27 = vunpack.c.l.b16 %v1322_v10  ;;  %v1233_v35 = vsel %vm1206_vm2, %v1166_v20, %v1232_v31  ;;  %v1380_v56 = vsel %vm1216_vm7, %v1351_v47, %v1379_v54  ;;  %v3663_v10 = vld [vmem:[%s5215_s7 + $0x38] sm:$0xff] }
 0x2a7   :  { %v1083_v15 = vmax.f32 %v1081_v22, %v1082_v4  ;;  %v1382_v43 = vsel %vm1206_vm2, %v1354_v27, %v1381_v38  ;;  %v3649_v22 = vld [vmem:[%s5214_s6 + $0x8] sm:$0xff] }
 0x2a8   :  { %1536 = vmatpush.bf16.msra.mxu3 %v3649_v22  ;;  %v3657_v27 = vld [vmem:[%s5215_s7 + $0x8] sm:$0xff] }
 0x2a9   :  { %v1135_v26 = vpack.c.bf16 %v1083_v15, %v1083_v15  ;;  %v3660_v15 = vld [vmem:[%s5215_s7 + $0x20] sm:$0xff] }
 0x2ab   :  { %v1167_v32 = vunpack.c.l.bf16 %v1135_v26  ;;  %v1323_v11 = vperm.slane %v1135_v26, 0  ;;  %v3658_v26 = vld [vmem:[%s5215_s7 + $0x10] sm:$0xff] }
 0x2ac   :  { %1537 = vmatpush.bf16.msra.mxu3 %v3648_v60 }
 0x2ad   :  { %v1234_v39 = vsel %vm1208_vm3, %v1167_v32, %v1233_v35  ;;  %v1355_v51 = vunpack.c.l.b16 %v1323_v11 }
 0x2ae   :  { %v1235_v42 = vsel %vm1210_vm4, %v1168_v45, %v1234_v39  ;;  %v1263_v45 = vperm.slane %v3723_v58, 3 }
 0x2af   :  { %v1236_v9 = vsel %vm1212_vm5, %v1169_v62, %v1235_v42  ;;  %v1383_v53 = vsel %vm1208_vm3, %v1355_v51, %v1382_v43  ;;  %v1571_v42 = vperm.slane %v3723_v58, 5 }
 0x2b0   :  { %v1237_v24 = vsel %vm1214_vm6, %v1170_v40, %v1236_v9  ;;  %v1384_v49 = vsel %vm1210_vm4, %v1356_v5, %v1383_v53  ;;  %1620 = vmatpush.bf16.msrb.mxu3 %v3663_v10 }
 0x2b1   :  { %v1238_v50 = vsel %vm1216_vm7, %v1171_v44, %v1237_v24  ;;  %v1385_v52 = vsel %vm1212_vm5, %v1357_v8, %v1384_v49 }
 0x2b2   :  { %1246 = vst [vmem:[%s5212_s9 + $0x18] sm:$0xff] %v1238_v50  ;;  %v1386_v55 = vsel %vm1214_vm6, %v1358_v46, %v1385_v52 }
 0x2b3   :  { %v1387_v0 = vsel %vm1216_vm7, %v1359_v63, %v1386_v55 }
 0x2b4   :  { %v1389_v7 = vpack.c.b16 %v1387_v0, %v1380_v56  ;;  %1621 = vmatpush.bf16.msrb.mxu3 %v3662_v12 }
 0x2b6   :  { %1453 = vmatmul.bf16.gmra.mxu3 %v1389_v7 }
 0x2b8   :  { %1622 = vmatpush.bf16.msrb.mxu3 %v3661_v14 }
 0x2bc   :  { %1623 = vmatpush.bf16.msrb.mxu3 %v3660_v15 }
 0x2c0   :  { %1624 = vmatpush.bf16.msrb.mxu3 %v3659_v25 }
 0x2c4   :  { %1625 = vmatpush.bf16.msrb.mxu3 %v3658_v26 }
 0x2c8   :  { %1626 = vmatpush.bf16.msrb.mxu3 %v3657_v27 }
 0x2cc   :  { %1627 = vmatpush.bf16.msrb.mxu3 %v3656_v28 }
 0x2d5   :  { %v1449_v61 = vpop.f32.mrf.mxu3 }
 0x2d6   :  { %v1450_v62 = vadd.f32 %v1449_v61, %v1263_v45 }
 0x2d8   :  { %v1459_v3 = vmax.f32 %v1450_v62, 0.0 }
 0x2dd   :  { %v1451_v2 = vpop.f32.mrf.mxu3 }
 0x2de   :  { %v1452_v4 = vadd.f32 %v1451_v2, %v1263_v45  ;;  %v1672_v2 = vlaneseq }
 0x2e0   :  { %v1460_v5 = vmax.f32 %v1452_v4, 0.0 }
 0x2e2   :  { %v1463_v8 = vpack.c.bf16 %v1460_v5, %v1459_v3  ;;  %v4414_v3 = vand.u32 127, %v1672_v2 }
 0x2e4   :  { %1538 = vmatmul.bf16.vlgmr.msra.gmra.mxu3 %v1463_v8 }
 0x339   :  { %v1454_v16 = vpop.f32.mrf.mxu3 }
 0x33a   :  { %v1455_v17 = vadd.f32 %v1454_v16, %v1263_v45 }
 0x33c   :  { %v1461_v20 = vmax.f32 %v1455_v17, 0.0 }
 0x341   :  { %v1456_v18 = vpop.f32.mrf.mxu3 }
 0x342   :  { %v1457_v19 = vadd.f32 %v1456_v18, %v1263_v45 }
 0x344   :  { %v1462_v21 = vmax.f32 %v1457_v19, 0.0 }
 0x346   :  { %v1464_v23 = vpack.c.bf16 %v1462_v21, %v1461_v20 }
 0x348   :  { %1543 = vmatmul.bf16.gmra.mxu3 %v1464_v23 }
 0x367   :  { %v1539_v29 = vpop.f32.mrf.mxu3 }
 0x368   :  { %v1540_v30 = vadd.f32 %v1539_v29, %v1481_v6 }
 0x36a   :  { %v1549_v11 = vmax.f32 %v1540_v30, 0.0 }
 0x36f   :  { %v1541_v31 = vpop.f32.mrf.mxu3 }
 0x370   :  { %v1542_v32 = vadd.f32 %v1541_v31, %v1481_v6 }
 0x372   :  { %v1550_v33 = vmax.f32 %v1542_v32, 0.0 }
 0x374   :  { %v1553_v35 = vpack.c.bf16 %v1550_v33, %v1549_v11 }
 0x376   :  { %1628 = vmatmul.bf16.vlgmr.msrb.gmra.mxu3 %v1553_v35 }
 0x3cb   :  { %v1544_v36 = vpop.f32.mrf.mxu3 }
 0x3cc   :  { %v1545_v13 = vadd.f32 %v1544_v36, %v1481_v6 }
 0x3ce   :  { %v1551_v39 = vmax.f32 %v1545_v13, 0.0 }
 0x3d3   :  { %v1546_v37 = vpop.f32.mrf.mxu3 }
 0x3d4   :  { %v1547_v38 = vadd.f32 %v1546_v37, %v1481_v6 }
 0x3d6   :  { %v1552_v51 = vmax.f32 %v1547_v38, 0.0 }
 0x3d8   :  { %v1554_v40 = vpack.c.bf16 %v1552_v51, %v1551_v39 }
 0x3da   :  { %1633 = vmatmul.bf16.gmra.mxu3 %v1554_v40 }
 0x3f9   :  { %v1629_v41 = vpop.f32.mrf.mxu3 }
 0x3fa   :  { %v4356_v43 = vadd.f32 %v1629_v41, %v1571_v42 }
 0x3fc   :  { %1639 = vst [vmem:[%s5216_s10] sm:$0xff] %v4356_v43  ;;  %1722 = vrot.lane.b32.xlu1 %v4356_v43, %s3729_s14  ;;  %1678 = vrot.lane.b32.xlu2 %v4356_v43, %s3730_s15  ;;  %v3103_v6 = vsel %vm3102_vm12, %v4356_v43, -inf }
 0x3fd   :  { %1647 = vrot.lane.b32.xlu0 %v4356_v43, %s3731_s16 }
 0x401   :  { %v1631_v44 = vpop.f32.mrf.mxu3 }
 0x402   :  { %v4365_v9 = vadd.f32 %v1631_v44, %v1571_v42 }
 0x404   :  { %1640 = vst [vmem:[%s5216_s10 + $0x8] sm:$0xff] %v4365_v9  ;;  %1680 = vrot.lane.b32.xlu2 %v4365_v9, %s3730_s15 }
 0x405   :  { %1649 = vrot.lane.b32.xlu0 %v4365_v9, %s3731_s16 }
 0x40d   :  { %1724 = vrot.lane.b32.xlu0 %v4365_v9, %s3729_s14 }
 0x456   :  { %v1679_v57 = vpop.permute.xlu2 %1678 }
 0x45d   :  { %v1634_v47 = vpop.f32.mrf.mxu3 }
 0x45e   :  { %v4374_v53 = vadd.f32 %v1634_v47, %v1571_v42  ;;  %v1681_v58 = vpop.permute.xlu2 %1680 }
 0x460   :  { %1641 = vst [vmem:[%s5216_s10 + $0x10] sm:$0xff] %v4374_v53  ;;  %1651 = vrot.lane.b32.xlu1 %v4374_v53, %s3731_s16  ;;  %1682 = vrot.lane.b32.xlu2 %v4374_v53, %s3730_s15  ;;  %v3109_v23 = vsel %vm3102_vm12, %v4374_v53, -inf }
 0x465   :  { %v1636_v24 = vpop.f32.mrf.mxu3 }
 0x466   :  { %v4382_v46 = vadd.f32 %v1636_v24, %v1571_v42 }
 0x468   :  { %1642 = vst [vmem:[%s5216_s10 + $0x18] sm:$0xff] %v4382_v46  ;;  %1726 = vrot.lane.b32.xlu1 %v4374_v53, %s3729_s14  ;;  %1684 = vrot.lane.b32.xlu2 %v4382_v46, %s3730_s15  ;;  %v3112_v30 = vsel %vm3102_vm12, %v4382_v46, -inf }
 0x469   :  { %1728 = vrot.lane.b32.xlu0 %v4382_v46, %s3729_s14 }
 0x46e   :  { %v4391_v48 = vpop.permute.xlu1 %1722 }
 0x46f   :  { %v1738_v49 = vsub.f32 %v4356_v43, %v4391_v48  ;;  %v1648_v63 = vpop.permute.xlu0 %1647 }
 0x470   :  { %1653 = vrot.lane.b32.xlu1 %v4382_v46, %s3731_s16  ;;  %v1660_v34 = vsel %vm1659_vm8, %v1648_v63, -inf }
 0x471   :  { %v4396_v50 = vmul.f32 0.5, %v1738_v49 }
 0x477   :  { %v1650_v52 = vpop.permute.xlu0 %1649 }
 0x478   :  { %3086 = vrot.lane.b32.xlu1 %v4396_v50, %s3732_s21  ;;  %v1663_v54 = vsel %vm1659_vm8, %v1650_v52, -inf }
 0x47f   :  { %v4405_v7 = vpop.permute.xlu0 %1724 }
 0x480   :  { %v1739_v59 = vsub.f32 %v4365_v9, %v4405_v7 }
 0x482   :  { %v4410_v61 = vmul.f32 0.5, %v1739_v59 }
 0x491   :  { %1661 = vmax.index.xlane.f32.xlu2 %v1660_v34 }
 0x499   :  { %1664 = vmax.index.xlane.f32.xlu2 %v1663_v54 }
 0x4ba   :  { %v1683_v45 = vpop.permute.xlu2 %1682 }
 0x4c2   :  { %v1685_v62 = vpop.permute.xlu2 %1684 }
 0x4d2   :  { %v1652_v55 = vpop.permute.xlu1 %1651 }
 0x4d3   :  { %v1666_v56 = vsel %vm1659_vm8, %v1652_v55, -inf }
 0x4d4   :  { %1667 = vmax.index.xlane.f32.xlu0 %v1666_v56 }
 0x4da   :  { %v4403_v0 = vpop.permute.xlu1 %1726 }
 0x4db   :  { %v4420_v15 = vpop.permute.xlu0 %1728  ;;  %v1740_v28 = vsub.f32 %v4374_v53, %v4403_v0 }
 0x4dc   :  { %v1741_v16 = vsub.f32 %v4382_v46, %v4420_v15 }
 0x4dd   :  { %v4444_v29 = vmul.f32 0.5, %v1740_v28 }
 0x4de   :  { %v4424_v17 = vmul.f32 0.5, %v1741_v16 }
 0x4e2   :  { %v1654_v22 = vpop.permute.xlu1 %1653 }
 0x4e3   :  { %v1669_v60 = vsel %vm1659_vm8, %v1654_v22, -inf }
 0x4e4   :  { %1670 = vmax.index.xlane.f32.xlu1 %v1669_v60 }
 0x4e8   :  { %3088 = vrot.lane.b32.xlu0 %v4410_v61, %s3732_s21 }
 0x4ea   :  { %v4433_v21 = vpop.permute.xlu1 %3086 }
 0x504   :  { %v1662_v4 = vpop.xlane.xlu2 %1661 }
 0x505   :  { %vm1674_vm9 = vcmp.eq.s32.totalorder %v4414_v3, %v1662_v4  ;;  %v1706_v11 = vcvt.s32.f32 %v1662_v4 }
 0x506   :  { %v1690_v10 = vsel %vm1674_vm9, %v1679_v57, 0.0 }
 0x507   :  { %v1694_v14 = vsel %vm1659_vm8, %v1690_v10, 0.0  ;;  %v1710_v37 = vmul.f32 1.5707964, %v1706_v11 }
 0x50c   :  { %v1665_v5 = vpop.xlane.xlu2 %1664 }
 0x50d   :  { %vm1675_vm10 = vcmp.eq.s32.totalorder %v4414_v3, %v1665_v5  ;;  %v1707_v32 = vcvt.s32.f32 %v1665_v5 }
 0x50e   :  { %v1691_v8 = vsel %vm1675_vm10, %v1681_v58, 0.0 }
 0x50f   :  { %v1697_v12 = vsel %vm1659_vm8, %v1691_v8, 0.0  ;;  %v1711_v35 = vmul.f32 1.5707964, %v1707_v32 }
 0x510   :  { %1698 = vadd.xlane.f32.xlu1 %v1697_v12 }
 0x512   :  { %1695 = vadd.xlane.f32.xlu0 %v1694_v14  ;;  %v5231_v14 = vmov 683565275  }
 0x529   :  { %3092 = vrot.lane.b32.xlu1 %v4424_v17, %s3732_s21 }
 0x547   :  { %v4428_v18 = vpop.xlane.xlu0 %1667 }
 0x548   :  { %vm1676_vm11 = vcmp.eq.s32.totalorder %v4414_v3, %v4428_v18 }
 0x549   :  { %v1692_v19 = vsel %vm1676_vm11, %v1683_v45, 0.0 }
 0x54a   :  { %v1700_v20 = vsel %vm1659_vm8, %v1692_v19, 0.0  ;;  %v3735_v19 = vmov 2475754826  }
 0x54b   :  { %1701 = vadd.xlane.f32.xlu2 %v1700_v20 }
 0x553   :  { %3110 = vmax.index.xlane.f32.xlu1 %v3109_v23  ;;  %v3736_v23 = vmov 2131351028  }
 0x557   :  { %v4437_v25 = vpop.xlane.xlu1 %1670 }
 0x558   :  { %vm1677_vm13 = vcmp.eq.s32.totalorder %v4414_v3, %v4437_v25 }
 0x559   :  { %v1693_v26 = vsel %vm1677_vm13, %v1685_v62, 0.0 }
 0x55a   :  { %v1703_v27 = vsel %vm1659_vm8, %v1693_v26, 0.0  ;;  %v4454_v31 = vpop.permute.xlu0 %3088 }
 0x55b   :  { %1704 = vadd.xlane.f32.xlu0 %v1703_v27 }
 0x563   :  { %3090 = vrot.lane.b32.xlu2 %v4444_v29, %s3732_s21  ;;  %3104 = vmax.index.xlane.f32.xlu0 %v3103_v6 }
 0x56b   :  { %3113 = vmax.index.xlane.f32.xlu0 %v3112_v30  ;;  %v5225_v30 = vmov 2102212464  }
 0x56c   :  { %3121 = vrot.lane.b32.xlu1 %v4365_v9, %s3733_s22 }
 0x57f   :  { %3123 = vrot.lane.b32.xlu0 %v4374_v53, %s3733_s22  ;;  %v3106_v53 = vsel %vm3102_vm12, %v4365_v9, -inf }
 0x583   :  { %v1699_v33 = vpop.xlane.xlu1 %1698 }
 0x584   :  { %v1715_v36 = vmul.f32 0.7853982, %v1699_v33  ;;  %v5223_v33 = vmov 920167782  }
 0x585   :  { %v1696_v13 = vpop.xlane.xlu0 %1695 }
 0x586   :  { %v4458_v38 = vadd.f32 %v1715_v36, %v1711_v35  ;;  %v1714_v39 = vmul.f32 0.7853982, %v1696_v13  ;;  %v5222_v13 = vmov 1326507024  }
 0x588   :  { %v1903_v51 = vand.u32 2139095040, %v4458_v38  ;;  %v4461_v40 = vadd.f32 %v1714_v39, %v1710_v37  ;;  %v5219_v42 = vand.u32 2147483647, %v4458_v38 }
 0x58a   :  { %v1904_v41 = vshrl.u32 %v1903_v51, 23  ;;  %v1749_v44 = vand.u32 2139095040, %v4461_v40  ;;  %v1746_v47 = vand.u32 2147483647, %v4461_v40  ;;  %v1907_v24 = vand.u32 8388607, %v5219_v42 }
 0x58c   :  { %v3579_v49 = vadd.s32 4294967169, %v1904_v41  ;;  %v1750_v63 = vshrl.u32 %v1749_v44, 23  ;;  %3107 = vmax.index.xlane.f32.xlu2 %v3106_v53  ;;  %v1753_v34 = vand.u32 8388607, %v1746_v47  ;;  %v1908_v52 = vor.u32 8388608, %v1907_v24 }
 0x58e   :  { %v1910_v54 = vadd.s32 1, %v3579_v49  ;;  %v3576_v55 = vadd.s32 4294967169, %v1750_v63  ;;  %v1754_v56 = vor.u32 8388608, %v1753_v34  ;;  %v4472_v22 = vshll.u32 %v1908_v52, 8 }
 0x590   :  { %vm1911_vm14 = vcmp.gt.s32.totalorder %v1910_v54, 0  ;;  %v1756_v57 = vadd.s32 1, %v3576_v55  ;;  %v4474_v9 = vshll.u32 %v1754_v56, 8  ;;  %v4479_v4 = vand.u32 65535, %v4472_v22 }
 0x591   :  { %v1912_v59 = vsel %vm1911_vm14, %v1910_v54, 0 }
 0x592   :  { %v1914_v60 = vand.u32 31, %v1912_v59  ;;  %vm1757_vm15 = vcmp.gt.s32.totalorder %v1756_v57, 0  ;;  %v4476_v62 = vshrl.u32 %v1912_v59, 5  ;;  %v4484_v10 = vand.u32 65535, %v4474_v9 }
 0x593   :  { %v1758_v58 = vsel %vm1757_vm15, %v1756_v57, 0  ;;  %v4487_v12 = vshrl.u32 %v4474_v9, 16 }
 0x594   :  { %v1760_v45 = vand.u32 31, %v1758_v58  ;;  %v1759_v2 = vshrl.u32 %v1758_v58, 5  ;;  %v4481_v5 = vsub.s32 32, %v1914_v60  ;;  %v1917_v27 = vshll.u32 %v5231_v14, %v1914_v60 }
 0x595   :  { %vm1932_vm4 = vcmp.lt.s32.totalorder %v4476_v62, 1  ;;  %vm1935_vm10 = vcmp.lt.s32.totalorder %v4476_v62, 4  ;;  %vm1934_vm11 = vcmp.lt.s32.totalorder %v4476_v62, 3  ;;  %vm1933_vm12 = vcmp.lt.s32.totalorder %v4476_v62, 2 }
 0x596   :  { %v1761_v8 = vsub.s32 32, %v1760_v45  ;;  %v1763_v16 = vshll.u32 %v5231_v14, %v1760_v45  ;;  %v1766_v20 = vshll.u32 %v3735_v19, %v1760_v45  ;;  %v1769_v26 = vshll.u32 %v3736_v23, %v1760_v45 }
 0x597   :  { %v1772_v11 = vshll.u32 %v5225_v30, %v1760_v45  ;;  %v1775_v36 = vshll.u32 %v5223_v33, %v1760_v45  ;;  %vm1778_vm0 = vcmp.lt.s32.totalorder %v1759_v2, 1  ;;  %vm1779_vm1 = vcmp.lt.s32.totalorder %v1759_v2, 2 }
 0x598   :  { %v1764_v28 = vshrl.u32 %v3735_v19, %v1761_v8  ;;  %v1767_v6 = vshrl.u32 %v3736_v23, %v1761_v8  ;;  %v1770_v32 = vshrl.u32 %v5225_v30, %v1761_v8  ;;  %v1773_v35 = vshrl.u32 %v5223_v33, %v1761_v8 }
 0x599   :  { %v1776_v37 = vshrl.u32 %v5222_v13, %v1761_v8  ;;  %v1762_v44 = vshrl.u32 %v5231_v14, %v1761_v8  ;;  %vm1781_vm2 = vcmp.lt.s32.totalorder %v1759_v2, 4  ;;  %vm1780_vm3 = vcmp.lt.s32.totalorder %v1759_v2, 3 }
 0x59a   :  { %v1765_v39 = vor.u32 %v1764_v28, %v1763_v16  ;;  %v1768_v51 = vor.u32 %v1767_v6, %v1766_v20  ;;  %v1771_v41 = vor.u32 %v1770_v32, %v1769_v26  ;;  %v1774_v53 = vor.u32 %v1773_v35, %v1772_v11 }
 0x59b   :  { %v1777_v24 = vor.u32 %v1776_v37, %v1775_v36  ;;  %v1918_v34 = vshrl.u32 %v3735_v19, %v4481_v5  ;;  %v1921_v56 = vshrl.u32 %v3736_v23, %v4481_v5  ;;  %v1920_v20 = vshll.u32 %v3735_v19, %v1914_v60 }
 0x59c   :  { %v1783_v49 = vsel %vm1781_vm2, %v1771_v41, 2102212464  ;;  %v1786_v63 = vsel %vm1778_vm0, %v1765_v39, %v1768_v51  ;;  %v1787_v52 = vsel %vm1781_vm2, %v1774_v53, 920167782  ;;  %v1790_v54 = vsel %vm1778_vm0, %v1768_v51, %v1771_v41 }
 0x59d   :  { %v1791_v55 = vsel %vm1781_vm2, %v1777_v24, 1326507024  ;;  %v1782_v57 = vsel %vm1778_vm0, %v1762_v44, %v1765_v39  ;;  %v1784_v59 = vsel %vm1780_vm3, %v1768_v51, %v1783_v49  ;;  %v1788_v58 = vsel %vm1780_vm3, %v1771_v41, %v1787_v52 }
 0x59e   :  { %v1792_v45 = vsel %vm1780_vm3, %v1774_v53, %v1791_v55  ;;  %v1789_v8 = vsel %vm1779_vm1, %v1786_v63, %v1788_v58  ;;  %v1923_v26 = vshll.u32 %v3736_v23, %v1914_v60  ;;  %v4513_v35 = vsel %vm1779_vm1, %v1782_v57, %v1784_v59 }
 0x59f   :  { %v1793_v16 = vsel %vm1779_vm1, %v1790_v54, %v1792_v45  ;;  %v1819_v32 = vand.u32 65535, %v1789_v8  ;;  %v1820_v11 = vshrl.u32 %v1789_v8, 16  ;;  %v4515_v36 = vor.u32 %v1918_v34, %v1917_v27 }
 0x5a0   :  { %v1797_v28 = vand.u32 65535, %v1793_v16  ;;  %v1798_v6 = vshrl.u32 %v1793_v16, 16  ;;  %v1926_v37 = vshll.u32 %v5225_v30, %v1914_v60  ;;  %v1929_v39 = vshll.u32 %v5223_v33, %v1914_v60 }
 0x5a1   :  { %v4521_v44 = vor.u32 %v1921_v56, %v1920_v20  ;;  %v1924_v53 = vshrl.u32 %v5225_v30, %v4481_v5  ;;  %v1822_v24 = vmul.u32 %v1820_v11, %v4484_v10  ;;  %v1823_v2 = vmul.u32 %v1819_v32, %v4487_v12 }
 0x5a2   :  { %v1800_v51 = vmul.u32 %v1798_v6, %v4484_v10  ;;  %v1801_v41 = vmul.u32 %v1797_v28, %v4487_v12  ;;  %v1927_v27 = vshrl.u32 %v5223_v33, %v4481_v5  ;;  %v1930_v49 = vshrl.u32 %v5222_v13, %v4481_v5 }
 0x5a3   :  { %v1799_v60 = vmul.u32 %v1797_v28, %v4484_v10  ;;  %v1802_v63 = vmul.u32 %v1798_v6, %v4487_v12  ;;  %v1821_v54 = vmul.u32 %v1819_v32, %v4484_v10  ;;  %v1824_v55 = vmul.u32 %v1820_v11, %v4487_v12 }
 0x5a4   :  { %3119 = vrot.lane.b32.xlu2 %v4356_v43, %s3733_s22  ;;  %v1803_v34 = vshll.u32 %v1800_v51, 16  ;;  %v1804_v52 = vshrl.u32 %v1800_v51, 16  ;;  %v1825_v56 = vshll.u32 %v1822_v24, 16  ;;  %v1805_v57 = vshll.u32 %v1801_v41, 16 }
 0x5a5   :  { %v1827_v58 = vshll.u32 %v1823_v2, 16  ;;  %v4539_v8 = vor.u32 %v1924_v53, %v1923_v26  ;;  %v1928_v28 = vor.u32 %v1927_v27, %v1926_v37  ;;  %v1931_v12 = vor.u32 %v1930_v49, %v1929_v39 }
 0x5a6   :  { %vm1807_vm5 = vc.u32 %v1799_v60, %v1803_v34  ;;  %v1809_v59 = vadd.s32 %v1803_v34, %v1799_v60  ;;  %vm1829_vm6 = vc.u32 %v1821_v54, %v1825_v56  ;;  %v1831_v43 = vadd.s32 %v1825_v56, %v1821_v54 }
 0x5a7   :  { %v1808_v45 = vsel %vm1807_vm5, 1, %v5232_v1  ;;  %v1830_v20 = vsel %vm1829_vm6, 1, %v5232_v1  ;;  %v1806_v32 = vshrl.u32 %v1801_v41, 16  ;;  %v1826_v51 = vshrl.u32 %v1822_v24, 16 }
 0x5a8   :  { %v1810_v16 = vadd.s32 %v1808_v45, %v1802_v63  ;;  %vm1811_vm7 = vc.u32 %v1809_v59, %v1805_v57  ;;  %v1832_v6 = vadd.s32 %v1830_v20, %v1824_v55  ;;  %vm1833_vm9 = vc.u32 %v1831_v43, %v1827_v58 }
 0x5a9   :  { %v1812_v10 = vsel %vm1811_vm7, 1, %v5232_v1  ;;  %v1834_v60 = vsel %vm1833_vm9, 1, %v5232_v1  ;;  %v1828_v34 = vshrl.u32 %v1823_v2, 16  ;;  %v1940_v26 = vsel %vm1932_vm4, %v4515_v36, %v4521_v44 }
 0x5aa   :  { %v1814_v11 = vadd.s32 %v1812_v10, %v1810_v16  ;;  %v1836_v42 = vadd.s32 %v1834_v60, %v1832_v6  ;;  %v1941_v39 = vsel %vm1935_vm10, %v1928_v28, 920167782  ;;  %v1944_v41 = vsel %vm1932_vm4, %v4521_v44, %v4539_v8 }
 0x5ab   :  { %v1942_v24 = vsel %vm1934_vm11, %v4539_v8, %v1941_v39  ;;  %v4566_v27 = vadd.s32 %v1831_v43, %v1827_v58  ;;  %v1950_v56 = vshrl.u32 %v4472_v22, 16  ;;  %v1839_v43 = vmul.u32 %v4474_v9, %v4513_v35 }
 0x5ac   :  { %3125 = vrot.lane.b32.xlu2 %v4382_v46, %s3733_s22  ;;  %v1815_v37 = vadd.s32 %v1814_v11, %v1804_v52  ;;  %v1837_v53 = vadd.s32 %v1836_v42, %v1826_v51  ;;  %v1945_v46 = vsel %vm1935_vm10, %v1931_v12, 1326507024  ;;  %v1943_v49 = vsel %vm1933_vm12, %v1940_v26, %v1942_v24 }
 0x5ad   :  { %v1946_v63 = vsel %vm1934_vm11, %v1928_v28, %v1945_v46  ;;  %v1973_v54 = vand.u32 65535, %v1943_v49  ;;  %v1974_v55 = vshrl.u32 %v1943_v49, 16  ;;  %vm1748_vm5 = vcmp.lt.s32.totalorder %v4461_v40, 0 }
 0x5ae   :  { %v4564_v2 = vadd.s32 %v1815_v37, %v1806_v32  ;;  %v1838_v42 = vadd.s32 %v1837_v53, %v1828_v34  ;;  %v1947_v52 = vsel %vm1933_vm12, %v1944_v41, %v1946_v63  ;;  %v1937_v63 = vsel %vm1935_vm10, %v4539_v8, 2102212464 }
 0x5af   :  { %v1951_v57 = vand.u32 65535, %v1947_v52  ;;  %v1952_v59 = vshrl.u32 %v1947_v52, 16  ;;  %v1976_v45 = vmul.u32 %v1974_v55, %v4479_v4  ;;  %v1975_v10 = vmul.u32 %v1973_v54, %v4479_v4 }
 0x5b0   :  { %vm1841_vm13 = vc.u32 %v4564_v2, %v4566_v27  ;;  %v1842_v58 = vadd.s32 1, %v1838_v42  ;;  %v1977_v6 = vmul.u32 %v1973_v54, %v1950_v56  ;;  %v1978_v26 = vmul.u32 %v1974_v55, %v1950_v56 }
 0x5b1   :  { %v1954_v16 = vmul.u32 %v1952_v59, %v4479_v4  ;;  %v1955_v20 = vmul.u32 %v1951_v57, %v1950_v56  ;;  %v1979_v12 = vshll.u32 %v1976_v45, 16  ;;  %v1953_v11 = vmul.u32 %v1951_v57, %v4479_v4 }
 0x5b2   :  { %v1843_v28 = vsel %vm1841_vm13, %v1842_v58, %v1838_v42  ;;  %v1956_v60 = vmul.u32 %v1952_v59, %v1950_v56  ;;  %v1981_v41 = vshll.u32 %v1977_v6, 16  ;;  %v1916_v4 = vshrl.u32 %v5231_v14, %v4481_v5 }
 0x5b3   :  { %v1844_v32 = vadd.s32 %v1843_v28, %v1839_v43  ;;  %v1957_v51 = vshll.u32 %v1954_v16, 16  ;;  %v1959_v34 = vshll.u32 %v1955_v20, 16  ;;  %vm1983_vm14 = vc.u32 %v1975_v10, %v1979_v12 }
 0x5b4   :  { %v1984_v9 = vsel %vm1983_vm14, 1, %v5232_v1  ;;  %v1985_v53 = vadd.s32 %v1979_v12, %v1975_v10  ;;  %v1958_v54 = vshrl.u32 %v1954_v16, 16  ;;  %v1708_v57 = vcvt.s32.f32 %v4428_v18 }
 0x5b5   :  { %v1845_v37 = vadd.s32 536870912, %v1844_v32  ;;  %vm1961_vm15 = vc.u32 %v1953_v11, %v1957_v51  ;;  %v1963_v39 = vadd.s32 %v1957_v51, %v1953_v11  ;;  %v1986_v24 = vadd.s32 %v1984_v9, %v1978_v26 }
 0x5b6   :  { %v1962_v35 = vsel %vm1961_vm15, 1, %v5232_v1  ;;  %vm1987_vm1 = vc.u32 %v1985_v53, %v1981_v41  ;;  %v1936_v59 = vsel %vm1932_vm4, %v1916_v4, %v4515_v36  ;;  %v1980_v58 = vshrl.u32 %v1976_v45, 16 }
 0x5b7   :  { %v1846_v46 = vshrl.u32 %v1845_v37, 30  ;;  %v1964_v49 = vadd.s32 %v1962_v35, %v1956_v60  ;;  %vm1965_vm0 = vc.u32 %v1963_v39, %v1959_v34  ;;  %v1988_v56 = vsel %vm1987_vm1, 1, %v5232_v1 }
 0x5b8   :  { %v1966_v42 = vsel %vm1965_vm0, 1, %v5232_v1  ;;  %v1990_v5 = vadd.s32 %v1988_v56, %v1986_v24  ;;  %v1938_v8 = vsel %vm1934_vm11, %v4521_v44, %v1937_v63  ;;  %v1960_v28 = vshrl.u32 %v1955_v20, 16 }
 0x5b9   :  { %v1847_v52 = vshll.u32 %v1846_v46, 30  ;;  %v1968_v55 = vadd.s32 %v1966_v42, %v1964_v49  ;;  %v1982_v12 = vshrl.u32 %v1977_v6, 16  ;;  %v4601_v18 = vadd.s32 %v1985_v53, %v1981_v41 }
 0x5ba   :  { %v1991_v16 = vadd.s32 %v1990_v5, %v1980_v58  ;;  %v1712_v34 = vmul.f32 1.5707964, %v1708_v57  ;;  %v1939_v45 = vsel %vm1933_vm12, %v1936_v59, %v1938_v8  ;;  %v1870_v24 = vsub.s32 4, %v1846_v46 }
 0x5bb   :  { %v1848_v43 = vsub.s32 %v1844_v32, %v1847_v52  ;;  %v1969_v10 = vadd.s32 %v1968_v55, %v1958_v54  ;;  %v1993_v37 = vmul.u32 %v4472_v22, %v1939_v45  ;;  %v1840_v63 = vadd.s32 %v4566_v27, %v4564_v2 }
 0x5bc   :  { %v1992_v32 = vadd.s32 %v1991_v16, %v1982_v12  ;;  %v1871_v58 = vsel %vm1748_vm5, %v1870_v24, %v1846_v46  ;;  %v1709_v8 = vcvt.s32.f32 %v4437_v25  ;;  %vm4620_vm7 = vcmp.le.f32.partialorder %v1746_v47, 0.7853982  ;;  %v4630_v16 = vpop.permute.xlu1 %3092 }
 0x5bd   :  { %vm1849_vm2 = vcmp.lt.s32.totalorder %v1848_v43, 0  ;;  %v1850_v51 = vsub.s32 0, %v1848_v43  ;;  %v4599_v60 = vadd.s32 %v1969_v10, %v1960_v28  ;;  %vm1902_vm10 = vcmp.lt.s32.totalorder %v4458_v38, 0 }
 0x5be   :  { %v1702_v11 = vpop.xlane.xlu2 %1701  ;;  %v1996_v6 = vadd.s32 1, %v1992_v32 }
 0x5bf   :  { %v1716_v36 = vmul.f32 0.7853982, %v1702_v11  ;;  %v1851_v26 = vsel %vm1849_vm2, %v1850_v51, %v1848_v43  ;;  %vm1995_vm3 = vc.u32 %v4599_v60, %v4601_v18  ;;  %v1713_v51 = vmul.f32 1.5707964, %v1709_v8 }
 0x5c0   :  { %v1852_v20 = vclz %v1851_v26  ;;  %v1997_v35 = vsel %vm1995_vm3, %v1996_v6, %v1992_v32 }
 0x5c1   :  { %v4607_v44 = vadd.f32 %v1716_v36, %v1712_v34  ;;  %v1998_v41 = vadd.s32 %v1997_v35, %v1993_v37 }
 0x5c2   :  { %v3577_v9 = vadd.s32 4294967294, %v1852_v20 }
 0x5c3   :  { %v2057_v39 = vand.u32 2139095040, %v4607_v44  ;;  %v1999_v49 = vadd.s32 536870912, %v1998_v41  ;;  %v5220_v56 = vand.u32 2147483647, %v4607_v44 }
 0x5c4   :  { %vm3578_vm4 = vcmp.lt.s32.totalorder %v3577_v9, 0 }
 0x5c5   :  { %v2058_v53 = vshrl.u32 %v2057_v39, 23  ;;  %v1855_v62 = vsel %vm3578_vm4, 0, %v3577_v9  ;;  %v2000_v54 = vshrl.u32 %v1999_v49, 30  ;;  %v2061_v46 = vand.u32 8388607, %v5220_v56 }
 0x5c6   :  { %v1856_v42 = vsub.s32 32, %v1855_v62  ;;  %v1860_v52 = vsub.s32 4294967266, %v1855_v62  ;;  %v1857_v57 = vshll.u32 %v1848_v43, %v1855_v62  ;;  %v4626_v43 = vsel %vm4620_vm7, 0, %v1871_v58 }
 0x5c7   :  { %v3582_v4 = vadd.s32 4294967169, %v2058_v53  ;;  %v2001_v5 = vshll.u32 %v2000_v54, 30  ;;  %v2506_v26 = vadd.s32 3, %v4626_v43  ;;  %v2024_v39 = vsub.s32 4, %v2000_v54 }
 0x5c8   :  { %v1858_v22 = vshrl.u32 %v1840_v63, %v1856_v42  ;;  %v1861_v59 = vadd.s32 127, %v1860_v52  ;;  %v2062_v9 = vor.u32 8388608, %v2061_v46  ;;  %v1994_v49 = vadd.s32 %v4601_v18, %v4599_v60 }
 0x5c9   :  { %v2064_v55 = vadd.s32 1, %v3582_v4  ;;  %v2002_v12 = vsub.s32 %v1998_v41, %v2001_v5  ;;  %v4637_v24 = vand.u32 3, %v2506_v26  ;;  %v2025_v63 = vsel %vm1902_vm10, %v2024_v39, %v2000_v54 }
 0x5ca   :  { %v1859_v28 = vor.u32 %v1858_v22, %v1857_v57  ;;  %v1862_v10 = vshll.u32 %v1861_v59, 23  ;;  %v4645_v42 = vshll.u32 %v2062_v9, 8 }
 0x5cb   :  { %vm2065_vm6 = vcmp.gt.s32.totalorder %v2064_v55, 0  ;;  %vm2003_vm9 = vcmp.lt.s32.totalorder %v2002_v12, 0  ;;  %v2004_v47 = vsub.s32 0, %v2002_v12  ;;  %vm2509_vm1 = vcmp.eq.s32.totalorder %v4637_v24, 0 }
 0x5cc   :  { %v2066_v27 = vsel %vm2065_vm6, %v2064_v55, 0  ;;  %v1863_v11 = vor.u32 4788187, %v1862_v10  ;;  %v1866_v32 = vcvt.s32.f32 %v1859_v28  ;;  %v4649_v55 = vpop.xlane.xlu1 %3110  ;;  %vm2512_vm2 = vcmp.eq.s32.totalorder %v4637_v24, 2 }
 0x5cd   :  { %v2068_v34 = vand.u32 31, %v2066_v27  ;;  %v2005_v20 = vsel %vm2003_vm9, %v2004_v47, %v2002_v12  ;;  %v4647_v52 = vshrl.u32 %v2066_v27, 5  ;;  %5236 = vst [vmem:[#allocation3_spill] sm:$0xff] %v4649_v55  ;;  %vm2508_vm3 = vcmp.lt.s32.totalorder %v4637_v24, 2 }
 0x5ce   :  { %v1705_v25 = vpop.xlane.xlu0 %1704  ;;  %v1864_v45 = vand.u32 2147483647, %v1863_v11  ;;  %v2006_v37 = vclz %v2005_v20 }
 0x5cf   :  { %v1717_v36 = vmul.f32 0.7853982, %v1705_v25  ;;  %v4635_v41 = vsub.s32 32, %v2068_v34  ;;  %v2071_v59 = vshll.u32 %v5231_v14, %v2068_v34  ;;  %v2074_v58 = vshll.u32 %v3735_v19, %v2068_v34 }
 0x5d0   :  { %v1867_v35 = vmul.f32 %v1866_v32, %v1864_v45  ;;  %v3580_v53 = vadd.s32 4294967294, %v2006_v37  ;;  %v2077_v20 = vshll.u32 %v3736_v23, %v2068_v34  ;;  %v2080_v37 = vshll.u32 %v5225_v30, %v2068_v34 }
 0x5d1   :  { %v4633_v6 = vadd.f32 %v1717_v36, %v1713_v51  ;;  %v2072_v54 = vshrl.u32 %v3735_v19, %v4635_v41  ;;  %v2075_v27 = vshrl.u32 %v3736_v23, %v4635_v41  ;;  %v2078_v28 = vshrl.u32 %v5225_v30, %v4635_v41 }
 0x5d2   :  { %v1868_v62 = vxor.u32 2147483648, %v1867_v35  ;;  %vm3581_vm11 = vcmp.lt.s32.totalorder %v3580_v53, 0  ;;  %v2081_v46 = vshrl.u32 %v5223_v33, %v4635_v41  ;;  %v2084_v25 = vshrl.u32 %v5222_v13, %v4635_v41 }
 0x5d3   :  { %v2211_v4 = vand.u32 2139095040, %v4633_v6  ;;  %v2009_v57 = vsel %vm3581_vm11, 0, %v3580_v53  ;;  %v5237_v51 = vand.u32 2147483647, %v4458_v38  ;;  %v2073_v26 = vor.u32 %v2072_v54, %v2071_v59 }
 0x5d4   :  { %v1869_v22 = vsel %vm1748_vm5, %v1868_v62, %v1867_v35  ;;  %v2010_v18 = vsub.s32 32, %v2009_v57  ;;  %v2014_v8 = vsub.s32 4294967266, %v2009_v57  ;;  %v2011_v45 = vshll.u32 %v2002_v12, %v2009_v57 }
 0x5d5   :  { %v4657_v60 = vsel %vm4620_vm7, %v4461_v40, %v1869_v22  ;;  %v2212_v10 = vshrl.u32 %v2211_v4, 23  ;;  %vm4674_vm12 = vcmp.le.f32.partialorder %v5237_v51, 0.7853982  ;;  %v2083_v39 = vshll.u32 %v5223_v33, %v2068_v34 }
 0x5d6   :  { %v1874_v5 = vmul.f32 %v4657_v60, %v4657_v60  ;;  %v2012_v2 = vshrl.u32 %v1994_v49, %v2010_v18  ;;  %v2015_v32 = vadd.s32 127, %v2014_v8  ;;  %v4681_v49 = vor.u32 %v2075_v27, %v2074_v58  ;;  %v4683_v54 = vpop.xlane.xlu0 %3104 }
 0x5d7   :  { %v2079_v4 = vor.u32 %v2078_v28, %v2077_v20  ;;  %v2082_v22 = vor.u32 %v2081_v46, %v2080_v37  ;;  %v2085_v18 = vor.u32 %v2084_v25, %v2083_v39  ;;  %v3585_v51 = vadd.s32 4294967169, %v2212_v10 }
 0x5d8   :  { %v1875_v11 = vmul.f32 -0.001358992, %v1874_v5  ;;  %v1882_v47 = vmul.f32 -0.00019511016, %v1874_v5  ;;  %v2013_v53 = vor.u32 %v2012_v2, %v2011_v45  ;;  %v2016_v62 = vshll.u32 %v2015_v32, 23 }
 0x5d9   :  { %vm2086_vm13 = vcmp.lt.s32.totalorder %v4647_v52, 1  ;;  %vm2088_vm14 = vcmp.lt.s32.totalorder %v4647_v52, 3  ;;  %vm2089_vm15 = vcmp.lt.s32.totalorder %v4647_v52, 4  ;;  %v2218_v32 = vadd.s32 1, %v3585_v51 }
 0x5da   :  { %v1876_v9 = vadd.f32 0.041655596, %v1875_v11  ;;  %v1883_v35 = vadd.f32 0.008332121, %v1882_v47  ;;  %v2017_v59 = vor.u32 4788187, %v2016_v62  ;;  %v2020_v28 = vcvt.s32.f32 %v2013_v53 }
 0x5db   :  { %v2094_v10 = vsel %vm2086_vm13, %v2073_v26, %v4681_v49  ;;  %v2095_v2 = vsel %vm2089_vm15, %v2082_v22, 920167782  ;;  %v2099_v46 = vsel %vm2089_vm15, %v2085_v18, 1326507024  ;;  %v4703_v20 = vsel %vm4674_vm12, 0, %v2025_v63 }
 0x5dc   :  { %v1877_v12 = vmul.f32 %v1876_v9, %v1874_v5  ;;  %v1884_v57 = vmul.f32 %v1883_v35, %v1874_v5  ;;  %v2018_v27 = vand.u32 2147483647, %v2017_v59  ;;  %v2096_v45 = vsel %vm2088_vm14, %v2079_v4, %v2095_v2 }
 0x5dd   :  { %vm2087_vm0 = vcmp.lt.s32.totalorder %v4647_v52, 2  ;;  %v2100_v37 = vsel %vm2088_vm14, %v2082_v22, %v2099_v46  ;;  %v2103_v53 = vand.u32 65535, %v4645_v42  ;;  %v2104_v63 = vshrl.u32 %v4645_v42, 16 }
 0x5de   :  { %v3122_v56 = vpop.permute.xlu1 %3121  ;;  %v1878_v34 = vadd.f32 -0.4999988, %v1877_v12  ;;  %v1885_v58 = vadd.f32 -0.16666654, %v1884_v57  ;;  %v2021_v47 = vmul.f32 %v2020_v28, %v2018_v27  ;;  %v2070_v57 = vshrl.u32 %v5231_v14, %v4635_v41  ;;  %v4739_v28 = vpop.xlane.xlu0 %3113 }
 0x5df   :  { %v3134_v8 = vsel %vm1659_vm8, %v3122_v56, -inf  ;;  %v2098_v56 = vsel %vm2086_vm13, %v4681_v49, %v2079_v4  ;;  %vm2219_vm4 = vcmp.gt.s32.totalorder %v2218_v32, 0  ;;  %v2091_v41 = vsel %vm2089_vm15, %v2079_v4, 2102212464  ;;  %5240 = vst [vmem:[#allocation4_spill] sm:$0xff] %v4739_v28 }
 0x5e0   :  { %3135 = vmax.index.xlane.f32.xlu1 %v3134_v8  ;;  %v1879_v25 = vmul.f32 %v1878_v34, %v1874_v5  ;;  %v1886_v11 = vmul.f32 %v1885_v58, %v1874_v5  ;;  %v2022_v9 = vxor.u32 2147483648, %v2021_v47  ;;  %v2097_v5 = vsel %vm2087_vm0, %v2094_v10, %v2096_v45 }
 0x5e1   :  { %v2101_v35 = vsel %vm2087_vm0, %v2098_v56, %v2100_v37  ;;  %v2090_v27 = vsel %vm2086_vm13, %v2070_v57, %v2073_v26  ;;  %v2127_v56 = vand.u32 65535, %v2097_v5  ;;  %vm1889_vm5 = vweird.f32 %v4461_v40 }
 0x5e2   :  { %v1887_v39 = vadd.f32 1.0, %v1886_v11  ;;  %v2105_v62 = vand.u32 65535, %v2101_v35  ;;  %v2106_v18 = vshrl.u32 %v2101_v35, 16  ;;  %v4715_v51 = vadd.f32 1.0, %v1879_v25 }
 0x5e3   :  { %v2023_v12 = vsel %vm1902_vm10, %v2022_v9, %v2021_v47  ;;  %v4746_v4 = vsel %vm2219_vm4, %v2218_v32, 0  ;;  %v2092_v32 = vsel %vm2088_vm14, %v4681_v49, %v2091_v41 }
 0x5e4   :  { %v4718_v22 = vmul.f32 %v1887_v39, %v4657_v60  ;;  %v4729_v59 = vsel %vm4674_vm12, %v4458_v38, %v2023_v12  ;;  %v2108_v8 = vmul.u32 %v2106_v18, %v2103_v53  ;;  %v4731_v34 = vmul.u32 %v2105_v62, %v2104_v63 }
 0x5e5   :  { %v2128_v60 = vshrl.u32 %v2097_v5, 16  ;;  %v2028_v58 = vmul.f32 %v4729_v59, %v4729_v59  ;;  %v2107_v10 = vmul.u32 %v2105_v62, %v2103_v53  ;;  %v5227_v46 = vxor.u32 2147483648, %v4715_v51 }
 0x5e6   :  { %v5221_v36 = vxor.u32 2147483648, %v4718_v22  ;;  %v2111_v2 = vshll.u32 %v2108_v8, 16  ;;  %v2110_v47 = vmul.u32 %v2106_v18, %v2104_v63  ;;  %v2113_v45 = vshll.u32 %v4731_v34, 16 }
 0x5e7   :  { %v2029_v25 = vmul.f32 -0.001358992, %v2028_v58  ;;  %v2036_v11 = vmul.f32 -0.00019511016, %v2028_v58  ;;  %v2130_v37 = vmul.u32 %v2128_v60, %v2103_v53  ;;  %v2131_v18 = vmul.u32 %v2127_v56, %v2104_v63 }
 0x5e8   :  { %vm2115_vm6 = vc.u32 %v2107_v10, %v2111_v2  ;;  %v2117_v26 = vadd.s32 %v2111_v2, %v2107_v10  ;;  %v2511_v5 = vsel %vm2509_vm1, %v4715_v51, %v5221_v36  ;;  %v2514_v2 = vsel %vm2512_vm2, %v5227_v46, %v4718_v22 }
 0x5e9   :  { %v2030_v39 = vadd.f32 0.041655596, %v2029_v25  ;;  %v2037_v9 = vadd.f32 0.008332121, %v2036_v11  ;;  %v2116_v35 = vsel %vm2115_vm6, 1, %v5232_v1  ;;  %v2129_v11 = vmul.u32 %v2127_v56, %v2103_v53 }
 0x5ea   :  { %v2118_v62 = vadd.s32 %v2116_v35, %v2110_v47  ;;  %vm2119_vm7 = vc.u32 %v2117_v26, %v2113_v45  ;;  %v2133_v36 = vshll.u32 %v2130_v37, 16  ;;  %v2515_v47 = vsel %vm2508_vm3, %v2511_v5, %v2514_v2 }
 0x5eb   :  { %v2031_v12 = vmul.f32 %v2030_v39, %v2028_v58  ;;  %v2038_v57 = vmul.f32 %v2037_v9, %v2028_v58  ;;  %v2120_v10 = vsel %vm2119_vm7, 1, %v5232_v1  ;;  %v2112_v39 = vshrl.u32 %v2108_v8, 16 }
 0x5ec   :  { %v2122_v25 = vadd.s32 %v2120_v10, %v2118_v62  ;;  %v2132_v35 = vmul.u32 %v2128_v60, %v2104_v63  ;;  %v2135_v49 = vshll.u32 %v2131_v18, 16  ;;  %vm2137_vm9 = vc.u32 %v2129_v11, %v2133_v36  ;;  %v4781_v10 = vpop.permute.xlu2 %3090 }
 0x5ed   :  { %v2032_v45 = vadd.f32 -0.4999988, %v2031_v12  ;;  %v2039_v26 = vadd.f32 -0.16666654, %v2038_v57  ;;  %v2139_v41 = vadd.s32 %v2133_v36, %v2129_v11  ;;  %v2138_v46 = vsel %vm2137_vm9, 1, %v5232_v1 }
 0x5ee   :  { %v2123_v30 = vadd.s32 %v2122_v25, %v2112_v39  ;;  %v4769_v53 = vsel %vm1889_vm5, nan, %v2515_v47  ;;  %v2140_v56 = vadd.s32 %v2138_v46, %v2132_v35  ;;  %v2222_v8 = vand.u32 31, %v4746_v4 }
 0x5ef   :  { %v2040_v33 = vmul.f32 %v2039_v26, %v2028_v58  ;;  %v2033_v24 = vmul.f32 %v2032_v45, %v2028_v58  ;;  %vm2141_vm10 = vc.u32 %v2139_v41, %v2135_v49  ;;  %v2114_v60 = vshrl.u32 %v4731_v34, 16 }
 0x5f0   :  { %v2142_v36 = vsel %vm2141_vm10, 1, %v5232_v1  ;;  %v2044_v5 = vand.u32 3, %v4703_v20  ;;  %v2134_v62 = vshrl.u32 %v2130_v37, 16  ;;  %v2093_v57 = vsel %vm2087_vm0, %v2090_v27, %v2092_v32 }
 0x5f1   :  { %v3124_v9 = vpop.permute.xlu0 %3123  ;;  %v2041_v63 = vadd.f32 1.0, %v2040_v33  ;;  %v2144_v12 = vadd.s32 %v2142_v36, %v2140_v56  ;;  %v4779_v58 = vadd.s32 %v2123_v30, %v2114_v60  ;;  %v2136_v46 = vshrl.u32 %v2131_v18, 16 }
 0x5f2   :  { %v3137_v13 = vsel %vm1659_vm8, %v3124_v9, -inf  ;;  %v4783_v33 = vadd.f32 1.0, %v2033_v24  ;;  %v5228_v37 = vand.u32 2147483647, %v4633_v6  ;;  %v4789_v25 = vsub.s32 32, %v2222_v8 }
 0x5f3   :  { %3138 = vmax.index.xlane.f32.xlu2 %v3137_v13  ;;  %v2990_v13 = vmul.f32 %v4769_v53, %v4396_v50  ;;  %v4786_v34 = vmul.f32 %v2041_v63, %v4729_v59  ;;  %v2145_v2 = vadd.s32 %v2144_v12, %v2134_v62  ;;  %v4791_v11 = vadd.s32 %v2139_v41, %v2135_v49 }
 0x5f4   :  { %vm2046_vm11 = vcmp.eq.s32.totalorder %v2044_v5, 0  ;;  %v2147_v52 = vmul.u32 %v4645_v42, %v2093_v57  ;;  %v5229_v27 = vxor.u32 2147483648, %v4783_v33  ;;  %v2215_v32 = vand.u32 8388607, %v5228_v37 }
 0x5f5   :  { %v2146_v30 = vadd.s32 %v2145_v2, %v2136_v46  ;;  %vm2149_vm12 = vc.u32 %v4779_v58, %v4791_v11  ;;  %v5230_v59 = vxor.u32 2147483648, %v4786_v34  ;;  %v2225_v47 = vshll.u32 %v5231_v14, %v2222_v8 }
 0x5f6   :  { %v2226_v45 = vshrl.u32 %v3735_v19, %v4789_v25  ;;  %v2228_v26 = vshll.u32 %v3735_v19, %v2222_v8  ;;  %v2229_v42 = vshrl.u32 %v3736_v23, %v4789_v25  ;;  %v5241_v9 = vmov 2102212464  }
 0x5f7   :  { %v2150_v18 = vadd.s32 1, %v2146_v30  ;;  %v2232_v35 = vshrl.u32 %v5241_v9, %v4789_v25  ;;  %v2234_v49 = vshll.u32 %v5241_v9, %v2222_v8  ;;  %v5242_v41 = vmov 920167782  }
 0x5f8   :  { %v2235_v24 = vshrl.u32 %v5242_v41, %v4789_v25  ;;  %v4813_v56 = vshrl.u32 %v4746_v4, 5  ;;  %vm2049_vm13 = vcmp.eq.s32.totalorder %v2044_v5, 2  ;;  %v2231_v60 = vshll.u32 %v3736_v23, %v2222_v8 }
 0x5f9   :  { %2998 = vrot.lane.b32.xlu1 %v2990_v13, %s3740_s5  ;;  %v2151_v39 = vsel %vm2149_vm12, %v2150_v18, %v2146_v30  ;;  %v2048_v36 = vsel %vm2046_vm11, %v4783_v33, %v5230_v59  ;;  %v4822_v62 = vor.u32 %v2226_v45, %v2225_v47  ;;  %v4824_v12 = vor.u32 %v2229_v42, %v2228_v26 }
 0x5fa   :  { %v2152_v63 = vadd.s32 %v2151_v39, %v2147_v52  ;;  %v2236_v13 = vor.u32 %v2235_v24, %v2234_v49  ;;  %v4826_v46 = vor.u32 %v2232_v35, %v2231_v60  ;;  %v2237_v4 = vshll.u32 %v5242_v41, %v2222_v8 }
 0x5fb   :  { %v5244_v2 = vmov 1326507024   ;;  %vm2045_vm14 = vcmp.lt.s32.totalorder %v2044_v5, 2  ;;  %v2051_v30 = vsel %vm2049_vm13, %v5229_v27, %v4786_v34  ;;  %v2216_v52 = vor.u32 8388608, %v2215_v32 }
 0x5fc   :  { %v2153_v57 = vadd.s32 536870912, %v2152_v63  ;;  %v2238_v23 = vshrl.u32 %v5244_v2, %v4789_v25  ;;  %vm2240_vm15 = vcmp.lt.s32.totalorder %v4813_v56, 1  ;;  %vm2243_vm0 = vcmp.lt.s32.totalorder %v4813_v56, 4 }
 0x5fd   :  { %v2052_v45 = vsel %vm2045_vm14, %v2048_v36, %v2051_v30  ;;  %vm2242_vm1 = vcmp.lt.s32.totalorder %v4813_v56, 3  ;;  %v2248_v8 = vsel %vm2240_vm15, %v4822_v62, %v4824_v12  ;;  %v2249_v5 = vsel %vm2243_vm0, %v2236_v13, 920167782 }
 0x5fe   :  { %v4834_v18 = vshrl.u32 %v2153_v57, 30  ;;  %v2239_v47 = vor.u32 %v2238_v23, %v2237_v4  ;;  %vm2241_vm2 = vcmp.lt.s32.totalorder %v4813_v56, 2  ;;  %v2250_v26 = vsel %vm2242_vm1, %v4826_v46, %v2249_v5 }
 0x5ff   :  { %v4816_v19 = vpop.xlane.xlu2 %3107  ;;  %vm2043_vm3 = vweird.f32 %v4458_v38  ;;  %v2251_v42 = vsel %vm2241_vm2, %v2248_v8, %v2250_v26  ;;  %v2252_v39 = vsel %vm2240_vm15, %v4824_v12, %v4826_v46  ;;  %v4863_v24 = vshll.u32 %v2216_v52, 8 }
 0x600   :  { %5243 = vst [vmem:[#allocation5_spill] sm:$0xff] %v4816_v19  ;;  %v2155_v32 = vshll.u32 %v4834_v18, 30  ;;  %v2253_v9 = vsel %vm2243_vm0, %v2239_v47, 1326507024  ;;  %v2053_v35 = vsel %vm2043_vm3, nan, %v2052_v45  ;;  %v2282_v2 = vshrl.u32 %v2251_v42, 16 }
 0x601   :  { %v2254_v41 = vsel %vm2242_vm1, %v2236_v13, %v2253_v9  ;;  %v4869_v23 = vmul.f32 %v2053_v35, %v4410_v61  ;;  %v2257_v52 = vand.u32 65535, %v4863_v24  ;;  %v2258_v47 = vshrl.u32 %v4863_v24, 16 }
 0x602   :  { %v2156_v49 = vsub.s32 %v2152_v63, %v2155_v32  ;;  %v2255_v36 = vsel %vm2241_vm2, %v2252_v39, %v2254_v41  ;;  %v4872_v63 = vand.u32 3, %v4626_v43  ;;  %v2281_v45 = vand.u32 65535, %v2251_v42 }
 0x603   :  { %v2259_v30 = vand.u32 65535, %v2255_v36  ;;  %v2260_v5 = vshrl.u32 %v2255_v36, 16  ;;  %v2284_v26 = vmul.u32 %v2282_v2, %v2257_v52  ;;  %v4880_v43 = vadd.s32 3, %v4703_v20 }
 0x604   :  { %vm2157_vm4 = vcmp.lt.s32.totalorder %v2156_v49, 0  ;;  %v2158_v4 = vsub.s32 0, %v2156_v49  ;;  %vm1892_vm6 = vcmp.eq.s32.totalorder %v4872_v63, 0  ;;  %v2148_v9 = vadd.s32 %v4791_v11, %v4779_v58 }
 0x605   :  { %v2263_v32 = vmul.u32 %v2259_v30, %v2258_v47  ;;  %v2261_v35 = vmul.u32 %v2259_v30, %v2257_v52  ;;  %v2262_v41 = vmul.u32 %v2260_v5, %v2257_v52  ;;  %v2286_v1 = vmul.u32 %v2282_v2, %v2258_v47 }
 0x606   :  { %v2159_v13 = vsel %vm2157_vm4, %v2158_v4, %v2156_v49  ;;  %v2283_v4 = vmul.u32 %v2281_v45, %v2257_v52  ;;  %v5245_v19 = vmov 0   ;;  %vm1895_vm12 = vcmp.eq.s32.totalorder %v4872_v63, 2 }
 0x607   :  { %v3120_v60 = vpop.permute.xlu2 %3119  ;;  %v2160_v8 = vclz %v2159_v13  ;;  %v2287_v13 = vshll.u32 %v2284_v26, 16  ;;  %v2267_v27 = vshll.u32 %v2263_v32, 16  ;;  %vm1891_vm13 = vcmp.lt.s32.totalorder %v4872_v63, 2 }
 0x608   :  { %v3131_v57 = vsel %vm1659_vm8, %v3120_v60, -inf  ;;  %v2285_v60 = vmul.u32 %v2281_v45, %v2258_v47  ;;  %v2178_v56 = vsub.s32 4, %v4834_v18 }
 0x609   :  { %3132 = vmax.index.xlane.f32.xlu0 %v3131_v57  ;;  %v3583_v39 = vadd.s32 4294967294, %v2160_v8  ;;  %v2264_v57 = vmul.u32 %v2260_v5, %v2258_v47  ;;  %v2265_v8 = vshll.u32 %v2262_v41, 16  ;;  %vm2291_vm10 = vc.u32 %v2283_v4, %v2287_v13 }
 0x60a   :  { %v2289_v11 = vshll.u32 %v2285_v60, 16  ;;  %v2292_v52 = vsel %vm2291_vm10, 1, %v5245_v19 }
 0x60b   :  { %3048 = vrot.lane.b32.xlu2 %v4869_v23, %s3740_s5  ;;  %vm3584_vm7 = vcmp.lt.s32.totalorder %v3583_v39, 0  ;;  %vm2269_vm9 = vc.u32 %v2261_v35, %v2265_v8  ;;  %v2271_v58 = vadd.s32 %v2265_v8, %v2261_v35 }
 0x60c   :  { %v2163_v37 = vsel %vm3584_vm7, 0, %v3583_v39  ;;  %v2270_v5 = vsel %vm2269_vm9, 1, %v5245_v19  ;;  %v2293_v39 = vadd.s32 %v2287_v13, %v2283_v4  ;;  %v2288_v4 = vshrl.u32 %v2284_v26, 16 }
 0x60d   :  { %v2164_v59 = vsub.s32 32, %v2163_v37  ;;  %v2165_v20 = vshll.u32 %v2156_v49, %v2163_v37  ;;  %v2168_v14 = vsub.s32 4294967266, %v2163_v37  ;;  %v2272_v45 = vadd.s32 %v2270_v5, %v2264_v57 }
 0x60e   :  { %v5246_v49 = vxor.u32 2147483648, %v4718_v22  ;;  %vm2295_vm11 = vc.u32 %v2293_v39, %v2289_v11 }
 0x60f   :  { %v3126_v42 = vpop.permute.xlu2 %3125  ;;  %v2166_v30 = vshrl.u32 %v2148_v9, %v2164_v59  ;;  %v2169_v28 = vadd.s32 127, %v2168_v14  ;;  %v2245_v14 = vsel %vm2243_vm0, %v4826_v46, 2102212464  ;;  %v2266_v59 = vshrl.u32 %v2262_v41, 16 }
 0x610   :  { %v3140_v36 = vsel %vm1659_vm8, %v3126_v42, -inf  ;;  %vm2273_vm8 = vc.u32 %v2271_v58, %v2267_v27  ;;  %v2294_v42 = vadd.s32 %v2292_v52, %v2286_v1  ;;  %v1894_v37 = vsel %vm1892_vm6, %v4715_v51, %v5246_v49 }
 0x611   :  { %3141 = vmax.index.xlane.f32.xlu0 %v3140_v36  ;;  %v2167_v55 = vor.u32 %v2166_v30, %v2165_v20  ;;  %v2170_v36 = vshll.u32 %v2169_v28, 23  ;;  %v2274_v2 = vsel %vm2273_vm8, 1, %v5245_v19  ;;  %v5247_v1 = vmov 683565275  }
 0x612   :  { %v2276_v47 = vadd.s32 %v2274_v2, %v2272_v45  ;;  %v2224_v9 = vshrl.u32 %v5247_v1, %v4789_v25  ;;  %v2268_v28 = vshrl.u32 %v2263_v32, 16  ;;  %v2296_v35 = vsel %vm2295_vm11, 1, %v5245_v19 }
 0x613   :  { %v2171_v27 = vor.u32 4788187, %v2170_v36  ;;  %v2298_v13 = vadd.s32 %v2296_v35, %v2294_v42  ;;  %v2174_v20 = vcvt.s32.f32 %v2167_v55  ;;  %v3741_v58 = vmov 2  }
 0x614   :  { %v2277_v57 = vadd.s32 %v2276_v47, %v2266_v59  ;;  %3705 = vset.pattern.permute.xlu2 %v3741_v58  ;;  %v2244_v46 = vsel %vm2240_vm15, %v2224_v9, %v4822_v62  ;;  %v2246_v41 = vsel %vm2242_vm1, %v4824_v12, %v2245_v14  ;;  %3707 = vset.pattern.permute.xlu1 %v3741_v58  ;;  %v2290_v32 = vshrl.u32 %v2285_v60, 16 }
 0x615   :  { %v2172_v8 = vand.u32 2147483647, %v2171_v27  ;;  %v2299_v26 = vadd.s32 %v2298_v13, %v2288_v4  ;;  %3706 = vset.pattern.permute.xlu0 %v3741_v58  ;;  %v5248_v55 = vxor.u32 2147483648, %v4715_v51  ;;  %v4912_v62 = vadd.s32 %v2293_v39, %v2289_v11 }
 0x616   :  { %v4906_v25 = vadd.s32 %v2277_v57, %v2268_v28  ;;  %v2662_v12 = vand.u32 3, %v4880_v43  ;;  %v2247_v45 = vsel %vm2241_vm2, %v2244_v46, %v2246_v41  ;;  %v5249_v60 = vand.u32 2147483647, %v4607_v44 }
 0x617   :  { %v2175_v30 = vmul.f32 %v2174_v20, %v2172_v8  ;;  %v1897_v5 = vsel %vm1895_vm12, %v5248_v55, %v4718_v22  ;;  %v2300_v42 = vadd.s32 %v2299_v26, %v2290_v32  ;;  %vm2056_vm0 = vcmp.lt.s32.totalorder %v4607_v44, 0 }
 0x618   :  { %v1898_v52 = vsel %vm1891_vm13, %v1894_v37, %v1897_v5  ;;  %vm2303_vm14 = vc.u32 %v4906_v25, %v4912_v62  ;;  %vm4921_vm15 = vcmp.le.f32.partialorder %v5249_v60, 0.7853982  ;;  %v2301_v11 = vmul.u32 %v4863_v24, %v2247_v45 }
 0x619   :  { %v2176_v36 = vxor.u32 2147483648, %v2175_v30  ;;  %v2304_v51 = vadd.s32 1, %v2300_v42  ;;  %v1899_v43 = vsel %vm1889_vm5, nan, %v1898_v52  ;;  %vm2664_vm1 = vcmp.eq.s32.totalorder %v2662_v12, 0 }
 0x61a   :  { %v5252_v2 = vxor.u32 2147483648, %v4786_v34  ;;  %vm2667_vm2 = vcmp.eq.s32.totalorder %v2662_v12, 2  ;;  %v4939_v47 = vmul.f32 %v1899_v43, %v4396_v50  ;;  %vm2663_vm4 = vcmp.lt.s32.totalorder %v2662_v12, 2 }
 0x61b   :  { %v2177_v22 = vsel %vm2056_vm0, %v2176_v36, %v2175_v30  ;;  %v2305_v49 = vsel %vm2303_vm14, %v2304_v51, %v2300_v42  ;;  %v5253_v24 = vxor.u32 2147483648, %v4783_v33  ;;  %v2179_v1 = vsel %vm2056_vm0, %v2178_v56, %v4834_v18 }
 0x61c   :  { %v2180_v39 = vsel %vm4921_vm15, %v4607_v44, %v2177_v22  ;;  %v2666_v14 = vsel %vm2664_vm1, %v4783_v33, %v5252_v2  ;;  %v2306_v59 = vadd.s32 %v2305_v49, %v2301_v11  ;;  %v2181_v20 = vsel %vm4921_vm15, 0, %v2179_v1 }
 0x61d   :  { %v2182_v37 = vmul.f32 %v2180_v39, %v2180_v39  ;;  %v2669_v27 = vsel %vm2667_vm2, %v5253_v24, %v4786_v34  ;;  %v2816_v32 = vadd.s32 3, %v2181_v20  ;;  %v2198_v12 = vand.u32 3, %v2181_v20 }
 0x61e   :  { %v2307_v35 = vadd.s32 536870912, %v2306_v59  ;;  %v2670_v57 = vsel %vm2663_vm4, %v2666_v14, %v2669_v27  ;;  %vm2210_vm13 = vcmp.lt.s32.totalorder %v4633_v6, 0 }
 0x61f   :  { %v2183_v9 = vmul.f32 -0.001358992, %v2182_v37  ;;  %v2190_v28 = vmul.f32 -0.00019511016, %v2182_v37  ;;  %v4955_v58 = vsel %vm2043_vm3, nan, %v2670_v57  ;;  %v2817_v36 = vand.u32 3, %v2816_v32 }
 0x620   :  { %v4949_v8 = vshrl.u32 %v2307_v35, 30  ;;  %v2991_v30 = vmul.f32 %v4955_v58, %v4410_v61  ;;  %vm2197_vm3 = vweird.f32 %v4607_v44  ;;  %vm2199_vm6 = vcmp.lt.s32.totalorder %v2198_v12, 2 }
 0x621   :  { %v2184_v4 = vadd.f32 0.041655596, %v2183_v9  ;;  %v2191_v13 = vadd.f32 0.008332121, %v2190_v28  ;;  %vm2200_vm7 = vcmp.eq.s32.totalorder %v2198_v12, 0  ;;  %vm2203_vm9 = vcmp.eq.s32.totalorder %v2198_v12, 2 }
 0x622   :  { %v2309_v18 = vshll.u32 %v4949_v8, 30  ;;  %vm2818_vm10 = vcmp.lt.s32.totalorder %v2817_v36, 2  ;;  %vm2819_vm8 = vcmp.eq.s32.totalorder %v2817_v36, 0  ;;  %vm2822_vm11 = vcmp.eq.s32.totalorder %v2817_v36, 2 }
 0x623   :  { %v2185_v33 = vmul.f32 %v2184_v4, %v2182_v37  ;;  %v2192_v34 = vmul.f32 %v2191_v13, %v2182_v37 }
 0x624   :  { %v2310_v26 = vsub.s32 %v2306_v59, %v2309_v18 }
 0x625   :  { %3046 = vrot.lane.b32.xlu0 %v4939_v47, %s3740_s5  ;;  %v2186_v46 = vadd.f32 -0.4999988, %v2185_v33  ;;  %v2193_v41 = vadd.f32 -0.16666654, %v2192_v34  ;;  %v4981_v33 = vld [vmem:[%s5217_s1] sm:$0xff] }
 0x626   :  { %vm2311_vm5 = vcmp.lt.s32.totalorder %v2310_v26, 0  ;;  %v2312_v52 = vsub.s32 0, %v2310_v26 }
 0x627   :  { %v2187_v55 = vmul.f32 %v2186_v46, %v2182_v37  ;;  %v2194_v5 = vmul.f32 %v2193_v41, %v2182_v37  ;;  %v3098_v41 = vsub.f32 %v4981_v33, %v4433_v21 }
 0x628   :  { %v2313_v60 = vsel %vm2311_vm5, %v2312_v52, %v2310_v26  ;;  %v2332_v52 = vsub.s32 4, %v4949_v8 }
 0x629   :  { %v2188_v45 = vadd.f32 1.0, %v2187_v55  ;;  %v2195_v42 = vadd.f32 1.0, %v2194_v5  ;;  %v2314_v63 = vclz %v2313_v60  ;;  %v5254_v55 = vand.u32 2147483647, %v4633_v6 }
 0x62a   :  { %v2333_v60 = vsel %vm2210_vm13, %v2332_v52, %v4949_v8 }
 0x62b   :  { %v2196_v51 = vmul.f32 %v2195_v42, %v2180_v39  ;;  %v2204_v22 = vxor.u32 2147483648, %v2188_v45  ;;  %v3586_v56 = vadd.s32 4294967294, %v2314_v63  ;;  %v2302_v39 = vadd.s32 %v4912_v62, %v4906_v25 }
 0x62c   :  { %vm2209_vm14 = vcmp.le.f32.partialorder %v5254_v55, 0.7853982 }
 0x62d   :  { %3000 = vrot.lane.b32.xlu0 %v2991_v30, %s3740_s5  ;;  %v2201_v43 = vxor.u32 2147483648, %v2196_v51  ;;  %v2205_v11 = vsel %vm2203_vm9, %v2204_v22, %v2196_v51  ;;  %vm3587_vm12 = vcmp.lt.s32.totalorder %v3586_v56, 0  ;;  %v2824_v2 = vsel %vm2822_vm11, %v2204_v22, %v2196_v51  ;;  %v4989_v30 = vld [vmem:[%s5217_s1 + $0x18] sm:$0xff] }
 0x62e   :  { %v2317_v14 = vsel %vm3587_vm12, 0, %v3586_v56  ;;  %v3101_v21 = vsub.f32 %v4989_v30, %v4630_v16  ;;  %v2335_v22 = vsel %vm2209_vm14, 0, %v2333_v60  ;;  %vm3177_vm9 = vcmp.eq.s32.totalorder %v4414_v3, 2 }
 0x62f   :  { %v2202_v49 = vsel %vm2200_vm7, %v2188_v45, %v2201_v43  ;;  %v2821_v37 = vsel %vm2819_vm8, %v2188_v45, %v2201_v43  ;;  %v2318_v27 = vsub.s32 32, %v2317_v14  ;;  %v2322_v28 = vsub.s32 4294967266, %v2317_v14 }
 0x630   :  { %v2206_v59 = vsel %vm2199_vm6, %v2202_v49, %v2205_v11  ;;  %v2825_v24 = vsel %vm2818_vm10, %v2821_v37, %v2824_v2  ;;  %v2319_v13 = vshll.u32 %v2310_v26, %v2317_v14  ;;  %v3724_v37 = vld [vmem:[%s5216_s10 + $0x8] sm:$0xff]  ;;  %v2971_v16 = vadd.s32 3, %v2335_v22 }
 0x631   :  { %v2207_v1 = vsel %vm2197_vm3, nan, %v2206_v59  ;;  %v4968_v9 = vsel %vm2197_vm3, nan, %v2825_v24  ;;  %v2320_v4 = vshrl.u32 %v2302_v39, %v2318_v27  ;;  %v2323_v20 = vadd.s32 127, %v2322_v28 }
 0x632   :  { %v4971_v35 = vmul.f32 %v2207_v1, %v4444_v29  ;;  %v2992_v57 = vmul.f32 %v4968_v9, %v4444_v29  ;;  %v5002_v2 = vadd.f32 %v3724_v37, %v4405_v7  ;;  %v2352_v39 = vand.u32 3, %v2335_v22 }
 0x633   :  { %v2321_v25 = vor.u32 %v2320_v4, %v2319_v13  ;;  %v2324_v62 = vshll.u32 %v2323_v20, 23  ;;  %v2972_v27 = vand.u32 3, %v2971_v16  ;;  %vm2351_vm3 = vweird.f32 %v4633_v6 }
 0x634   :  { %3050 = vrot.lane.b32.xlu1 %v4971_v35, %s3740_s5  ;;  %3002 = vrot.lane.b32.xlu2 %v2992_v57, %s3740_s5  ;;  %vm2353_vm15 = vcmp.lt.s32.totalorder %v2352_v39, 2  ;;  %vm2354_vm0 = vcmp.eq.s32.totalorder %v2352_v39, 0  ;;  %vm2357_vm5 = vcmp.eq.s32.totalorder %v2352_v39, 2  ;;  %v3034_v22 = vsub.f32 0.0, %v4396_v50 }
 0x635   :  { %v2325_v34 = vor.u32 4788187, %v2324_v62  ;;  %v2328_v46 = vcvt.s32.f32 %v2321_v25  ;;  %vm2973_vm1 = vcmp.lt.s32.totalorder %v2972_v27, 2  ;;  %vm2974_vm2 = vcmp.eq.s32.totalorder %v2972_v27, 0 }
 0x636   :  { %vm2977_vm4 = vcmp.eq.s32.totalorder %v2972_v27, 2  ;;  %vm3152_vm6 = vcmp.eq.s32.totalorder %v4414_v3, 1  ;;  %vm3147_vm7 = vcmp.eq.s32.totalorder %v4414_v3, 0  ;;  %vm3202_vm10 = vcmp.eq.s32.totalorder %v4414_v3, 3 }
 0x637   :  { %v2326_v18 = vand.u32 2147483647, %v2325_v34  ;;  %vm3227_vm8 = vcmp.eq.s32.totalorder %v4414_v3, 4  ;;  %vm3252_vm11 = vcmp.eq.s32.totalorder %v4414_v3, 5  ;;  %vm3273_vm12 = vcmp.eq.s32.totalorder %v4414_v3, 6 }
 0x639   :  { %v2329_v32 = vmul.f32 %v2328_v46, %v2326_v18 }
 0x63b   :  { %v2330_v26 = vxor.u32 2147483648, %v2329_v32 }
 0x63c   :  { %3205 = vperm.xlu2 %3705, %v3098_v41  }
 0x63d   :  { %v2331_v5 = vsel %vm2210_vm13, %v2330_v26, %v2329_v32  ;;  %v5013_v32 = vld [vmem:[%s5217_s1 + $0x8] sm:$0xff]  ;;  %v5018_v26 = vld [vmem:[%s5217_s1 + $0x10] sm:$0xff]  ;;  %vm3294_vm13 = vcmp.eq.s32.totalorder %v4414_v3, 7 }
 0x63e   :  { %v2334_v12 = vsel %vm2209_vm14, %v4633_v6, %v2331_v5  ;;  %v3099_v55 = vsub.f32 %v5013_v32, %v4454_v31  ;;  %v3100_v5 = vsub.f32 %v5018_v26, %v4781_v10  ;;  %vm3299_vm14 = vcmp.eq.s32.totalorder %v4414_v3, 8 }
 0x63f   :  { %v2336_v45 = vmul.f32 %v2334_v12, %v2334_v12 }
 0x641   :  { %v2337_v42 = vmul.f32 -0.001358992, %v2336_v45  ;;  %v2344_v36 = vmul.f32 -0.00019511016, %v2336_v45 }
 0x643   :  { %v2338_v63 = vadd.f32 0.041655596, %v2337_v42  ;;  %v2345_v51 = vadd.f32 0.008332121, %v2344_v36 }
 0x644   :  { %3220 = vperm.xlu2 %3705, %v3101_v21  }
 0x645   :  { %v2339_v56 = vmul.f32 %v2338_v63, %v2336_v45  ;;  %v2346_v43 = vmul.f32 %v2345_v51, %v2336_v45 }
 0x647   :  { %v2340_v11 = vadd.f32 -0.4999988, %v2339_v56  ;;  %v2347_v49 = vadd.f32 -0.16666654, %v2346_v43 }
 0x649   :  { %v2341_v14 = vmul.f32 %v2340_v11, %v2336_v45  ;;  %v2348_v59 = vmul.f32 %v2347_v49, %v2336_v45  ;;  %v3035_v49 = vsub.f32 0.0, %v4410_v61  ;;  %v3742_v61 = vmov 3  }
 0x64b   :  { %v2342_v8 = vadd.f32 1.0, %v2341_v14  ;;  %v2349_v24 = vadd.f32 1.0, %v2348_v59  ;;  %v3039_v37 = vmul.f32 %v3035_v49, %v4955_v58  ;;  %v3115_v49 = vcvt.s32.f32 %v4683_v54 }
 0x64c   :  { %3235 = vperm.xlu2 %3705, %v5002_v2  }
 0x64d   :  { %v2350_v1 = vmul.f32 %v2349_v24, %v2334_v12  ;;  %v2358_v28 = vxor.u32 2147483648, %v2342_v8  ;;  %v3725_v12 = vld [vmem:[%s5216_s10] sm:$0xff] }
 0x64e   :  { %v1734_v45 = vadd.f32 %v3725_v12, %v4391_v48  ;;  %v3038_v48 = vmul.f32 %v3034_v22, %v4769_v53 }
 0x64f   :  { %v2355_v57 = vxor.u32 2147483648, %v2350_v1  ;;  %v2979_v4 = vsel %vm2977_vm4, %v2358_v28, %v2350_v1  ;;  %v2359_v20 = vsel %vm2357_vm5, %v2358_v28, %v2350_v1  ;;  %v3743_v28 = vmov 4  }
 0x651   :  { %v2976_v7 = vsel %vm2974_vm2, %v2342_v8, %v2355_v57  ;;  %v2356_v13 = vsel %vm2354_vm0, %v2342_v8, %v2355_v57 }
 0x652   :  { %v2980_v25 = vsel %vm2973_vm1, %v2976_v7, %v2979_v4  ;;  %v2360_v62 = vsel %vm2353_vm15, %v2356_v13, %v2359_v20  ;;  %v3744_v4 = vmov 1  }
 0x653   :  { %v2981_v34 = vsel %vm2351_vm3, nan, %v2980_v25  ;;  %v2361_v18 = vsel %vm2351_vm3, nan, %v2360_v62  ;;  %v5024_v52 = vpop.xlane.xlu1 %3135 }
 0x654   :  { %v2993_v46 = vmul.f32 %v2981_v34, %v4424_v17  ;;  %v2989_v41 = vmul.f32 %v2361_v18, %v4424_v17  ;;  %3708 = vset.pattern.permute.xlu2 %v3742_v61 }
 0x656   :  { %3004 = vrot.lane.b32.xlu1 %v2993_v46, %s3740_s5  ;;  %3052 = vrot.lane.b32.xlu0 %v2989_v41, %s3740_s5 }
 0x65e   :  { %3215 = vperm.xlu1 %3707, %v3100_v5   ;;  %3210 = vperm.xlu0 %3706, %v3099_v55  }
 0x666   :  { %3230 = vperm.xlu1 %3707, %v1734_v45   ;;  %v5032_v31 = vpop.xlane.xlu2 %3138 }
 0x66b   :  { %v2999_v21 = vpop.permute.xlu1 %2998 }
 0x66c   :  { %v3010_v42 = vadd.f32 %v2999_v21, %v4939_v47 }
 0x66e   :  { %3018 = vrot.lane.b32.xlu0 %v3010_v42, %s3732_s21  ;;  %v3049_v10 = vpop.permute.xlu2 %3048 }
 0x66f   :  { %v3059_v50 = vadd.f32 %v3049_v10, %v3039_v37 }
 0x67c   :  { %v5034_v36 = vpop.xlane.xlu0 %3132 }
 0x684   :  { %v5036_v60 = vpop.xlane.xlu0 %3141 }
 0x68e   :  { %v3003_v63 = vpop.permute.xlu2 %3002 }
 0x68f   :  { %v3012_v51 = vadd.f32 %v3003_v63, %v4971_v35  ;;  %v3036_v35 = vsub.f32 0.0, %v4444_v29  ;;  %v3727_v29 = vld [vmem:[%s5216_s10 + $0x10] sm:$0xff] }
 0x690   :  { %v1736_v58 = vadd.f32 %v3727_v29, %v4403_v0  ;;  %v3149_v29 = vsel %vm3147_vm7, %v4458_v38, 0.0 }
 0x691   :  { %3022 = vrot.lane.b32.xlu0 %v3012_v51, %s3732_s21  ;;  %v3040_v16 = vmul.f32 %v3036_v35, %v4968_v9  ;;  %v3143_v35 = vcvt.s32.f32 %v5034_v36 }
 0x696   :  { %v5067_v1 = vpop.permute.xlu2 %3205 }
 0x697   :  { %v3047_v56 = vpop.permute.xlu0 %3046 }
 0x698   :  { %v3058_v47 = vadd.f32 %v3047_v56, %v3038_v48  ;;  %v3148_v48 = vsel %vm3147_vm7, %v4461_v40, 0.0 }
 0x69a   :  { %3066 = vrot.lane.b32.xlu2 %v3058_v47, %s3740_s5 }
 0x69f   :  { %v3001_v43 = vpop.permute.xlu0 %3000 }
 0x6a0   :  { %v3011_v11 = vadd.f32 %v3001_v43, %v4869_v23  ;;  %v3726_v23 = vld [vmem:[%s5216_s10 + $0x18] sm:$0xff] }
 0x6a1   :  { %v5055_v59 = vadd.f32 %v3726_v23, %v4420_v15  ;;  %v3037_v15 = vsub.f32 0.0, %v4424_v17  ;;  %v5072_v17 = vpop.permute.xlu2 %3220 }
 0x6a2   :  { %3020 = vrot.lane.b32.xlu1 %v3011_v11, %s3732_s21 }
 0x6a3   :  { %v3041_v9 = vmul.f32 %v3037_v15, %v2981_v34 }
 0x6a6   :  { %v3051_v14 = vpop.permute.xlu1 %3050 }
 0x6a7   :  { %v3060_v53 = vadd.f32 %v3051_v14, %v3040_v16 }
 0x6a9   :  { %3070 = vrot.lane.b32.xlu0 %v3060_v53, %s3740_s5  ;;  %v5076_v13 = vpop.permute.xlu2 %3235 }
 0x6aa   :  { %3068 = vrot.lane.b32.xlu1 %v3059_v50, %s3740_s5 }
 0x6b1   :  { %3240 = vperm.xlu0 %3706, %v1736_v58  }
 0x6b2   :  { %3245 = vperm.xlu1 %3707, %v5055_v59  }
 0x6b9   :  { %3709 = vset.pattern.permute.xlu0 %v3742_v61 }
 0x6ba   :  { %3710 = vset.pattern.permute.xlu1 %v3742_v61  ;;  %3258 = vperm.xlu0 %3709, %v5002_v2   ;;  %v3150_v61 = vsel %vm3147_vm7, %v4607_v44, 0.0 }
 0x6c2   :  { %3716 = vset.pattern.permute.xlu0 %v5245_v19 }
 0x6c8   :  { %v3005_v8 = vpop.permute.xlu1 %3004  ;;  %v3053_v24 = vpop.permute.xlu0 %3052 }
 0x6c9   :  { %v3013_v39 = vadd.f32 %v3005_v8, %v2989_v41  ;;  %v3061_v27 = vadd.f32 %v3053_v24, %v3041_v9 }
 0x6cb   :  { %3072 = vrot.lane.b32.xlu2 %v3061_v27, %s3740_s5  ;;  %3024 = vrot.lane.b32.xlu1 %v3013_v39, %s3732_s21  ;;  %v5255_v27 = vld [vmem:[#allocation3_spill] sm:$0xff] }
 0x6d0   :  { %v5069_v0 = vpop.permute.xlu0 %3210  ;;  %v5080_v62 = vpop.permute.xlu1 %3215 }
 0x6d3   :  { %3254 = vperm.xlu2 %3708, %v1734_v45   ;;  %3262 = vperm.xlu1 %3710, %v1736_v58  }
 0x6d8   :  { %v3231_v46 = vpop.permute.xlu1 %3230 }
 0x6db   :  { %3266 = vperm.xlu2 %3708, %v5055_v59   ;;  %3711 = vset.pattern.permute.xlu1 %v3743_v28 }
 0x6dc   :  { %3275 = vperm.xlu1 %3711, %v1734_v45  }
 0x6e0   :  { %v3019_v57 = vpop.permute.xlu0 %3018 }
 0x6e1   :  { %v3030_v7 = vsub.f32 %v4981_v33, %v3019_v57 }
 0x6e3   :  { %3713 = vset.pattern.permute.xlu2 %v3744_v4 }
 0x6e4   :  { %3712 = vset.pattern.permute.xlu1 %v5245_v19 }
 0x6e5   :  { %3155 = vperm.xlu1 %3712, %v3030_v7  }
 0x6ed   :  { %3715 = vset.pattern.permute.xlu1 %v3744_v4 }
 0x6f4   :  { %v3067_v20 = vpop.permute.xlu2 %3066 }
 0x6f5   :  { %v3078_v25 = vsub.f32 %v4981_v33, %v3067_v20 }
 0x6f7   :  { %3180 = vperm.xlu2 %3713, %v3078_v25  }
 0x6ff   :  { %3714 = vset.pattern.permute.xlu2 %v5245_v19 }
 0x703   :  { %v3023_v34 = vpop.permute.xlu0 %3022 }
 0x704   :  { %v3032_v18 = vsub.f32 %v5018_v26, %v3023_v34 }
 0x706   :  { %3165 = vperm.xlu0 %3716, %v3032_v18  }
 0x70e   :  { %3721 = vset.pattern.permute.xlu0 %v3743_v28 }
 0x70f   :  { %3283 = vperm.xlu0 %3721, %v1736_v58  }
 0x714   :  { %v3021_v41 = vpop.permute.xlu1 %3020 }
 0x715   :  { %v3031_v55 = vsub.f32 %v5013_v32, %v3021_v41 }
 0x717   :  { %3160 = vperm.xlu2 %3714, %v3031_v55   ;;  %v3151_v55 = vsel %vm3147_vm7, %v4633_v6, 0.0 }
 0x71b   :  { %v3071_v33 = vpop.permute.xlu0 %3070 }
 0x71c   :  { %v3069_v5 = vpop.permute.xlu1 %3068  ;;  %v3080_v45 = vsub.f32 %v5018_v26, %v3071_v33 }
 0x71d   :  { %v3079_v12 = vsub.f32 %v5013_v32, %v3069_v5 }
 0x71f   :  { %3717 = vset.pattern.permute.xlu2 %v3744_v4  ;;  %3185 = vperm.xlu1 %3715, %v3079_v12  }
 0x720   :  { %3190 = vperm.xlu2 %3717, %v3080_v45  }
 0x723   :  { %v3241_v11 = vpop.permute.xlu0 %3240 }
 0x724   :  { %v5088_v21 = vpop.permute.xlu1 %3245 }
 0x725   :  { %v3073_v63 = vpop.permute.xlu2 %3072 }
 0x726   :  { %v3081_v32 = vsub.f32 %v4989_v30, %v3073_v63 }
 0x727   :  { %3718 = vset.pattern.permute.xlu1 %v5245_v19 }
 0x728   :  { %3720 = vset.pattern.permute.xlu2 %v3743_v28 }
 0x729   :  { %3279 = vperm.xlu2 %3720, %v5002_v2  }
 0x72c   :  { %v3259_v53 = vpop.permute.xlu0 %3258 }
 0x72d   :  { %v3255_v51 = vpop.permute.xlu2 %3254 }
 0x735   :  { %v5093_v22 = vpop.permute.xlu2 %3266 }
 0x73d   :  { %v3025_v42 = vpop.permute.xlu1 %3024 }
 0x73e   :  { %v3033_v10 = vsub.f32 %v4989_v30, %v3025_v42 }
 0x740   :  { %3170 = vperm.xlu1 %3718, %v3033_v10   ;;  %v5257_v10 = vld [vmem:[#allocation4_spill] sm:$0xff] }
 0x741   :  { %v3118_v63 = vcvt.s32.f32 %v5257_v10 }
 0x745   :  { %v3263_v26 = vpop.permute.xlu1 %3262 }
 0x748   :  { %3719 = vset.pattern.permute.xlu1 %v3744_v4 }
 0x749   :  { %3195 = vperm.xlu1 %3719, %v3081_v32  }
 0x74e   :  { %v3276_v19 = vpop.permute.xlu1 %3275 }
 0x751   :  { %3722 = vset.pattern.permute.xlu1 %v3743_v28  ;;  %v3181_v56 = vpop.permute.xlu2 %3180  ;;  %v5256_v28 = vld [vmem:[#allocation5_spill] sm:$0xff] }
 0x752   :  { %3287 = vperm.xlu1 %3722, %v5055_v59   ;;  %v3116_v57 = vcvt.s32.f32 %v5256_v28 }
 0x757   :  { %v3156_v2 = vpop.permute.xlu1 %3155 }
 0x758   :  { %v3173_v30 = vsel %vm3152_vm6, %v3156_v2, %v3148_v48 }
 0x759   :  { %v3198_v47 = vsel %vm3177_vm9, %v3181_v56, %v3173_v30 }
 0x75a   :  { %v3223_v43 = vsel %vm3202_vm10, %v5067_v1, %v3198_v47  ;;  %v3117_v1 = vcvt.s32.f32 %v5255_v27 }
 0x75b   :  { %v3248_v40 = vsel %vm3227_vm8, %v3231_v46, %v3223_v43 }
 0x75c   :  { %v3269_v37 = vsel %vm3252_vm11, %v3255_v51, %v3248_v40 }
 0x75d   :  { %v3290_v50 = vsel %vm3273_vm12, %v3276_v19, %v3269_v37 }
 0x75e   :  { %v3295_v16 = vsel %vm3294_vm13, %v3115_v49, %v3290_v50 }
 0x75f   :  { %v3300_v54 = vsel %vm3299_vm14, %v3143_v35, %v3295_v16 }
 0x760   :  { %3304 = vst [vmem:[%s5218_s11] sm:$0xff] %v3300_v54 }
 0x771   :  { %v3161_v14 = vpop.permute.xlu2 %3160 }
 0x772   :  { %v3174_v15 = vsel %vm3152_vm6, %v3161_v14, %v3149_v29 }
 0x778   :  { %v3166_v36 = vpop.permute.xlu0 %3165 }
 0x779   :  { %v3175_v58 = vsel %vm3152_vm6, %v3166_v36, %v3150_v61 }
 0x77a   :  { %v3191_v23 = vpop.permute.xlu2 %3190 }
 0x77b   :  { %v3200_v9 = vsel %vm3177_vm9, %v3191_v23, %v3175_v58 }
 0x77c   :  { %v3225_v44 = vsel %vm3202_vm10, %v5080_v62, %v3200_v9  ;;  %v3145_v62 = vcvt.s32.f32 %v5032_v31 }
 0x77d   :  { %v3250_v24 = vsel %vm3227_vm8, %v3241_v11, %v3225_v44 }
 0x77e   :  { %v3271_v25 = vsel %vm3252_vm11, %v3263_v26, %v3250_v24  ;;  %v3146_v26 = vcvt.s32.f32 %v5036_v60 }
 0x781   :  { %v3284_v7 = vpop.permute.xlu0 %3283 }
 0x783   :  { %v3280_v4 = vpop.permute.xlu2 %3279 }
 0x791   :  { %v3186_v59 = vpop.permute.xlu1 %3185 }
 0x792   :  { %v3199_v8 = vsel %vm3177_vm9, %v3186_v59, %v3174_v15 }
 0x793   :  { %v3224_v38 = vsel %vm3202_vm10, %v5069_v0, %v3199_v8  ;;  %v3144_v0 = vcvt.s32.f32 %v5024_v52 }
 0x794   :  { %v3249_v39 = vsel %vm3227_vm8, %v5076_v13, %v3224_v38  ;;  %v3292_v13 = vsel %vm3273_vm12, %v3284_v7, %v3271_v25 }
 0x795   :  { %v3270_v20 = vsel %vm3252_vm11, %v3259_v53, %v3249_v39  ;;  %v3297_v46 = vsel %vm3294_vm13, %v3117_v1, %v3292_v13 }
 0x796   :  { %v3291_v34 = vsel %vm3273_vm12, %v3280_v4, %v3270_v20  ;;  %v3302_v52 = vsel %vm3299_vm14, %v3145_v62, %v3297_v46 }
 0x797   :  { %v3296_v18 = vsel %vm3294_vm13, %v3116_v57, %v3291_v34  ;;  %3306 = vst [vmem:[%s5218_s11 + $0x10] sm:$0xff] %v3302_v52 }
 0x798   :  { %v3301_v41 = vsel %vm3299_vm14, %v3144_v0, %v3296_v18 }
 0x799   :  { %3305 = vst [vmem:[%s5218_s11 + $0x8] sm:$0xff] %v3301_v41 }
 0x7b2   :  { %v3171_v31 = vpop.permute.xlu1 %3170 }
 0x7b3   :  { %v3176_v5 = vsel %vm3152_vm6, %v3171_v31, %v3151_v55 }
 0x7bb   :  { %v3196_v12 = vpop.permute.xlu1 %3195 }
 0x7bc   :  { %v3201_v33 = vsel %vm3177_vm9, %v3196_v12, %v3176_v5 }
 0x7bd   :  { %v3226_v45 = vsel %vm3202_vm10, %v5072_v17, %v3201_v33 }
 0x7be   :  { %v3251_v42 = vsel %vm3227_vm8, %v5088_v21, %v3226_v45 }
 0x7bf   :  { %v3272_v6 = vsel %vm3252_vm11, %v5093_v22, %v3251_v42 }
 0x7c4   :  { %v3288_v32 = vpop.permute.xlu1 %3287 }
 0x7c5   :  { %v3293_v51 = vsel %vm3273_vm12, %v3288_v32, %v3272_v6 }
 0x7c6   :  { %v3298_v19 = vsel %vm3294_vm13, %v3118_v63, %v3293_v51 }
 0x7c7   :  { %v3303_v17 = vsel %vm3299_vm14, %v3146_v26, %v3298_v19 }
 0x7c8   :  { %3307 = vst [vmem:[%s5218_s11 + $0x18] sm:$0xff] %v3303_v17 }

</bundles_post_ra>
